<compile_context>
chip_gen: v6e
topology: v6e:2x2x1
jax: 0.10.0
libtpu: 0.0.40
codegen_flags: <defaults>
</compile_context>

<pallas_src>
import functools

import jax
import jax.numpy as jnp
from jax import lax
from jax.experimental import pallas as pl
from jax.experimental.pallas import tpu as pltpu

EPS = 1e-5
INV_STD = 1.0 / (1.0 + EPS) ** 0.5  # eval batch_norm with running (mean=0, var=1)
N_SEGMENT = 8
NUM_GROUPS = 4


# ----------------------------- Pallas kernels -----------------------------

def _stage1_kernel(x_ref, w1_ref, w2_ref, y2_ref, fm_ref, ypad_ref, cat_ref,
                   *, H, W):
    """conv1(1x1)+relu -> conv2(3x3) as ONE matmul via VMEM im2col -> frame mean."""
    tf, HW, Cin = x_ref.shape
    planes = w1_ref.shape[1]

    # conv1 (1x1) + bn1 (INV_STD pre-folded into w1) + relu; bf16 MXU operands.
    x_rows = x_ref[...].reshape(tf * HW, Cin)                       # bf16
    y1 = jnp.dot(x_rows, w1_ref[...], preferred_element_type=jnp.float32)
    y1 = jnp.maximum(y1, 0.0)

    # Halo image in VMEM (pad = 1 per spatial side).  Only the 1-wide border is
    # zeroed each step; the interior is fully overwritten below.  Correctness
    # invariant: nothing else ever writes non-zero data to the border.
    zrow = jnp.zeros((tf, 1, W + 2, planes), jnp.float32)
    zcol = jnp.zeros((tf, H, 1, planes), jnp.float32)
    ypad_ref[:, 0:1, :, :] = zrow
    ypad_ref[:, H + 1:H + 2, :, :] = zrow
    ypad_ref[:, 1:H + 1, 0:1, :] = zcol
    ypad_ref[:, 1:H + 1, W + 1:W + 2, :] = zcol
    ypad_ref[:, 1:H + 1, 1:W + 1, :] = y1.reshape(tf, H, W, planes)

    # conv2 (3x3): build the im2col operand once in VMEM, then a single MXU
    # matmul with K = 9*planes (instead of nine K=planes matmuls + VPU adds).
    for kh in range(3):
        for kw in range(3):
            k = kh * 3 + kw
            tap = ypad_ref[:, kh:kh + H, kw:kw + W, :].reshape(tf * HW, planes)
            cat_ref[:, k * planes:(k + 1) * planes] = tap
    acc = jnp.dot(cat_ref[...].astype(jnp.bfloat16), w2_ref[...],
                  preferred_element_type=jnp.float32)

    y2_img = acc.reshape(tf, HW, planes)
    y2_ref[...] = y2_img.astype(y2_ref.dtype)          # bf16 inter-stage buffer
    # fused spatial part of CT_DNR's AdaptiveAvgPool (per-frame channel mean),
    # taken from the f32 accumulator (before the bf16 cast) for LSTM accuracy.
    fm_ref[...] = jnp.mean(y2_img, axis=1).astype(fm_ref.dtype)


def conv1_conv2_framemean(x_rows3, w1m, w2m, *, H, W, tf, vmem_limit_bytes=None):
    NT, HW, Cin = x_rows3.shape
    planes = w1m.shape[1]
    kernel = functools.partial(_stage1_kernel, H=H, W=W)
    return pl.pallas_call(
        kernel,
        out_shape=(jax.ShapeDtypeStruct((NT, HW, planes), jnp.bfloat16),
                   jax.ShapeDtypeStruct((NT, planes), jnp.float32)),
        grid_spec=pltpu.PrefetchScalarGridSpec(
            num_scalar_prefetch=0,
            grid=(NT // tf,),
            in_specs=[
                pl.BlockSpec((tf, HW, Cin), lambda i: (i, 0, 0)),
                # constant index_map => weights stay resident, no re-DMA
                pl.BlockSpec((Cin, planes), lambda i: (0, 0)),
                pl.BlockSpec((9 * planes, planes), lambda i: (0, 0)),
            ],
            out_specs=[
                pl.BlockSpec((tf, HW, planes), lambda i: (i, 0, 0)),
                pl.BlockSpec((tf, planes), lambda i: (i, 0)),
            ],
            scratch_shapes=[
                pltpu.VMEM((tf, H + 2, W + 2, planes), jnp.float32),   # halo
                pltpu.VMEM((tf * HW, 9 * planes), jnp.float32),        # im2col
            ]),
        compiler_params=pltpu.CompilerParams(
            dimension_semantics=("parallel",),
            vmem_limit_bytes=vmem_limit_bytes),
    )(x_rows3, w1m, w2m)


def _stage2_kernel(y2_ref, wf_ref, bf_ref, res_ref, w3_ref, o_ref):
    """CT_DNR modulation + relu -> conv3(1x1) + bn3 + residual + relu."""
    tf, HW, planes = y2_ref.shape
    Cout = o_ref.shape[2]
    # bn2 = CT_DNR: per-frame LSTM gain (INV_STD pre-folded) + per-frame bias
    w = wf_ref[...][:, None, :]                       # (tf, 1, planes)
    b = bf_ref[...][:, None, :]
    y2n = jnp.maximum(y2_ref[...].astype(jnp.float32) * w + b, 0.0)
    # conv3 (1x1, bn3 folded into w3) + residual add + relu; bf16 MXU operands.
    acc = jnp.dot(y2n.reshape(tf * HW, planes).astype(jnp.bfloat16), w3_ref[...],
                  preferred_element_type=jnp.float32)
    out = jnp.maximum(acc + res_ref[...].reshape(tf * HW, Cout), 0.0)
    o_ref[...] = out.reshape(tf, HW, Cout).astype(o_ref.dtype)


def mod_conv3_residual(y2, w_frame, b_frame, x_res3, w3m, *, tf,
                       vmem_limit_bytes=None):
    NT, HW, planes = y2.shape
    Cout = w3m.shape[1]
    return pl.pallas_call(
        _stage2_kernel,
        out_shape=jax.ShapeDtypeStruct((NT, HW, Cout), jnp.float32),
        grid_spec=pltpu.PrefetchScalarGridSpec(
            num_scalar_prefetch=0,
            grid=(NT // tf,),
            in_specs=[
                pl.BlockSpec((tf, HW, planes), lambda i: (i, 0, 0)),
                pl.BlockSpec((tf, planes), lambda i: (i, 0)),
                pl.BlockSpec((tf, planes), lambda i: (i, 0)),
                pl.BlockSpec((tf, HW, Cout), lambda i: (i, 0, 0)),
                pl.BlockSpec((planes, Cout), lambda i: (0, 0)),   # resident
            ],
            out_specs=pl.BlockSpec((tf, HW, Cout), lambda i: (i, 0, 0)),
        ),
        compiler_params=pltpu.CompilerParams(
            dimension_semantics=("parallel",),
            vmem_limit_bytes=vmem_limit_bytes),
    )(y2, w_frame, b_frame, x_res3, w3m)


# ----------------------- generation-aware block sizing -----------------------

def _round_up(x, m):
    return ((x + m - 1) // m) * m


def _vmem_capacity_bytes():
    """Per-core VMEM capacity; conservative default is v7x's 64 MiB/TC."""
    cap = 64 << 20
    try:
        info = pltpu.get_tpu_info()
        for name in ("vmem_capacity_bytes", "vmem_size_bytes", "vmem_bytes"):
            val = getattr(info, name, None)
            if val:
                cap = int(val)
                break
    except Exception:
        pass
    return cap


def _block_budget_bytes(cap):
    """Activation-block budget for one pallas_call (~1/3 of per-core VMEM)."""
    return max(2 << 20, min(cap // 3, 48 << 20))


def _stage1_frame_bytes(H, W, Cin, planes):
    """Per-frame VMEM footprint (lane-padded, incl. double buffering + scratch)."""
    HW = H * W
    lane = lambda c: _round_up(c, 128)
    x_in = 2 * HW * lane(Cin) * 2                    # bf16 input, double-buffered
    y2_out = 2 * HW * lane(planes) * 2               # bf16 output, double-buffered
    halo = (H + 2) * _round_up(W + 2, 8) * lane(planes) * 4
    cat = HW * lane(9 * planes) * 4                  # im2col scratch
    temps = 2 * HW * lane(planes) * 4                # y1 / f32 conv2 accumulator
    return x_in + y2_out + halo + cat + temps


def _stage2_frame_bytes(H, W, planes):
    HW = H * W
    Cout = 4 * planes
    lane = lambda c: _round_up(c, 128)
    y2_in = 2 * HW * lane(planes) * 2
    res_in = 2 * HW * lane(Cout) * 4
    out = 2 * HW * lane(Cout) * 4
    temps = 2 * HW * lane(Cout) * 4
    return y2_in + res_in + out + temps


def _pick_frames_per_block(nt, per_frame_bytes, budget_bytes):
    """Largest frame-block that fits the budget; prefer an EVEN number of grid
    blocks (balanced v7x megacore sharding), else >=2 blocks (pipelining)."""
    divisors = [d for d in range(1, nt + 1) if nt % d == 0]
    fits = [d for d in divisors if d * per_frame_bytes <= budget_bytes]
    if not fits:
        return 1
    even = [d for d in fits if nt // d >= 2 and (nt // d) % 2 == 0]
    multi = [d for d in fits if nt // d >= 2]
    for cand in (even, multi, fits):
        if cand:
            return max(cand)
    return 1


def _maybe_vmem_limit(est_bytes, cap):
    """Only override the default scoped-VMEM limit when the blocks need it."""
    default_limit = 16 << 20            # smallest default across v5e/v6e/v7x
    if est_bytes <= (default_limit * 3) // 4:
        return None
    return int(min(max(2 * est_bytes, 32 << 20), (3 * cap) // 4))


# ------------------------------- JAX glue ----------------------------------

def _bneck(x, p):
    """bottleneck_cell: Linear(C, C//4) -> ReLU -> Linear(C//4, 4C)."""
    h = jnp.maximum(x @ p["w1"].T + p["b1"], 0.0)
    return h @ p["w2"].T + p["b2"]


def ct_dnr_lstm(frame_means, lstm_params, n_batch):
    """CT_DNR recurrence over the 4 temporal groups.  Returns per-frame (w, b).

    Tiny (4 sequential steps, few-KB operands) -> kept in plain JAX.
    """
    N = n_batch
    C = frame_means.shape[-1]
    tg = N_SEGMENT // NUM_GROUPS
    # group-mean of the per-frame means == AdaptiveAvgPool3d((1,1,1)) per group
    fm = frame_means.reshape(N, NUM_GROUPS, tg, C).mean(axis=2)  # (N, G, C)

    ht = jnp.zeros((N, C), jnp.float32)
    ct = jnp.zeros((N, C), jnp.float32)
    w_list, b_list = [], []
    for g in range(NUM_GROUPS):
        seq = fm[:, g, :]
        gates = _bneck(seq, lstm_params["ih"]) + _bneck(ht, lstm_params["hh"])
        ig, fg, cg, og = jnp.split(gates, 4, axis=1)
        ncx = jax.nn.sigmoid(fg) * ct + jax.nn.sigmoid(ig) * jnp.tanh(cg)
        nhx = jax.nn.sigmoid(og) * jax.nn.sigmoid(ncx)  # as in the PyTorch source
        ht, ct = nhx, ncx
        w_list.append(nhx)
        b_list.append(ncx)

    wg = jnp.transpose(jnp.stack(w_list, 0), (1, 0, 2))  # (N, G, C)
    bg = jnp.transpose(jnp.stack(b_list, 0), (1, 0, 2))
    w_frame = jnp.repeat(wg, tg, axis=1).reshape(N * N_SEGMENT, C)
    b_frame = jnp.repeat(bg, tg, axis=1).reshape(N * N_SEGMENT, C)
    return w_frame, b_frame


def bottleneck_forward(x_nchw, params):
    """Pallas-backed Bottleneck.forward (stride=1, dilation=1, downsample=None)."""
    NT, Cin, H, W = x_nchw.shape
    planes = params["planes"]
    Cout = planes * 4
    assert Cin == Cout, "downsample=None requires inplanes == planes * expansion"
    HW = H * W

    x_rows3 = jnp.transpose(x_nchw, (0, 2, 3, 1)).reshape(NT, HW, Cin)

    # Fold the eval batch-norm scale (INV_STD > 0) into the weights (not into
    # the residual path or b_frame), then cast MXU operands to bf16.
    w1m = (params["w_conv1"].reshape(planes, Cin).T * INV_STD).astype(jnp.bfloat16)
    w2m = jnp.transpose(params["w_conv2"], (2, 3, 1, 0)).reshape(
        9 * planes, planes).astype(jnp.bfloat16)
    w3m = (params["w_conv3"].reshape(Cout, planes).T * INV_STD).astype(jnp.bfloat16)

    cap = _vmem_capacity_bytes()
    budget = _block_budget_bytes(cap)
    pf1 = _stage1_frame_bytes(H, W, Cin, planes)
    pf2 = _stage2_frame_bytes(H, W, planes)
    tf1 = _pick_frames_per_block(NT, pf1, budget)
    tf2 = _pick_frames_per_block(NT, pf2, budget)
    limit1 = _maybe_vmem_limit(tf1 * pf1, cap)
    limit2 = _maybe_vmem_limit(tf2 * pf2, cap)

    # stage 1: conv1 + relu + conv2 (single fused matmul) + per-frame mean
    x_bf = x_rows3.astype(jnp.bfloat16)
    y2, fm = conv1_conv2_framemean(x_bf, w1m, w2m, H=H, W=W, tf=tf1,
                                   vmem_limit_bytes=limit1)

    # CT_DNR temporal LSTM on the tiny (NT, planes) means (f32)
    w_frame, b_frame = ct_dnr_lstm(fm, params["lstm"], NT // N_SEGMENT)
    w_frame = w_frame * INV_STD          # bn2 eval scale folded into the gain

    # stage 2: modulation + relu + conv3 + residual + relu (one pallas_call)
    out3 = mod_conv3_residual(y2, w_frame, b_frame, x_rows3, w3m, tf=tf2,
                              vmem_limit_bytes=limit2)

    return jnp.transpose(out3.reshape(NT, H, W, Cout), (0, 3, 1, 2))


# -------------------------- pure-JAX reference ------------------------------

def reference_forward(x, params):
    dn = ("NCHW", "OIHW", "NCHW")
    y = lax.conv_general_dilated(x, params["w_conv1"], (1, 1), "VALID",
                                 dimension_numbers=dn)
    y = jax.nn.relu(y * INV_STD)
    y = lax.conv_general_dilated(y, params["w_conv2"], (1, 1), [(1, 1), (1, 1)],
                                 dimension_numbers=dn)
    NT = y.shape[0]
    fm = y.mean(axis=(2, 3))
    w_frame, b_frame = ct_dnr_lstm(fm, params["lstm"], NT // N_SEGMENT)
    y = jax.nn.relu(y * INV_STD * w_frame[:, :, None, None] + b_frame[:, :, None, None])
    y = lax.conv_general_dilated(y, params["w_conv3"], (1, 1), "VALID",
                                 dimension_numbers=dn)
    return jax.nn.relu(y * INV_STD + x)


# --------------------------------- main --------------------------------------

if __name__ == "__main__":
    key = jax.random.PRNGKey(0)
    planes = 8
    inplanes = planes * 4        # downsample=None => residual needs inplanes == planes*expansion
    NT, H, W = 16, 8, 8          # NT must be a multiple of n_segment=8 (n_batch=2)
    C4, Cq = planes * 4, planes // 4

    ks = jax.random.split(key, 12)
    lstm_params = {
        "ih": {"w1": jax.random.normal(ks[3], (Cq, planes), jnp.float32) * 0.2,
               "b1": jax.random.normal(ks[4], (Cq,), jnp.float32) * 0.05,
               "w2": jax.random.normal(ks[5], (C4, Cq), jnp.float32) * 0.2,
               "b2": jax.random.normal(ks[6], (C4,), jnp.float32) * 0.05},
        "hh": {"w1": jax.random.normal(ks[7], (Cq, planes), jnp.float32) * 0.2,
               "b1": jax.random.normal(ks[8], (Cq,), jnp.float32) * 0.05,
               "w2": jax.random.normal(ks[9], (C4, Cq), jnp.float32) * 0.2,
               "b2": jax.random.normal(ks[10], (C4,), jnp.float32) * 0.05},
    }
    params = {
        "planes": planes,
        "w_conv1": jax.random.normal(ks[0], (planes, inplanes, 1, 1), jnp.float32) * 0.1,
        "w_conv2": jax.random.normal(ks[1], (planes, planes, 3, 3), jnp.float32) * 0.1,
        "w_conv3": jax.random.normal(ks[2], (planes * 4, planes, 1, 1), jnp.float32) * 0.1,
        "lstm": lstm_params,
    }

    x = jax.random.normal(ks[11], (NT, inplanes, H, W), jnp.float32)

    out = bottleneck_forward(x, params)
    out = jax.block_until_ready(out)

    ref = reference_forward(x, params)
    assert out.shape == (NT, inplanes, H, W), out.shape
    max_err = float(jnp.max(jnp.abs(out - ref)))
    # tolerance sized for bf16 MXU operands (f32 accumulation) vs the f32 reference
    assert jnp.allclose(out, ref, atol=2e-2, rtol=2e-2), max_err

    print("KERNEL_OK")
</pallas_src>

<mosaic_0001>
module attributes {stable_mosaic.version = 11 : i64} {
  func.func @_stage1_kernel(%arg0: i32, %arg1: memref<8x64x32xbf16, #tpu.memory_space<vmem>>, %arg2: memref<32x8xbf16, #tpu.memory_space<vmem>>, %arg3: memref<72x8xbf16, #tpu.memory_space<vmem>>, %arg4: memref<8x64x8xbf16, #tpu.memory_space<vmem>>, %arg5: memref<8x8xf32, #tpu.memory_space<vmem>>, %arg6: memref<8x10x10x8xf32, #tpu.memory_space<vmem>>, %arg7: memref<512x72xf32, #tpu.memory_space<vmem>>) attributes {dimension_semantics = [#tpu.dimension_semantics<parallel>], iteration_bounds = array<i64: 2>, scalar_prefetch = 0 : i64, scratch_operands = 2 : i64, tpu.core_type = #tpu.core_type<tc>, window_params = [{transform_indices = @transform_0, window_bounds = array<i64: 8, 64, 32>}, {pipeline_mode = #tpu.pipeline_mode<synchronous>, transform_indices = @transform_1, window_bounds = array<i64: 32, 8>}, {pipeline_mode = #tpu.pipeline_mode<synchronous>, transform_indices = @transform_2, window_bounds = array<i64: 72, 8>}, {transform_indices = @transform_3, window_bounds = array<i64: 8, 64, 8>}, {transform_indices = @transform_4, window_bounds = array<i64: 8, 8>}]} {
    %c0 = arith.constant 0 : index
    %c0_0 = arith.constant 0 : index
    %c0_1 = arith.constant 0 : index
    %0 = vector.load %arg1[%c0, %c0_0, %c0_1] : memref<8x64x32xbf16, #tpu.memory_space<vmem>>, vector<8x64x32xbf16>
    %1 = vector.shape_cast %0 : vector<8x64x32xbf16> to vector<512x32xbf16>
    %c0_2 = arith.constant 0 : index
    %c0_3 = arith.constant 0 : index
    %2 = vector.load %arg2[%c0_2, %c0_3] : memref<32x8xbf16, #tpu.memory_space<vmem>>, vector<32x8xbf16>
    %cst = arith.constant dense<0.000000e+00> : vector<512x8xf32>
    %3 = tpu.matmul %1, %2, %cst {dimension_numbers = #tpu.dot_dimension_numbers<[1], [0], [0], [1], [0, 0, 1, 1], [], []>} : vector<512x32xbf16>, vector<32x8xbf16>, vector<512x8xf32> -> vector<512x8xf32>
    %cst_4 = arith.constant 0.000000e+00 : f32
    %4 = vector.broadcast %cst_4 : f32 to vector<512x8xf32>
    %5 = arith.maximumf %3, %4 : vector<512x8xf32>
    %cst_5 = arith.constant 0.000000e+00 : f32
    %6 = vector.broadcast %cst_5 : f32 to vector<8x1x10x8xf32>
    %cst_6 = arith.constant 0.000000e+00 : f32
    %7 = vector.broadcast %cst_6 : f32 to vector<8x8x1x8xf32>
    %c0_7 = arith.constant 0 : index
    %c0_8 = arith.constant 0 : index
    %c0_9 = arith.constant 0 : index
    %c0_10 = arith.constant 0 : index
    %8 = vector.load %arg6[%c0_7, %c0_8, %c0_9, %c0_10] : memref<8x10x10x8xf32, #tpu.memory_space<vmem>>, vector<8x1x10x8xf32>
    tpu.vector_store %arg6[%c0_7, %c0_8, %c0_9, %c0_10], %6 {strides = array<i32>} : memref<8x10x10x8xf32, #tpu.memory_space<vmem>>, vector<8x1x10x8xf32>,
    %c0_11 = arith.constant 0 : index
    %c9 = arith.constant 9 : index
    %c0_12 = arith.constant 0 : index
    %c0_13 = arith.constant 0 : index
    %9 = vector.load %arg6[%c0_11, %c9, %c0_12, %c0_13] : memref<8x10x10x8xf32, #tpu.memory_space<vmem>>, vector<8x1x10x8xf32>
    tpu.vector_store %arg6[%c0_11, %c9, %c0_12, %c0_13], %6 {strides = array<i32>} : memref<8x10x10x8xf32, #tpu.memory_space<vmem>>, vector<8x1x10x8xf32>,
    %c0_14 = arith.constant 0 : index
    %c1 = arith.constant 1 : index
    %c0_15 = arith.constant 0 : index
    %c0_16 = arith.constant 0 : index
    %10 = vector.load %arg6[%c0_14, %c1, %c0_15, %c0_16] : memref<8x10x10x8xf32, #tpu.memory_space<vmem>>, vector<8x8x1x8xf32>
    tpu.vector_store %arg6[%c0_14, %c1, %c0_15, %c0_16], %7 {strides = array<i32>} : memref<8x10x10x8xf32, #tpu.memory_space<vmem>>, vector<8x8x1x8xf32>,
    %c0_17 = arith.constant 0 : index
    %c1_18 = arith.constant 1 : index
    %c9_19 = arith.constant 9 : index
    %c0_20 = arith.constant 0 : index
    %11 = vector.load %arg6[%c0_17, %c1_18, %c9_19, %c0_20] : memref<8x10x10x8xf32, #tpu.memory_space<vmem>>, vector<8x8x1x8xf32>
    tpu.vector_store %arg6[%c0_17, %c1_18, %c9_19, %c0_20], %7 {strides = array<i32>} : memref<8x10x10x8xf32, #tpu.memory_space<vmem>>, vector<8x8x1x8xf32>,
    %12 = vector.shape_cast %5 : vector<512x8xf32> to vector<8x8x8x8xf32>
    %c0_21 = arith.constant 0 : index
    %c1_22 = arith.constant 1 : index
    %c1_23 = arith.constant 1 : index
    %c0_24 = arith.constant 0 : index
    %13 = vector.load %arg6[%c0_21, %c1_22, %c1_23, %c0_24] : memref<8x10x10x8xf32, #tpu.memory_space<vmem>>, vector<8x8x8x8xf32>
    tpu.vector_store %arg6[%c0_21, %c1_22, %c1_23, %c0_24], %12 {strides = array<i32>} : memref<8x10x10x8xf32, #tpu.memory_space<vmem>>, vector<8x8x8x8xf32>,
    %c0_25 = arith.constant 0 : index
    %c0_26 = arith.constant 0 : index
    %c0_27 = arith.constant 0 : index
    %c0_28 = arith.constant 0 : index
    %14 = vector.load %arg6[%c0_25, %c0_26, %c0_27, %c0_28] : memref<8x10x10x8xf32, #tpu.memory_space<vmem>>, vector<8x8x8x8xf32>
    %15 = vector.shape_cast %14 : vector<8x8x8x8xf32> to vector<512x8xf32>
    %c0_29 = arith.constant 0 : index
    %c0_30 = arith.constant 0 : index
    %16 = vector.load %arg7[%c0_29, %c0_30] : memref<512x72xf32, #tpu.memory_space<vmem>>, vector<512x8xf32>
    tpu.vector_store %arg7[%c0_29, %c0_30], %15 {strides = array<i32>} : memref<512x72xf32, #tpu.memory_space<vmem>>, vector<512x8xf32>,
    %c0_31 = arith.constant 0 : index
    %c0_32 = arith.constant 0 : index
    %c1_33 = arith.constant 1 : index
    %c0_34 = arith.constant 0 : index
    %17 = vector.load %arg6[%c0_31, %c0_32, %c1_33, %c0_34] : memref<8x10x10x8xf32, #tpu.memory_space<vmem>>, vector<8x8x8x8xf32>
    %18 = vector.shape_cast %17 : vector<8x8x8x8xf32> to vector<512x8xf32>
    %c0_35 = arith.constant 0 : index
    %c8 = arith.constant 8 : index
    %19 = vector.load %arg7[%c0_35, %c8] : memref<512x72xf32, #tpu.memory_space<vmem>>, vector<512x8xf32>
    tpu.vector_store %arg7[%c0_35, %c8], %18 {strides = array<i32>} : memref<512x72xf32, #tpu.memory_space<vmem>>, vector<512x8xf32>,
    %c0_36 = arith.constant 0 : index
    %c0_37 = arith.constant 0 : index
    %c2 = arith.constant 2 : index
    %c0_38 = arith.constant 0 : index
    %20 = vector.load %arg6[%c0_36, %c0_37, %c2, %c0_38] : memref<8x10x10x8xf32, #tpu.memory_space<vmem>>, vector<8x8x8x8xf32>
    %21 = vector.shape_cast %20 : vector<8x8x8x8xf32> to vector<512x8xf32>
    %c0_39 = arith.constant 0 : index
    %c16 = arith.constant 16 : index
    %22 = vector.load %arg7[%c0_39, %c16] : memref<512x72xf32, #tpu.memory_space<vmem>>, vector<512x8xf32>
    tpu.vector_store %arg7[%c0_39, %c16], %21 {strides = array<i32>} : memref<512x72xf32, #tpu.memory_space<vmem>>, vector<512x8xf32>,
    %c0_40 = arith.constant 0 : index
    %c1_41 = arith.constant 1 : index
    %c0_42 = arith.constant 0 : index
    %c0_43 = arith.constant 0 : index
    %23 = vector.load %arg6[%c0_40, %c1_41, %c0_42, %c0_43] : memref<8x10x10x8xf32, #tpu.memory_space<vmem>>, vector<8x8x8x8xf32>
    %24 = vector.shape_cast %23 : vector<8x8x8x8xf32> to vector<512x8xf32>
    %c0_44 = arith.constant 0 : index
    %c24 = arith.constant 24 : index
    %25 = vector.load %arg7[%c0_44, %c24] : memref<512x72xf32, #tpu.memory_space<vmem>>, vector<512x8xf32>
    tpu.vector_store %arg7[%c0_44, %c24], %24 {strides = array<i32>} : memref<512x72xf32, #tpu.memory_space<vmem>>, vector<512x8xf32>,
    %c0_45 = arith.constant 0 : index
    %c1_46 = arith.constant 1 : index
    %c1_47 = arith.constant 1 : index
    %c0_48 = arith.constant 0 : index
    %26 = vector.load %arg6[%c0_45, %c1_46, %c1_47, %c0_48] : memref<8x10x10x8xf32, #tpu.memory_space<vmem>>, vector<8x8x8x8xf32>
    %27 = vector.shape_cast %26 : vector<8x8x8x8xf32> to vector<512x8xf32>
    %c0_49 = arith.constant 0 : index
    %c32 = arith.constant 32 : index
    %28 = vector.load %arg7[%c0_49, %c32] : memref<512x72xf32, #tpu.memory_space<vmem>>, vector<512x8xf32>
    tpu.vector_store %arg7[%c0_49, %c32], %27 {strides = array<i32>} : memref<512x72xf32, #tpu.memory_space<vmem>>, vector<512x8xf32>,
    %c0_50 = arith.constant 0 : index
    %c1_51 = arith.constant 1 : index
    %c2_52 = arith.constant 2 : index
    %c0_53 = arith.constant 0 : index
    %29 = vector.load %arg6[%c0_50, %c1_51, %c2_52, %c0_53] : memref<8x10x10x8xf32, #tpu.memory_space<vmem>>, vector<8x8x8x8xf32>
    %30 = vector.shape_cast %29 : vector<8x8x8x8xf32> to vector<512x8xf32>
    %c0_54 = arith.constant 0 : index
    %c40 = arith.constant 40 : index
    %31 = vector.load %arg7[%c0_54, %c40] : memref<512x72xf32, #tpu.memory_space<vmem>>, vector<512x8xf32>
    tpu.vector_store %arg7[%c0_54, %c40], %30 {strides = array<i32>} : memref<512x72xf32, #tpu.memory_space<vmem>>, vector<512x8xf32>,
    %c0_55 = arith.constant 0 : index
    %c2_56 = arith.constant 2 : index
    %c0_57 = arith.constant 0 : index
    %c0_58 = arith.constant 0 : index
    %32 = vector.load %arg6[%c0_55, %c2_56, %c0_57, %c0_58] : memref<8x10x10x8xf32, #tpu.memory_space<vmem>>, vector<8x8x8x8xf32>
    %33 = vector.shape_cast %32 : vector<8x8x8x8xf32> to vector<512x8xf32>
    %c0_59 = arith.constant 0 : index
    %c48 = arith.constant 48 : index
    %34 = vector.load %arg7[%c0_59, %c48] : memref<512x72xf32, #tpu.memory_space<vmem>>, vector<512x8xf32>
    tpu.vector_store %arg7[%c0_59, %c48], %33 {strides = array<i32>} : memref<512x72xf32, #tpu.memory_space<vmem>>, vector<512x8xf32>,
    %c0_60 = arith.constant 0 : index
    %c2_61 = arith.constant 2 : index
    %c1_62 = arith.constant 1 : index
    %c0_63 = arith.constant 0 : index
    %35 = vector.load %arg6[%c0_60, %c2_61, %c1_62, %c0_63] : memref<8x10x10x8xf32, #tpu.memory_space<vmem>>, vector<8x8x8x8xf32>
    %36 = vector.shape_cast %35 : vector<8x8x8x8xf32> to vector<512x8xf32>
    %c0_64 = arith.constant 0 : index
    %c56 = arith.constant 56 : index
    %37 = vector.load %arg7[%c0_64, %c56] : memref<512x72xf32, #tpu.memory_space<vmem>>, vector<512x8xf32>
    tpu.vector_store %arg7[%c0_64, %c56], %36 {strides = array<i32>} : memref<512x72xf32, #tpu.memory_space<vmem>>, vector<512x8xf32>,
    %c0_65 = arith.constant 0 : index
    %c2_66 = arith.constant 2 : index
    %c2_67 = arith.constant 2 : index
    %c0_68 = arith.constant 0 : index
    %38 = vector.load %arg6[%c0_65, %c2_66, %c2_67, %c0_68] : memref<8x10x10x8xf32, #tpu.memory_space<vmem>>, vector<8x8x8x8xf32>
    %39 = vector.shape_cast %38 : vector<8x8x8x8xf32> to vector<512x8xf32>
    %c0_69 = arith.constant 0 : index
    %c64 = arith.constant 64 : index
    %40 = vector.load %arg7[%c0_69, %c64] : memref<512x72xf32, #tpu.memory_space<vmem>>, vector<512x8xf32>
    tpu.vector_store %arg7[%c0_69, %c64], %39 {strides = array<i32>} : memref<512x72xf32, #tpu.memory_space<vmem>>, vector<512x8xf32>,
    %c0_70 = arith.constant 0 : index
    %c0_71 = arith.constant 0 : index
    %41 = vector.load %arg7[%c0_70, %c0_71] : memref<512x72xf32, #tpu.memory_space<vmem>>, vector<512x72xf32>
    %42 = arith.truncf %41 : vector<512x72xf32> to vector<512x72xbf16>
    %c0_72 = arith.constant 0 : index
    %c0_73 = arith.constant 0 : index
    %43 = vector.load %arg3[%c0_72, %c0_73] : memref<72x8xbf16, #tpu.memory_space<vmem>>, vector<72x8xbf16>
    %cst_74 = arith.constant dense<0.000000e+00> : vector<512x8xf32>
    %44 = tpu.matmul %42, %43, %cst_74 {dimension_numbers = #tpu.dot_dimension_numbers<[1], [0], [0], [1], [0, 0, 1, 1], [], []>} : vector<512x72xbf16>, vector<72x8xbf16>, vector<512x8xf32> -> vector<512x8xf32>
    %45 = vector.shape_cast %44 : vector<512x8xf32> to vector<8x64x8xf32>
    %46 = arith.truncf %45 : vector<8x64x8xf32> to vector<8x64x8xbf16>
    %c0_75 = arith.constant 0 : index
    %c0_76 = arith.constant 0 : index
    %c0_77 = arith.constant 0 : index
    %47 = vector.load %arg4[%c0_75, %c0_76, %c0_77] : memref<8x64x8xbf16, #tpu.memory_space<vmem>>, vector<8x64x8xbf16>
    tpu.vector_store %arg4[%c0_75, %c0_76, %c0_77], %46 {strides = array<i32>} : memref<8x64x8xbf16, #tpu.memory_space<vmem>>, vector<8x64x8xbf16>,
    %cst_78 = arith.constant dense<0.000000e+00> : vector<8x8xf32>
    %48 = vector.multi_reduction <add>, %45, %cst_78 [1] : vector<8x64x8xf32> to vector<8x8xf32>
    %cst_79 = arith.constant 6.400000e+01 : f32
    %49 = vector.broadcast %cst_79 : f32 to vector<8x8xf32>
    %50 = arith.divf %48, %49 : vector<8x8xf32>
    %c0_80 = arith.constant 0 : index
    %c0_81 = arith.constant 0 : index
    %51 = vector.load %arg5[%c0_80, %c0_81] : memref<8x8xf32, #tpu.memory_space<vmem>>, vector<8x8xf32>
    tpu.vector_store %arg5[%c0_80, %c0_81], %50 {strides = array<i32>} : memref<8x8xf32, #tpu.memory_space<vmem>>, vector<8x8xf32>,
    return
  }
  func.func @transform_0(%arg0: i32) -> (i32, i32, i32) {
    %c0_i32 = arith.constant 0 : i32
    %c0_i32_0 = arith.constant 0 : i32
    %c0_i32_1 = arith.constant 0 : i32
    return %arg0, %c0_i32, %c0_i32_0 : i32, i32, i32
  }
  func.func @transform_1(%arg0: i32) -> (i32, i32) {
    %c0_i32 = arith.constant 0 : i32
    %c0_i32_0 = arith.constant 0 : i32
    %c0_i32_1 = arith.constant 0 : i32
    return %c0_i32, %c0_i32_0 : i32, i32
  }
  func.func @transform_2(%arg0: i32) -> (i32, i32) {
    %c0_i32 = arith.constant 0 : i32
    %c0_i32_0 = arith.constant 0 : i32
    %c0_i32_1 = arith.constant 0 : i32
    return %c0_i32, %c0_i32_0 : i32, i32
  }
  func.func @transform_3(%arg0: i32) -> (i32, i32, i32) {
    %c0_i32 = arith.constant 0 : i32
    %c0_i32_0 = arith.constant 0 : i32
    %c0_i32_1 = arith.constant 0 : i32
    return %arg0, %c0_i32, %c0_i32_0 : i32, i32, i32
  }
  func.func @transform_4(%arg0: i32) -> (i32, i32) {
    %c0_i32 = arith.constant 0 : i32
    %c0_i32_0 = arith.constant 0 : i32
    return %arg0, %c0_i32 : i32, i32
  }
}

</mosaic_0001>

<bundles_post_ra>
// kernel: tpu_custom_call.1
= control target key start
LH: loop header
LB: loop body
LE: loop exit
PB: predicated region body
PF: predicated region fallthrough
CT: control target
= control target key end

     0   :  { %s6038_s15 = smov 0   ;;  %s8344_s0 = inlined_call_operand.vmem [shape: bf16[16,64,32], index: 0, kind: input, shape index: {}]   ;;  %s8345_s1 = inlined_call_operand.vmem [shape: bf16[32,8], index: 1, kind: input, shape index: {}]   ;;  %s8346_s2 = inlined_call_operand.vmem [shape: bf16[72,8], index: 2, kind: input, shape index: {}]   ;;  %s8347_s3 = inlined_call_operand.vmem [shape: bf16[16,64,8], index: 3, kind: output, shape index: {0}]   ;;  %s8348_s4 = inlined_call_operand.vmem [shape: f32[16,8], index: 4, kind: output, shape index: {1}]  }
   0x1 LB: > { %s6044_s16 = sadd.s32 4294967295, %s6002_s15   ;;  %p5483_p0 = scmp.ge.s32.totalorder %s6002_s15, 1  ;;  %s6002_s15 = sphi %s6038_s15, %s15_s15  }
   0x2   : > { %p167_p1 = scmp.lt.s32.totalorder %s6002_s15, 3 }
   0x4   : > { %p168_p2 = pnand %p5483_p0, %p167_p1 }
   0x5   : > { %s5484_s19 = sshll.u32 (!%p168_p2), %s6044_s16, 3  ;;  %s6005_s26 = smov (!%p168_p2), 8  }
   0x6   : > { %171 = sbr.rel (%p168_p2) target bundleno = 1591 (0x637), region = 32  ;;  %p200_p3 = scmp.lt.s32.totalorder (!%p168_p2), %s5484_s19, 15 }
   0x7   : > { %s6006_s27 = smov (!%p168_p2), 16   ;;  %s6007_s28 = smov (!%p168_p2), 24  }
   0x8   : > { %s6008_s29 = smov (!%p168_p2), 32   ;;  %s6009_s30 = smov (!%p168_p2), 40  }
   0x9   : > { %s6010_s5 = smov (!%p168_p2), 48   ;;  %s6011_s6 = smov (!%p168_p2), 56  }
   0xa   : > { %s6012_s7 = smov (!%p168_p2), 64   ;;  %p213_p4 = scmp.lt.s32.totalorder (!%p168_p2), %s6044_s16, 1 }
   0xb   : > { %v5957_v0 = vld [vmem:[%s8345_s1 + $0x8] sm:$0xff]   ;;  %v5958_v1 = vld [vmem:[%s8345_s1] sm:$0xff]   ;;  %vm908_vm0 = vcmask 64512   ;;  %vm910_vm1 = vcmask 58368   ;;  %s8350_s19 = smov (!%p200_p3, %s5484_s19), 15  ;;  %v6004_v2 = vmov 0.0  }
   0xc   : > { %5797 = vmatprep.subr.bf16.mxu0 %v5957_v0  ;;  %909 = vst.msk [vmem:[#allocation2] sm:$0xff] %vm908_vm0, %v6004_v2  ;;  %912 = vst.msk [vmem:[#allocation2 + $0xa0] sm:$0xff] %vm908_vm0, %v6004_v2  ;;  %s5660_s22 = sshll.u32 %s8350_s19, 5  ;;  %vm458_vm2 = vcmask 261120   ;;  %vm944_vm3 = vcmask 57344   ;;  %vm1585_vm4 = vcmask 130112  }
   0xd   : > { %5798 = vmatpush3.bf16.msra.mxu0 %v5957_v0  ;;  %911 = vst.msk [vmem:[#allocation2 + $0x8] sm:$0x3] %vm910_vm1, %v6004_v2  ;;  %913 = vst.msk [vmem:[#allocation2 + $0xa8] sm:$0x3] %vm910_vm1, %v6004_v2  ;;  %s6127_s25 = scalar_lea.vmem %s8344_s0, %s5660_s22  ;;  %vm1970_vm5 = vcmask 195712   ;;  %vm2355_vm6 = vcmask 261312   ;;  %s8004_s24 = scalar_lea.vmem %s8347_s3, %s5660_s22 }
   0xe   : > { %914 = vst.msk [vmem:[#allocation2 + $0x140] sm:$0xff] %vm908_vm0, %v6004_v2  ;;  %916 = vst.msk [vmem:[#allocation2 + $0x1e0] sm:$0xff] %vm908_vm0, %v6004_v2  ;;  %5799 = vmatprep.subr.bf16.mxu0 %v5958_v1  ;;  %v5959_v3 = vld [vmem:[%s6127_s25] sm:$0xff]   ;;  %v5960_v4 = vld [vmem:[%s6127_s25 + $0x8] sm:$0xff]   ;;  %vm2740_vm7 = vcmask 326912   ;;  %vm3125_vm8 = vcmask 392512  }
   0xf   : > { %915 = vst.msk [vmem:[#allocation2 + $0x148] sm:$0x3] %vm910_vm1, %v6004_v2  ;;  %917 = vst.msk [vmem:[#allocation2 + $0x1e8] sm:$0x3] %vm910_vm1, %v6004_v2  ;;  %5801 = vmatprep.mubr.msk.bf16.mxu0 %vm458_vm2, %v5959_v3  ;;  %v5961_v5 = vld [vmem:[%s6127_s25 + $0x10] sm:$0xff]   ;;  %v5962_v6 = vld [vmem:[%s6127_s25 + $0x18] sm:$0xff]  }
  0x10   : > { %918 = vst.msk [vmem:[#allocation2 + $0x280] sm:$0xff] %vm908_vm0, %v6004_v2  ;;  %920 = vst.msk [vmem:[#allocation2 + $0x320] sm:$0xff] %vm908_vm0, %v6004_v2  ;;  %v5963_v7 = vld [vmem:[%s6127_s25 + $0x20] sm:$0xff]   ;;  %v5964_v9 = vld [vmem:[%s6127_s25 + $0x28] sm:$0xff]   ;;  %vm4575_vm9 = vcmask 1043456   ;;  %vm3511_vm10 = vcmask 458112  }
  0x11   : > { %919 = vst.msk [vmem:[#allocation2 + $0x288] sm:$0x3] %vm910_vm1, %v6004_v2  ;;  %921 = vst.msk [vmem:[#allocation2 + $0x328] sm:$0x3] %vm910_vm1, %v6004_v2  ;;  %5800 = vmatpush3.bf16.msra.mxu0 %v5958_v1  ;;  %v5965_v10 = vld [vmem:[%s6127_s25 + $0x30] sm:$0xff]   ;;  %v5966_v13 = vld [vmem:[%s6127_s25 + $0x38] sm:$0xff]  }
  0x12   : > { %922 = vst.msk [vmem:[#allocation2 + $0x3c0] sm:$0xff] %vm908_vm0, %v6004_v2  ;;  %924 = vst.msk [vmem:[#allocation2 + $0x460] sm:$0xff] %vm908_vm0, %v6004_v2  ;;  %v5967_v14 = vld [vmem:[%s6127_s25 + $0x40] sm:$0xff]   ;;  %v5968_v17 = vld [vmem:[%s6127_s25 + $0x48] sm:$0xff]   ;;  %vm3896_vm11 = vcmask 523712   ;;  %vm4281_vm12 = vcmask 589312  }
  0x13   : > { %923 = vst.msk [vmem:[#allocation2 + $0x3c8] sm:$0x3] %vm910_vm1, %v6004_v2  ;;  %925 = vst.msk [vmem:[#allocation2 + $0x468] sm:$0x3] %vm910_vm1, %v6004_v2  ;;  %v5969_v18 = vld [vmem:[%s6127_s25 + $0x50] sm:$0xff]   ;;  %v5970_v21 = vld [vmem:[%s6127_s25 + $0x58] sm:$0xff]  }
  0x14   : > { %927 = vst.msk [vmem:[#allocation2 + $0x90] sm:$0xff] %vm908_vm0, %v6004_v2  ;;  %929 = vst.msk [vmem:[#allocation2 + $0x130] sm:$0xff] %vm908_vm0, %v6004_v2  ;;  %5802 = vmatmul.mubr.msk.bf16.vlgmr.msra.gmra.mxu0 %vm458_vm2, %v5960_v4  ;;  %v1265_v8 = vld [vmem:[#allocation2 + $0x1] sm:$0xff]  ;;  %v5973_v26 = vld [vmem:[%s6127_s25 + $0x70] sm:$0xff]   ;;  %vm4478_vm13 = vcmask 588800   ;;  %vm5124_vm14 = vcmask 60416  }
  0x15   : > { %928 = vst.msk [vmem:[#allocation2 + $0x98] sm:$0x3] %vm910_vm1, %v6004_v2  ;;  %930 = vst.msk [vmem:[#allocation2 + $0x138] sm:$0x3] %vm910_vm1, %v6004_v2  ;;  %5805 = vmatprep.mubr.msk.bf16.mxu0 %vm458_vm2, %v5961_v5  ;;  %1393 = vrot.lane.b32.xlu0 %v1265_v8, %s6005_s26  ;;  %v1273_v11 = vld [vmem:[#allocation2 + $0xa1] sm:$0xff]  ;;  %v5974_v29 = vld [vmem:[%s6127_s25 + $0x78] sm:$0xff]  }
  0x16   : > { %931 = vst.msk [vmem:[#allocation2 + $0x1d0] sm:$0xff] %vm908_vm0, %v6004_v2  ;;  %933 = vst.msk [vmem:[#allocation2 + $0x270] sm:$0xff] %vm908_vm0, %v6004_v2  ;;  %v1281_v12 = vld [vmem:[#allocation2 + $0x141] sm:$0xff]  ;;  %v5977_v34 = vld [vmem:[%s6127_s25 + $0x90] sm:$0xff]   ;;  %vm5374_vm15 = vcmask 1041409   ;;  %s8352_s16 = smov (!%p213_p4, %s6044_s16), 1 }
  0x17   : > { %932 = vst.msk [vmem:[#allocation2 + $0x1d8] sm:$0x3] %vm910_vm1, %v6004_v2  ;;  %934 = vst.msk [vmem:[#allocation2 + $0x278] sm:$0x3] %vm910_vm1, %v6004_v2  ;;  %v1289_v15 = vld [vmem:[#allocation2 + $0x1e1] sm:$0xff]  ;;  %v5978_v37 = vld [vmem:[%s6127_s25 + $0x98] sm:$0xff]  }
  0x18   : > { %935 = vst.msk [vmem:[#allocation2 + $0x310] sm:$0xff] %vm908_vm0, %v6004_v2  ;;  %937 = vst.msk [vmem:[#allocation2 + $0x3b0] sm:$0xff] %vm908_vm0, %v6004_v2  ;;  %v1297_v16 = vld [vmem:[#allocation2 + $0x281] sm:$0xff]  ;;  %v5981_v41 = vld [vmem:[%s6127_s25 + $0xb0] sm:$0xff]   ;;  %s5490_s19 = sshll.u32 %s8352_s16, 3 }
  0x19   : > { %936 = vst.msk [vmem:[#allocation2 + $0x318] sm:$0x3] %vm910_vm1, %v6004_v2  ;;  %938 = vst.msk [vmem:[#allocation2 + $0x3b8] sm:$0x3] %vm910_vm1, %v6004_v2  ;;  %1409 = vrot.lane.b32.xlu0 %v1273_v11, %s6005_s26  ;;  %v1305_v19 = vld [vmem:[#allocation2 + $0x321] sm:$0xff]  ;;  %v5982_v42 = vld [vmem:[%s6127_s25 + $0xb8] sm:$0xff]  }
  0x1a   : > { %939 = vst.msk [vmem:[#allocation2 + $0x450] sm:$0xff] %vm908_vm0, %v6004_v2  ;;  %941 = vst.msk [vmem:[#allocation2 + $0x4f0] sm:$0xff] %vm908_vm0, %v6004_v2  ;;  %v1313_v20 = vld [vmem:[#allocation2 + $0x3c1] sm:$0xff]  ;;  %v5985_v45 = vld [vmem:[%s6127_s25 + $0xd0] sm:$0xff]  }
  0x1b   : > { %940 = vst.msk [vmem:[#allocation2 + $0x458] sm:$0x3] %vm910_vm1, %v6004_v2  ;;  %942 = vst.msk [vmem:[#allocation2 + $0x4f8] sm:$0x3] %vm910_vm1, %v6004_v2  ;;  %v5971_v22 = vld [vmem:[%s6127_s25 + $0x60] sm:$0xff]   ;;  %v5972_v25 = vld [vmem:[%s6127_s25 + $0x68] sm:$0xff]  }
  0x1c   : > { %5806 = vmatmul.mubr.msk.bf16.gmra.mxu0 %vm458_vm2, %v5962_v6  ;;  %v1321_v23 = vld [vmem:[#allocation2 + $0x461] sm:$0xff]  ;;  %947 = vst.msk [vmem:[#allocation2 + $0x30] sm:$0x1] %vm944_vm3, %v6004_v2  ;;  %945 = vst.msk [vmem:[#allocation2 + $0x10] sm:$0x1] %vm944_vm3, %v6004_v2  ;;  %v5986_v46 = vld [vmem:[%s6127_s25 + $0xd8] sm:$0xff]  }
  0x1d   : > { %5809 = vmatprep.mubr.msk.bf16.mxu0 %vm458_vm2, %v5963_v7  ;;  %1425 = vrot.lane.b32.xlu0 %v1281_v12, %s6005_s26  ;;  %v1650_v24 = vld [vmem:[#allocation2 + $0x2] sm:$0xff]  ;;  %946 = vst.msk [vmem:[#allocation2 + $0x20] sm:$0x1] %vm944_vm3, %v6004_v2  ;;  %948 = vst.msk [vmem:[#allocation2 + $0x40] sm:$0x1] %vm944_vm3, %v6004_v2  ;;  %v5989_v56 = vld [vmem:[%s6127_s25 + $0xf0] sm:$0xff]  }
  0x1e   : > { %v1658_v27 = vld [vmem:[#allocation2 + $0xa2] sm:$0xff]  ;;  %949 = vst.msk [vmem:[#allocation2 + $0x50] sm:$0x1] %vm944_vm3, %v6004_v2  ;;  %950 = vst.msk [vmem:[#allocation2 + $0x60] sm:$0x1] %vm944_vm3, %v6004_v2  ;;  %v5990_v57 = vld [vmem:[%s6127_s25 + $0xf8] sm:$0xff]  }
  0x1f   : > { %v1666_v28 = vld [vmem:[#allocation2 + $0x142] sm:$0xff]  ;;  %951 = vst.msk [vmem:[#allocation2 + $0x70] sm:$0x1] %vm944_vm3, %v6004_v2  ;;  %952 = vst.msk [vmem:[#allocation2 + $0x80] sm:$0x1] %vm944_vm3, %v6004_v2  ;;  %vm5376_vm1 = vcmask 1042434  }
  0x20   : > { %v5975_v30 = vld [vmem:[%s6127_s25 + $0x80] sm:$0xff]   ;;  %v5976_v33 = vld [vmem:[%s6127_s25 + $0x88] sm:$0xff]   ;;  %953 = vst.msk [vmem:[#allocation2 + $0xb0] sm:$0x1] %vm944_vm3, %v6004_v2  ;;  %954 = vst.msk [vmem:[#allocation2 + $0xc0] sm:$0x1] %vm944_vm3, %v6004_v2 }
  0x21   : > { %1441 = vrot.lane.b32.xlu0 %v1289_v15, %s6005_s26  ;;  %v1674_v31 = vld [vmem:[#allocation2 + $0x1e2] sm:$0xff]  ;;  %955 = vst.msk [vmem:[#allocation2 + $0xd0] sm:$0x1] %vm944_vm3, %v6004_v2  ;;  %956 = vst.msk [vmem:[#allocation2 + $0xe0] sm:$0x1] %vm944_vm3, %v6004_v2 }
  0x22   : > { %v1682_v32 = vld [vmem:[#allocation2 + $0x282] sm:$0xff]  ;;  %957 = vst.msk [vmem:[#allocation2 + $0xf0] sm:$0x1] %vm944_vm3, %v6004_v2  ;;  %958 = vst.msk [vmem:[#allocation2 + $0x100] sm:$0x1] %vm944_vm3, %v6004_v2 }
  0x23   : > { %v1690_v35 = vld [vmem:[#allocation2 + $0x322] sm:$0xff]  ;;  %959 = vst.msk [vmem:[#allocation2 + $0x110] sm:$0x1] %vm944_vm3, %v6004_v2  ;;  %960 = vst.msk [vmem:[#allocation2 + $0x120] sm:$0x1] %vm944_vm3, %v6004_v2 }
  0x24   : > { %5810 = vmatmul.mubr.msk.bf16.gmra.mxu0 %vm458_vm2, %v5964_v9  ;;  %v6181_v36 = vld [vmem:[#allocation2 + $0x3c2] sm:$0xff]  ;;  %961 = vst.msk [vmem:[#allocation2 + $0x150] sm:$0x1] %vm944_vm3, %v6004_v2  ;;  %962 = vst.msk [vmem:[#allocation2 + $0x160] sm:$0x1] %vm944_vm3, %v6004_v2 }
  0x25   : > { %5813 = vmatprep.mubr.msk.bf16.mxu0 %vm458_vm2, %v5965_v10  ;;  %1457 = vrot.lane.b32.xlu0 %v1297_v16, %s6005_s26  ;;  %963 = vst.msk [vmem:[#allocation2 + $0x170] sm:$0x1] %vm944_vm3, %v6004_v2  ;;  %964 = vst.msk [vmem:[#allocation2 + $0x180] sm:$0x1] %vm944_vm3, %v6004_v2  ;;  %v5979_v38 = vld [vmem:[%s6127_s25 + $0xa0] sm:$0xff]   ;;  %v5980_v40 = vld [vmem:[%s6127_s25 + $0xa8] sm:$0xff]  }
  0x26   : > { %965 = vst.msk [vmem:[#allocation2 + $0x190] sm:$0x1] %vm944_vm3, %v6004_v2  ;;  %966 = vst.msk [vmem:[#allocation2 + $0x1a0] sm:$0x1] %vm944_vm3, %v6004_v2  ;;  %v1706_v39 = vld [vmem:[#allocation2 + $0x462] sm:$0xff] }
  0x27   : > { %967 = vst.msk [vmem:[#allocation2 + $0x1b0] sm:$0x1] %vm944_vm3, %v6004_v2  ;;  %968 = vst.msk [vmem:[#allocation2 + $0x1c0] sm:$0x1] %vm944_vm3, %v6004_v2  ;;  %v5983_v43 = vld [vmem:[%s6127_s25 + $0xc0] sm:$0xff]   ;;  %v5984_v44 = vld [vmem:[%s6127_s25 + $0xc8] sm:$0xff]  }
  0x28   : > { %969 = vst.msk [vmem:[#allocation2 + $0x1f0] sm:$0x1] %vm944_vm3, %v6004_v2  ;;  %970 = vst.msk [vmem:[#allocation2 + $0x200] sm:$0x1] %vm944_vm3, %v6004_v2  ;;  %v5987_v47 = vld [vmem:[%s6127_s25 + $0xe0] sm:$0xff]   ;;  %v5988_v48 = vld [vmem:[%s6127_s25 + $0xe8] sm:$0xff]  }
  0x29   : > { %1473 = vrot.lane.b32.xlu0 %v1305_v19, %s6005_s26  ;;  %971 = vst.msk [vmem:[#allocation2 + $0x210] sm:$0x1] %vm944_vm3, %v6004_v2  ;;  %972 = vst.msk [vmem:[#allocation2 + $0x220] sm:$0x1] %vm944_vm3, %v6004_v2  ;;  %v1137_v49 = vld [vmem:[#allocation2] sm:$0xff] }
  0x2a   : > { %973 = vst.msk [vmem:[#allocation2 + $0x230] sm:$0x1] %vm944_vm3, %v6004_v2  ;;  %974 = vst.msk [vmem:[#allocation2 + $0x240] sm:$0x1] %vm944_vm3, %v6004_v2  ;;  %v1145_v51 = vld [vmem:[#allocation2 + $0xa0] sm:$0xff] }
  0x2b   : > { %975 = vst.msk [vmem:[#allocation2 + $0x250] sm:$0x1] %vm944_vm3, %v6004_v2  ;;  %976 = vst.msk [vmem:[#allocation2 + $0x260] sm:$0x1] %vm944_vm3, %v6004_v2  ;;  %v1153_v53 = vld [vmem:[#allocation2 + $0x140] sm:$0xff] }
  0x2c   : > { %5814 = vmatmul.mubr.msk.bf16.gmra.mxu0 %vm458_vm2, %v5966_v13  ;;  %977 = vst.msk [vmem:[#allocation2 + $0x290] sm:$0x1] %vm944_vm3, %v6004_v2  ;;  %978 = vst.msk [vmem:[#allocation2 + $0x2a0] sm:$0x1] %vm944_vm3, %v6004_v2  ;;  %v1161_v55 = vld [vmem:[#allocation2 + $0x1e0] sm:$0xff] }
  0x2d   : > { %5817 = vmatprep.mubr.msk.bf16.mxu0 %vm458_vm2, %v5967_v14  ;;  %1489 = vrot.lane.b32.xlu0 %v1313_v20, %s6005_s26  ;;  %979 = vst.msk [vmem:[#allocation2 + $0x2b0] sm:$0x1] %vm944_vm3, %v6004_v2  ;;  %980 = vst.msk [vmem:[#allocation2 + $0x2c0] sm:$0x1] %vm944_vm3, %v6004_v2  ;;  %v1169_v59 = vld [vmem:[#allocation2 + $0x280] sm:$0xff] }
  0x2e   : > { %981 = vst.msk [vmem:[#allocation2 + $0x2d0] sm:$0x1] %vm944_vm3, %v6004_v2  ;;  %982 = vst.msk [vmem:[#allocation2 + $0x2e0] sm:$0x1] %vm944_vm3, %v6004_v2  ;;  %v1177_v61 = vld [vmem:[#allocation2 + $0x320] sm:$0xff] }
  0x2f   : > { %983 = vst.msk [vmem:[#allocation2 + $0x2f0] sm:$0x1] %vm944_vm3, %v6004_v2  ;;  %984 = vst.msk [vmem:[#allocation2 + $0x300] sm:$0x1] %vm944_vm3, %v6004_v2  ;;  %v1185_v63 = vld [vmem:[#allocation2 + $0x3c0] sm:$0xff] }
  0x30   : > { %985 = vst.msk [vmem:[#allocation2 + $0x330] sm:$0x1] %vm944_vm3, %v6004_v2  ;;  %986 = vst.msk [vmem:[#allocation2 + $0x340] sm:$0x1] %vm944_vm3, %v6004_v2  ;;  %v1193_v1 = vld [vmem:[#allocation2 + $0x460] sm:$0xff] }
  0x31   : > { %1505 = vrot.lane.b32.xlu0 %v1321_v23, %s6005_s26  ;;  %987 = vst.msk [vmem:[#allocation2 + $0x350] sm:$0x1] %vm944_vm3, %v6004_v2  ;;  %988 = vst.msk [vmem:[#allocation2 + $0x360] sm:$0x1] %vm944_vm3, %v6004_v2 }
  0x32   : > { %989 = vst.msk [vmem:[#allocation2 + $0x370] sm:$0x1] %vm944_vm3, %v6004_v2  ;;  %990 = vst.msk [vmem:[#allocation2 + $0x380] sm:$0x1] %vm944_vm3, %v6004_v2 }
  0x33   : > { %991 = vst.msk [vmem:[#allocation2 + $0x390] sm:$0x1] %vm944_vm3, %v6004_v2  ;;  %992 = vst.msk [vmem:[#allocation2 + $0x3a0] sm:$0x1] %vm944_vm3, %v6004_v2 }
  0x34   : > { %5818 = vmatmul.mubr.msk.bf16.gmra.mxu0 %vm458_vm2, %v5968_v17  ;;  %993 = vst.msk [vmem:[#allocation2 + $0x3d0] sm:$0x1] %vm944_vm3, %v6004_v2  ;;  %994 = vst.msk [vmem:[#allocation2 + $0x3e0] sm:$0x1] %vm944_vm3, %v6004_v2 }
  0x35   : > { %5821 = vmatprep.mubr.msk.bf16.mxu0 %vm458_vm2, %v5969_v18  ;;  %1778 = vrot.lane.b32.xlu0 %v1650_v24, %s6006_s27  ;;  %995 = vst.msk [vmem:[#allocation2 + $0x3f0] sm:$0x1] %vm944_vm3, %v6004_v2  ;;  %996 = vst.msk [vmem:[#allocation2 + $0x400] sm:$0x1] %vm944_vm3, %v6004_v2 }
  0x36   : > { %997 = vst.msk [vmem:[#allocation2 + $0x410] sm:$0x1] %vm944_vm3, %v6004_v2  ;;  %998 = vst.msk [vmem:[#allocation2 + $0x420] sm:$0x1] %vm944_vm3, %v6004_v2 }
  0x37   : > { %999 = vst.msk [vmem:[#allocation2 + $0x430] sm:$0x1] %vm944_vm3, %v6004_v2  ;;  %1000 = vst.msk [vmem:[#allocation2 + $0x440] sm:$0x1] %vm944_vm3, %v6004_v2 }
  0x38   : > { %1001 = vst.msk [vmem:[#allocation2 + $0x470] sm:$0x1] %vm944_vm3, %v6004_v2  ;;  %1002 = vst.msk [vmem:[#allocation2 + $0x480] sm:$0x1] %vm944_vm3, %v6004_v2 }
  0x39   : > { %1794 = vrot.lane.b32.xlu0 %v1658_v27, %s6006_s27  ;;  %1003 = vst.msk [vmem:[#allocation2 + $0x490] sm:$0x1] %vm944_vm3, %v6004_v2  ;;  %1004 = vst.msk [vmem:[#allocation2 + $0x4a0] sm:$0x1] %vm944_vm3, %v6004_v2 }
  0x3a   : > { %1005 = vst.msk [vmem:[#allocation2 + $0x4b0] sm:$0x1] %vm944_vm3, %v6004_v2  ;;  %1006 = vst.msk [vmem:[#allocation2 + $0x4c0] sm:$0x1] %vm944_vm3, %v6004_v2 }
  0x3b   : > { %1007 = vst.msk [vmem:[#allocation2 + $0x4d0] sm:$0x1] %vm944_vm3, %v6004_v2  ;;  %1008 = vst.msk [vmem:[#allocation2 + $0x4e0] sm:$0x1] %vm944_vm3, %v6004_v2 }
  0x3c   : > { %5822 = vmatmul.mubr.msk.bf16.gmra.mxu0 %vm458_vm2, %v5970_v21  ;;  %1009 = vst.msk [vmem:[#allocation2 + $0x19] sm:$0x1] %vm944_vm3, %v6004_v2  ;;  %1010 = vst.msk [vmem:[#allocation2 + $0x29] sm:$0x1] %vm944_vm3, %v6004_v2 }
  0x3d   : > { %5825 = vmatprep.mubr.msk.bf16.mxu0 %vm458_vm2, %v5971_v22  ;;  %1810 = vrot.lane.b32.xlu0 %v1666_v28, %s6006_s27  ;;  %1011 = vst.msk [vmem:[#allocation2 + $0x39] sm:$0x1] %vm944_vm3, %v6004_v2  ;;  %1012 = vst.msk [vmem:[#allocation2 + $0x49] sm:$0x1] %vm944_vm3, %v6004_v2 }
  0x3e   : > { %1013 = vst.msk [vmem:[#allocation2 + $0x59] sm:$0x1] %vm944_vm3, %v6004_v2  ;;  %1014 = vst.msk [vmem:[#allocation2 + $0x69] sm:$0x1] %vm944_vm3, %v6004_v2 }
  0x3f   : > { %1015 = vst.msk [vmem:[#allocation2 + $0x79] sm:$0x1] %vm944_vm3, %v6004_v2  ;;  %1016 = vst.msk [vmem:[#allocation2 + $0x89] sm:$0x1] %vm944_vm3, %v6004_v2 }
  0x40   : > { %1017 = vst.msk [vmem:[#allocation2 + $0xb9] sm:$0x1] %vm944_vm3, %v6004_v2  ;;  %1018 = vst.msk [vmem:[#allocation2 + $0xc9] sm:$0x1] %vm944_vm3, %v6004_v2 }
  0x41   : > { %1826 = vrot.lane.b32.xlu0 %v1674_v31, %s6006_s27  ;;  %1019 = vst.msk [vmem:[#allocation2 + $0xd9] sm:$0x1] %vm944_vm3, %v6004_v2  ;;  %1020 = vst.msk [vmem:[#allocation2 + $0xe9] sm:$0x1] %vm944_vm3, %v6004_v2 }
  0x42   : > { %1021 = vst.msk [vmem:[#allocation2 + $0xf9] sm:$0x1] %vm944_vm3, %v6004_v2  ;;  %1022 = vst.msk [vmem:[#allocation2 + $0x109] sm:$0x1] %vm944_vm3, %v6004_v2 }
  0x43   : > { %1023 = vst.msk [vmem:[#allocation2 + $0x119] sm:$0x1] %vm944_vm3, %v6004_v2  ;;  %1024 = vst.msk [vmem:[#allocation2 + $0x129] sm:$0x1] %vm944_vm3, %v6004_v2 }
  0x44   : > { %5826 = vmatmul.mubr.msk.bf16.gmra.mxu0 %vm458_vm2, %v5972_v25  ;;  %1025 = vst.msk [vmem:[#allocation2 + $0x159] sm:$0x1] %vm944_vm3, %v6004_v2  ;;  %1026 = vst.msk [vmem:[#allocation2 + $0x169] sm:$0x1] %vm944_vm3, %v6004_v2 }
  0x45   : > { %5829 = vmatprep.mubr.msk.bf16.mxu0 %vm458_vm2, %v5973_v26  ;;  %1842 = vrot.lane.b32.xlu0 %v1682_v32, %s6006_s27  ;;  %1027 = vst.msk [vmem:[#allocation2 + $0x179] sm:$0x1] %vm944_vm3, %v6004_v2  ;;  %1028 = vst.msk [vmem:[#allocation2 + $0x189] sm:$0x1] %vm944_vm3, %v6004_v2 }
  0x46   : > { %1029 = vst.msk [vmem:[#allocation2 + $0x199] sm:$0x1] %vm944_vm3, %v6004_v2  ;;  %1030 = vst.msk [vmem:[#allocation2 + $0x1a9] sm:$0x1] %vm944_vm3, %v6004_v2 }
  0x47   : > { %1031 = vst.msk [vmem:[#allocation2 + $0x1b9] sm:$0x1] %vm944_vm3, %v6004_v2  ;;  %1032 = vst.msk [vmem:[#allocation2 + $0x1c9] sm:$0x1] %vm944_vm3, %v6004_v2 }
  0x48   : > { %1033 = vst.msk [vmem:[#allocation2 + $0x1f9] sm:$0x1] %vm944_vm3, %v6004_v2  ;;  %1034 = vst.msk [vmem:[#allocation2 + $0x209] sm:$0x1] %vm944_vm3, %v6004_v2 }
  0x49   : > { %1858 = vrot.lane.b32.xlu0 %v1690_v35, %s6006_s27  ;;  %1035 = vst.msk [vmem:[#allocation2 + $0x219] sm:$0x1] %vm944_vm3, %v6004_v2  ;;  %1036 = vst.msk [vmem:[#allocation2 + $0x229] sm:$0x1] %vm944_vm3, %v6004_v2 }
  0x4a   : > { %1037 = vst.msk [vmem:[#allocation2 + $0x239] sm:$0x1] %vm944_vm3, %v6004_v2  ;;  %1038 = vst.msk [vmem:[#allocation2 + $0x249] sm:$0x1] %vm944_vm3, %v6004_v2 }
  0x4b   : > { %1039 = vst.msk [vmem:[#allocation2 + $0x259] sm:$0x1] %vm944_vm3, %v6004_v2  ;;  %1040 = vst.msk [vmem:[#allocation2 + $0x269] sm:$0x1] %vm944_vm3, %v6004_v2 }
  0x4c   : > { %5830 = vmatmul.mubr.msk.bf16.gmra.mxu0 %vm458_vm2, %v5974_v29  ;;  %1041 = vst.msk [vmem:[#allocation2 + $0x299] sm:$0x1] %vm944_vm3, %v6004_v2  ;;  %1042 = vst.msk [vmem:[#allocation2 + $0x2a9] sm:$0x1] %vm944_vm3, %v6004_v2 }
  0x4d   : > { %5833 = vmatprep.mubr.msk.bf16.mxu0 %vm458_vm2, %v5975_v30  ;;  %1043 = vst.msk [vmem:[#allocation2 + $0x2b9] sm:$0x1] %vm944_vm3, %v6004_v2  ;;  %1044 = vst.msk [vmem:[#allocation2 + $0x2c9] sm:$0x1] %vm944_vm3, %v6004_v2  ;;  %1874 = vrot.lane.b32.xlu0 %v6181_v36, %s6006_s27 }
  0x4e   : > { %1045 = vst.msk [vmem:[#allocation2 + $0x2d9] sm:$0x1] %vm944_vm3, %v6004_v2  ;;  %1046 = vst.msk [vmem:[#allocation2 + $0x2e9] sm:$0x1] %vm944_vm3, %v6004_v2 }
  0x4f   : > { %1047 = vst.msk [vmem:[#allocation2 + $0x2f9] sm:$0x1] %vm944_vm3, %v6004_v2  ;;  %1048 = vst.msk [vmem:[#allocation2 + $0x309] sm:$0x1] %vm944_vm3, %v6004_v2 }
  0x50   : > { %1049 = vst.msk [vmem:[#allocation2 + $0x339] sm:$0x1] %vm944_vm3, %v6004_v2  ;;  %1050 = vst.msk [vmem:[#allocation2 + $0x349] sm:$0x1] %vm944_vm3, %v6004_v2 }
  0x51   : > { %1051 = vst.msk [vmem:[#allocation2 + $0x359] sm:$0x1] %vm944_vm3, %v6004_v2  ;;  %1052 = vst.msk [vmem:[#allocation2 + $0x369] sm:$0x1] %vm944_vm3, %v6004_v2  ;;  %1890 = vrot.lane.b32.xlu0 %v1706_v39, %s6006_s27 }
  0x52   : > { %1053 = vst.msk [vmem:[#allocation2 + $0x379] sm:$0x1] %vm944_vm3, %v6004_v2  ;;  %1054 = vst.msk [vmem:[#allocation2 + $0x389] sm:$0x1] %vm944_vm3, %v6004_v2 }
  0x53   : > { %1055 = vst.msk [vmem:[#allocation2 + $0x399] sm:$0x1] %vm944_vm3, %v6004_v2  ;;  %1056 = vst.msk [vmem:[#allocation2 + $0x3a9] sm:$0x1] %vm944_vm3, %v6004_v2 }
  0x54   : > { %5834 = vmatmul.mubr.msk.bf16.gmra.mxu0 %vm458_vm2, %v5976_v33  ;;  %1057 = vst.msk [vmem:[#allocation2 + $0x3d9] sm:$0x1] %vm944_vm3, %v6004_v2  ;;  %1058 = vst.msk [vmem:[#allocation2 + $0x3e9] sm:$0x1] %vm944_vm3, %v6004_v2 }
  0x55   : > { %5837 = vmatprep.mubr.msk.bf16.mxu0 %vm458_vm2, %v5977_v34  ;;  %1059 = vst.msk [vmem:[#allocation2 + $0x3f9] sm:$0x1] %vm944_vm3, %v6004_v2  ;;  %1060 = vst.msk [vmem:[#allocation2 + $0x409] sm:$0x1] %vm944_vm3, %v6004_v2 }
  0x56   : > { %1061 = vst.msk [vmem:[#allocation2 + $0x419] sm:$0x1] %vm944_vm3, %v6004_v2  ;;  %1062 = vst.msk [vmem:[#allocation2 + $0x429] sm:$0x1] %vm944_vm3, %v6004_v2 }
  0x57   : > { %1063 = vst.msk [vmem:[#allocation2 + $0x439] sm:$0x1] %vm944_vm3, %v6004_v2  ;;  %1064 = vst.msk [vmem:[#allocation2 + $0x449] sm:$0x1] %vm944_vm3, %v6004_v2 }
  0x58   : > { %1065 = vst.msk [vmem:[#allocation2 + $0x479] sm:$0x1] %vm944_vm3, %v6004_v2  ;;  %1066 = vst.msk [vmem:[#allocation2 + $0x489] sm:$0x1] %vm944_vm3, %v6004_v2 }
  0x59   : > { %1067 = vst.msk [vmem:[#allocation2 + $0x499] sm:$0x1] %vm944_vm3, %v6004_v2  ;;  %1068 = vst.msk [vmem:[#allocation2 + $0x4a9] sm:$0x1] %vm944_vm3, %v6004_v2 }
  0x5a   : > { %1069 = vst.msk [vmem:[#allocation2 + $0x4b9] sm:$0x1] %vm944_vm3, %v6004_v2  ;;  %1070 = vst.msk [vmem:[#allocation2 + $0x4c9] sm:$0x1] %vm944_vm3, %v6004_v2 }
  0x5b   : > { %1071 = vst.msk [vmem:[#allocation2 + $0x4d9] sm:$0x1] %vm944_vm3, %v6004_v2  ;;  %1072 = vst.msk [vmem:[#allocation2 + $0x4e9] sm:$0x1] %vm944_vm3, %v6004_v2  ;;  %vm5380_vm3 = vcmask 1044484  }
  0x5c   : > { %5838 = vmatmul.mubr.msk.bf16.gmra.mxu0 %vm458_vm2, %v5978_v37  ;;  %1201 = vst.msk [vmem:[#allocation3] sm:$0xff] %vm908_vm0, %v1137_v49  ;;  %1209 = vst.msk [vmem:[#allocation3 + $0x40] sm:$0xff] %vm908_vm0, %v1145_v51 }
  0x5d   : > { %5841 = vmatprep.mubr.msk.bf16.mxu0 %vm458_vm2, %v5979_v38  ;;  %1217 = vst.msk [vmem:[#allocation3 + $0x80] sm:$0xff] %vm908_vm0, %v1153_v53  ;;  %1225 = vst.msk [vmem:[#allocation3 + $0xc0] sm:$0xff] %vm908_vm0, %v1161_v55 }
  0x5e   : > { %1233 = vst.msk [vmem:[#allocation3 + $0x100] sm:$0xff] %vm908_vm0, %v1169_v59  ;;  %1241 = vst.msk [vmem:[#allocation3 + $0x140] sm:$0xff] %vm908_vm0, %v1177_v61 }
  0x5f   : > { %1249 = vst.msk [vmem:[#allocation3 + $0x180] sm:$0xff] %vm908_vm0, %v1185_v63  ;;  %1257 = vst.msk [vmem:[#allocation3 + $0x1c0] sm:$0xff] %vm908_vm0, %v1193_v1 }
  0x64   : > { %5842 = vmatmul.mubr.msk.bf16.gmra.mxu0 %vm458_vm2, %v5980_v40 }
  0x65   : > { %5845 = vmatprep.mubr.msk.bf16.mxu0 %vm458_vm2, %v5981_v41 }
  0x6c   : > { %5846 = vmatmul.mubr.msk.bf16.gmra.mxu0 %vm458_vm2, %v5982_v42 }
  0x6d   : > { %5849 = vmatprep.mubr.msk.bf16.mxu0 %vm458_vm2, %v5983_v43 }
  0x74   : > { %5850 = vmatmul.mubr.msk.bf16.gmra.mxu0 %vm458_vm2, %v5984_v44 }
  0x75   : > { %5853 = vmatprep.mubr.msk.bf16.mxu0 %vm458_vm2, %v5985_v45 }
  0x7c   : > { %5854 = vmatmul.mubr.msk.bf16.gmra.mxu0 %vm458_vm2, %v5986_v46 }
  0x7d   : > { %5857 = vmatprep.mubr.msk.bf16.mxu0 %vm458_vm2, %v5987_v47 }
  0x84   : > { %5858 = vmatmul.mubr.msk.bf16.gmra.mxu0 %vm458_vm2, %v5988_v48 }
  0x85   : > { %5861 = vmatprep.mubr.msk.bf16.mxu0 %vm458_vm2, %v5989_v56 }
  0x87   : > { %v1394_v50 = vpop.permute.xlu0 %1393 }
  0x88   : > { %1586 = vst.msk [vmem:[#allocation3] sm:$0xff] %vm1585_vm4, %v1394_v50 }
  0x8b   : > { %v1410_v52 = vpop.permute.xlu0 %1409 }
  0x8c   : > { %1594 = vst.msk [vmem:[#allocation3 + $0x40] sm:$0xff] %vm1585_vm4, %v1410_v52  ;;  %5862 = vmatmul.mubr.msk.bf16.gmra.mxu0 %vm458_vm2, %v5990_v57  ;;  %vm5378_vm2 = vcmask 1043459  }
  0x8f   : > { %v1426_v54 = vpop.permute.xlu0 %1425 }
  0x90   : > { %1602 = vst.msk [vmem:[#allocation3 + $0x80] sm:$0xff] %vm1585_vm4, %v1426_v54 }
  0x93   : > { %v1442_v58 = vpop.permute.xlu0 %1441 }
  0x94   : > { %1610 = vst.msk [vmem:[#allocation3 + $0xc0] sm:$0xff] %vm1585_vm4, %v1442_v58 }
  0x97   : > { %v1458_v60 = vpop.permute.xlu0 %1457 }
  0x98   : > { %1618 = vst.msk [vmem:[#allocation3 + $0x100] sm:$0xff] %vm1585_vm4, %v1458_v60 }
  0x9b   : > { %v1474_v62 = vpop.permute.xlu0 %1473 }
  0x9c   : > { %1626 = vst.msk [vmem:[#allocation3 + $0x140] sm:$0xff] %vm1585_vm4, %v1474_v62 }
  0x9f   : > { %v1490_v0 = vpop.permute.xlu0 %1489 }
  0xa0   : > { %1634 = vst.msk [vmem:[#allocation3 + $0x180] sm:$0xff] %vm1585_vm4, %v1490_v0 }
  0xa3   : > { %v1506_v2 = vpop.permute.xlu0 %1505 }
  0xa4   : > { %1642 = vst.msk [vmem:[#allocation3 + $0x1c0] sm:$0xff] %vm1585_vm4, %v1506_v2 }
  0xa7   : > { %v1779_v3 = vpop.permute.xlu0 %1778 }
  0xa8   : > { %1971 = vst.msk [vmem:[#allocation3] sm:$0xff] %vm1970_vm5, %v1779_v3 }
  0xab   : > { %v1795_v4 = vpop.permute.xlu0 %1794 }
  0xac   : > { %1979 = vst.msk [vmem:[#allocation3 + $0x40] sm:$0xff] %vm1970_vm5, %v1795_v4 }
  0xaf   : > { %v1811_v5 = vpop.permute.xlu0 %1810 }
  0xb0   : > { %1987 = vst.msk [vmem:[#allocation3 + $0x80] sm:$0xff] %vm1970_vm5, %v1811_v5 }
  0xb3   : > { %v1827_v6 = vpop.permute.xlu0 %1826 }
  0xb4   : > { %1995 = vst.msk [vmem:[#allocation3 + $0xc0] sm:$0xff] %vm1970_vm5, %v1827_v6 }
  0xb7   : > { %v1843_v7 = vpop.permute.xlu0 %1842 }
  0xb8   : > { %2003 = vst.msk [vmem:[#allocation3 + $0x100] sm:$0xff] %vm1970_vm5, %v1843_v7 }
  0xbb   : > { %v1859_v8 = vpop.permute.xlu0 %1858 }
  0xbc   : > { %2011 = vst.msk [vmem:[#allocation3 + $0x140] sm:$0xff] %vm1970_vm5, %v1859_v8 }
  0xbf   : > { %v1875_v9 = vpop.permute.xlu0 %1874 }
  0xc0   : > { %2019 = vst.msk [vmem:[#allocation3 + $0x180] sm:$0xff] %vm1970_vm5, %v1875_v9 }
  0xc3   : > { %v1891_v10 = vpop.permute.xlu0 %1890 }
  0xc4   : > { %2027 = vst.msk [vmem:[#allocation3 + $0x1c0] sm:$0xff] %vm1970_vm5, %v1891_v10 }
  0xd4   : > { %v5803_v11 = vpop.f32.mrf.mxu0 }
  0xd5   : > { %v846_v12 = vmax.f32 %v5803_v11, 0.0 }
  0xd6   : > { %v589_v13 = vpop.f32.mrf.mxu0 }
  0xd7   : > { %1075 = vst.msk [vmem:[#allocation2 + $0x31] sm:$0xff] %vm908_vm0, %v846_v12  ;;  %v844_v14 = vmax.f32 %v589_v13, 0.0 }
  0xd8   : > { %v5804_v15 = vpop.f32.mrf.mxu0 }
  0xd9   : > { %1073 = vst.msk [vmem:[#allocation2 + $0x11] sm:$0xff] %vm908_vm0, %v844_v14  ;;  %v847_v16 = vmax.f32 %v5804_v15, 0.0 }
  0xda   : > { %v592_v17 = vpop.f32.mrf.mxu0 }
  0xdb   : > { %1076 = vst.msk [vmem:[#allocation2 + $0x41] sm:$0xff] %vm908_vm0, %v847_v16  ;;  %v845_v18 = vmax.f32 %v592_v17, 0.0 }
  0xdc   : > { %v5807_v19 = vpop.f32.mrf.mxu0 }
  0xdd   : > { %1074 = vst.msk [vmem:[#allocation2 + $0x21] sm:$0xff] %vm908_vm0, %v845_v18  ;;  %v850_v20 = vmax.f32 %v5807_v19, 0.0 }
  0xde   : > { %v2037_v21 = vld [vmem:[#allocation2 + $0x30] sm:$0xff]  ;;  %v605_v23 = vpop.f32.mrf.mxu0 }
  0xdf   : > { %v1268_v22 = vld [vmem:[#allocation2 + $0x31] sm:$0xff]  ;;  %2167 = vrot.lane.b32.xlu0 %v2037_v21, %s6007_s28  ;;  %1079 = vst.msk [vmem:[#allocation2 + $0x71] sm:$0xff] %vm908_vm0, %v850_v20  ;;  %v848_v24 = vmax.f32 %v605_v23, 0.0  ;;  %1204 = vst.msk [vmem:[#allocation3 + $0x18] sm:$0xff] %vm908_vm0, %v2037_v21 }
  0xe0   : > { %1399 = vrot.lane.b32.xlu1 %v1268_v22, %s6005_s26  ;;  %v2035_v25 = vld [vmem:[#allocation2 + $0x10] sm:$0xff]  ;;  %v5808_v26 = vpop.f32.mrf.mxu0 }
  0xe1   : > { %1077 = vst.msk [vmem:[#allocation2 + $0x51] sm:$0xff] %vm908_vm0, %v848_v24  ;;  %v851_v27 = vmax.f32 %v5808_v26, 0.0  ;;  %1202 = vst.msk [vmem:[#allocation3 + $0x8] sm:$0xff] %vm908_vm0, %v2035_v25  ;;  %v1653_v28 = vld [vmem:[#allocation2 + $0x32] sm:$0xff] }
  0xe2   : > { %v1266_v29 = vld [vmem:[#allocation2 + $0x11] sm:$0xff]  ;;  %v2038_v30 = vld [vmem:[#allocation2 + $0x40] sm:$0xff]  ;;  %v608_v31 = vpop.f32.mrf.mxu0 }
  0xe3   : > { %1395 = vrot.lane.b32.xlu0 %v1266_v29, %s6005_s26  ;;  %1080 = vst.msk [vmem:[#allocation2 + $0x81] sm:$0xff] %vm908_vm0, %v851_v27  ;;  %v849_v32 = vmax.f32 %v608_v31, 0.0  ;;  %1205 = vst.msk [vmem:[#allocation3 + $0x20] sm:$0xff] %vm908_vm0, %v2038_v30  ;;  %v1651_v36 = vld [vmem:[#allocation2 + $0x12] sm:$0xff]  ;;  %v1269_v43 = vld [vmem:[#allocation2 + $0x41] sm:$0xff] }
  0xe4   : > { %1784 = vrot.lane.b32.xlu1 %v1653_v28, %s6006_s27  ;;  %v2036_v33 = vld [vmem:[#allocation2 + $0x20] sm:$0xff]  ;;  %v5811_v34 = vpop.f32.mrf.mxu0 }
  0xe5   : > { %1078 = vst.msk [vmem:[#allocation2 + $0x61] sm:$0xff] %vm908_vm0, %v849_v32  ;;  %v854_v35 = vmax.f32 %v5811_v34, 0.0  ;;  %1203 = vst.msk [vmem:[#allocation3 + $0x10] sm:$0xff] %vm908_vm0, %v2036_v33  ;;  %v1654_v49 = vld [vmem:[#allocation2 + $0x42] sm:$0xff] }
  0xe6   : > { %v2041_v37 = vld [vmem:[#allocation2 + $0x70] sm:$0xff]  ;;  %v621_v38 = vpop.f32.mrf.mxu0  ;;  %v1267_v50 = vld [vmem:[#allocation2 + $0x21] sm:$0xff] }
  0xe7   : > { %2163 = vrot.lane.b32.xlu0 %v2035_v25, %s6007_s28  ;;  %1083 = vst.msk [vmem:[#allocation2 + $0xd1] sm:$0xff] %vm908_vm0, %v854_v35  ;;  %v852_v39 = vmax.f32 %v621_v38, 0.0  ;;  %1208 = vst.msk [vmem:[#allocation3 + $0x38] sm:$0xff] %vm908_vm0, %v2041_v37  ;;  %v1652_v57 = vld [vmem:[#allocation2 + $0x22] sm:$0xff]  ;;  %v1272_v61 = vld [vmem:[#allocation2 + $0x71] sm:$0xff] }
  0xe8   : > { %1780 = vrot.lane.b32.xlu1 %v1651_v36, %s6006_s27  ;;  %v2039_v40 = vld [vmem:[#allocation2 + $0x50] sm:$0xff]  ;;  %v5812_v41 = vpop.f32.mrf.mxu0 }
  0xe9   : > { %1081 = vst.msk [vmem:[#allocation2 + $0xb1] sm:$0xff] %vm908_vm0, %v852_v39  ;;  %v855_v42 = vmax.f32 %v5812_v41, 0.0  ;;  %1206 = vst.msk [vmem:[#allocation3 + $0x28] sm:$0xff] %vm908_vm0, %v2039_v40  ;;  %v1657_v7 = vld [vmem:[#allocation2 + $0x72] sm:$0xff] }
  0xea   : > { %v624_v44 = vpop.f32.mrf.mxu0  ;;  %v1270_v13 = vld [vmem:[#allocation2 + $0x51] sm:$0xff]  ;;  %v2042_v29 = vld [vmem:[#allocation2 + $0x80] sm:$0xff] }
  0xeb   : > { %1401 = vrot.lane.b32.xlu0 %v1269_v43, %s6005_s26  ;;  %1084 = vst.msk [vmem:[#allocation2 + $0xe1] sm:$0xff] %vm908_vm0, %v855_v42  ;;  %v853_v45 = vmax.f32 %v624_v44, 0.0  ;;  %v1655_v21 = vld [vmem:[#allocation2 + $0x52] sm:$0xff] }
  0xec   : > { %2169 = vrot.lane.b32.xlu1 %v2038_v30, %s6007_s28  ;;  %v6517_v46 = vld [vmem:[#allocation2 + $0x60] sm:$0xff]  ;;  %v5815_v47 = vpop.f32.mrf.mxu0 }
  0xed   : > { %1082 = vst.msk [vmem:[#allocation2 + $0xc1] sm:$0xff] %vm908_vm0, %v853_v45  ;;  %v858_v48 = vmax.f32 %v5815_v47, 0.0  ;;  %1207 = vst.msk [vmem:[#allocation3 + $0x30] sm:$0xff] %vm908_vm0, %v6517_v46  ;;  %v1271_v14 = vld [vmem:[#allocation2 + $0x61] sm:$0xff] }
  0xee   : > { %v6522_v51 = vld [vmem:[#allocation2 + $0xd0] sm:$0xff]  ;;  %v637_v52 = vpop.f32.mrf.mxu0  ;;  %v1656_v22 = vld [vmem:[#allocation2 + $0x62] sm:$0xff] }
  0xef   : > { %1786 = vrot.lane.b32.xlu0 %v1654_v49, %s6006_s27  ;;  %1087 = vst.msk [vmem:[#allocation2 + $0x111] sm:$0xff] %vm908_vm0, %v858_v48  ;;  %v856_v53 = vmax.f32 %v637_v52, 0.0  ;;  %1212 = vst.msk [vmem:[#allocation3 + $0x58] sm:$0xff] %vm908_vm0, %v6522_v51  ;;  %v1276_v38 = vld [vmem:[#allocation2 + $0xd1] sm:$0xff] }
  0xf0   : > { %1397 = vrot.lane.b32.xlu1 %v1267_v50, %s6005_s26  ;;  %v6529_v54 = vld [vmem:[#allocation2 + $0xb0] sm:$0xff]  ;;  %v5816_v55 = vpop.f32.mrf.mxu0 }
  0xf1   : > { %1085 = vst.msk [vmem:[#allocation2 + $0xf1] sm:$0xff] %vm908_vm0, %v856_v53  ;;  %v859_v56 = vmax.f32 %v5816_v55, 0.0  ;;  %1210 = vst.msk [vmem:[#allocation3 + $0x48] sm:$0xff] %vm908_vm0, %v6529_v54  ;;  %v1661_v49 = vld [vmem:[#allocation2 + $0xd2] sm:$0xff] }
  0xf2   : > { %v640_v58 = vpop.f32.mrf.mxu0  ;;  %v6534_v59 = vld [vmem:[#allocation2 + $0xe0] sm:$0xff] }
  0xf3   : > { %1782 = vrot.lane.b32.xlu0 %v1652_v57, %s6006_s27  ;;  %1088 = vst.msk [vmem:[#allocation2 + $0x121] sm:$0xff] %vm908_vm0, %v859_v56  ;;  %v857_v60 = vmax.f32 %v640_v58, 0.0  ;;  %1213 = vst.msk [vmem:[#allocation3 + $0x60] sm:$0xff] %vm908_vm0, %v6534_v59  ;;  %v1277_v39 = vld [vmem:[#allocation2 + $0xe1] sm:$0xff]  ;;  %v1274_v57 = vld [vmem:[#allocation2 + $0xb1] sm:$0xff] }
  0xf4   : > { %2165 = vrot.lane.b32.xlu1 %v2036_v33, %s6007_s28  ;;  %v6541_v62 = vld [vmem:[#allocation2 + $0xc0] sm:$0xff]  ;;  %v5819_v63 = vpop.f32.mrf.mxu0 }
  0xf5   : > { %1086 = vst.msk [vmem:[#allocation2 + $0x101] sm:$0xff] %vm908_vm0, %v857_v60  ;;  %v862_v0 = vmax.f32 %v5819_v63, 0.0  ;;  %1211 = vst.msk [vmem:[#allocation3 + $0x50] sm:$0xff] %vm908_vm0, %v6541_v62  ;;  %v1662_v50 = vld [vmem:[#allocation2 + $0xe2] sm:$0xff] }
  0xf6   : > { %v6546_v1 = vld [vmem:[#allocation2 + $0x110] sm:$0xff]  ;;  %v653_v2 = vpop.f32.mrf.mxu0  ;;  %v1275_v58 = vld [vmem:[#allocation2 + $0xc1] sm:$0xff] }
  0xf7   : > { %2175 = vrot.lane.b32.xlu0 %v2041_v37, %s6007_s28  ;;  %1091 = vst.msk [vmem:[#allocation2 + $0x171] sm:$0xff] %vm908_vm0, %v862_v0  ;;  %v860_v3 = vmax.f32 %v653_v2, 0.0  ;;  %1216 = vst.msk [vmem:[#allocation3 + $0x78] sm:$0xff] %vm908_vm0, %v6546_v1 }
  0xf8   : > { %1407 = vrot.lane.b32.xlu1 %v1272_v61, %s6005_s26  ;;  %v6553_v4 = vld [vmem:[#allocation2 + $0xf0] sm:$0xff]  ;;  %v5820_v5 = vpop.f32.mrf.mxu0 }
  0xf9   : > { %1089 = vst.msk [vmem:[#allocation2 + $0x151] sm:$0xff] %vm908_vm0, %v860_v3  ;;  %v863_v6 = vmax.f32 %v5820_v5, 0.0  ;;  %1214 = vst.msk [vmem:[#allocation3 + $0x68] sm:$0xff] %vm908_vm0, %v6553_v4  ;;  %v1659_v5 = vld [vmem:[#allocation2 + $0xb2] sm:$0xff] }
  0xfa   : > { %v656_v8 = vpop.f32.mrf.mxu0 }
  0xfb   : > { %2171 = vrot.lane.b32.xlu0 %v2039_v40, %s6007_s28  ;;  %1092 = vst.msk [vmem:[#allocation2 + $0x181] sm:$0xff] %vm908_vm0, %v863_v6  ;;  %v861_v9 = vmax.f32 %v656_v8, 0.0  ;;  %v1660_v6 = vld [vmem:[#allocation2 + $0xc2] sm:$0xff] }
  0xfc   : > { %1792 = vrot.lane.b32.xlu1 %v1657_v7, %s6006_s27  ;;  %v6561_v10 = vld [vmem:[#allocation2 + $0x100] sm:$0xff]  ;;  %v5823_v11 = vpop.f32.mrf.mxu0 }
  0xfd   : > { %1090 = vst.msk [vmem:[#allocation2 + $0x161] sm:$0xff] %vm908_vm0, %v861_v9  ;;  %v866_v12 = vmax.f32 %v5823_v11, 0.0  ;;  %1215 = vst.msk [vmem:[#allocation3 + $0x70] sm:$0xff] %vm908_vm0, %v6561_v10 }
  0xfe   : > { %v6566_v15 = vld [vmem:[#allocation2 + $0x170] sm:$0xff]  ;;  %v669_v16 = vpop.f32.mrf.mxu0 }
  0xff   : > { %1405 = vrot.lane.b32.xlu0 %v1271_v14, %s6005_s26  ;;  %1095 = vst.msk [vmem:[#allocation2 + $0x1b1] sm:$0xff] %vm908_vm0, %v866_v12  ;;  %v864_v17 = vmax.f32 %v669_v16, 0.0  ;;  %1220 = vst.msk [vmem:[#allocation3 + $0x98] sm:$0xff] %vm908_vm0, %v6566_v15 }
 0x100   : > { %1403 = vrot.lane.b32.xlu1 %v1270_v13, %s6005_s26  ;;  %v6573_v18 = vld [vmem:[#allocation2 + $0x150] sm:$0xff]  ;;  %v5824_v19 = vpop.f32.mrf.mxu0 }
 0x101   : > { %1093 = vst.msk [vmem:[#allocation2 + $0x191] sm:$0xff] %vm908_vm0, %v864_v17  ;;  %v867_v20 = vmax.f32 %v5824_v19, 0.0  ;;  %1218 = vst.msk [vmem:[#allocation3 + $0x88] sm:$0xff] %vm908_vm0, %v6573_v18 }
 0x102   : > { %v672_v23 = vpop.f32.mrf.mxu0  ;;  %v6578_v24 = vld [vmem:[#allocation2 + $0x180] sm:$0xff] }
 0x103   : > { %1790 = vrot.lane.b32.xlu0 %v1656_v22, %s6006_s27  ;;  %1096 = vst.msk [vmem:[#allocation2 + $0x1c1] sm:$0xff] %vm908_vm0, %v867_v20  ;;  %v865_v25 = vmax.f32 %v672_v23, 0.0  ;;  %1221 = vst.msk [vmem:[#allocation3 + $0xa0] sm:$0xff] %vm908_vm0, %v6578_v24  ;;  %v1280_v22 = vld [vmem:[#allocation2 + $0x111] sm:$0xff]  ;;  %v1279_v23 = vld [vmem:[#allocation2 + $0x101] sm:$0xff] }
 0x104   : > { %1788 = vrot.lane.b32.xlu1 %v1655_v21, %s6006_s27  ;;  %v5827_v26 = vpop.f32.mrf.mxu0  ;;  %v6585_v27 = vld [vmem:[#allocation2 + $0x160] sm:$0xff] }
 0x105   : > { %1094 = vst.msk [vmem:[#allocation2 + $0x1a1] sm:$0xff] %vm908_vm0, %v865_v25  ;;  %v870_v28 = vmax.f32 %v5827_v26, 0.0  ;;  %1219 = vst.msk [vmem:[#allocation3 + $0x90] sm:$0xff] %vm908_vm0, %v6585_v27 }
 0x106   : > { %v6590_v30 = vld [vmem:[#allocation2 + $0x1b0] sm:$0xff]  ;;  %v685_v31 = vpop.f32.mrf.mxu0 }
 0x107   : > { %2183 = vrot.lane.b32.xlu0 %v6522_v51, %s6007_s28  ;;  %1099 = vst.msk [vmem:[#allocation2 + $0x211] sm:$0xff] %vm908_vm0, %v870_v28  ;;  %v868_v32 = vmax.f32 %v685_v31, 0.0  ;;  %1224 = vst.msk [vmem:[#allocation3 + $0xb8] sm:$0xff] %vm908_vm0, %v6590_v30 }
 0x108   : > { %2177 = vrot.lane.b32.xlu1 %v2042_v29, %s6007_s28  ;;  %v6598_v33 = vld [vmem:[#allocation2 + $0x190] sm:$0xff]  ;;  %v5828_v34 = vpop.f32.mrf.mxu0 }
 0x109   : > { %1097 = vst.msk [vmem:[#allocation2 + $0x1f1] sm:$0xff] %vm908_vm0, %v868_v32  ;;  %v871_v35 = vmax.f32 %v5828_v34, 0.0  ;;  %1222 = vst.msk [vmem:[#allocation3 + $0xa8] sm:$0xff] %vm908_vm0, %v6598_v33 }
 0x10a   : > { %v688_v36 = vpop.f32.mrf.mxu0 }
 0x10b   : > { %2179 = vrot.lane.b32.xlu0 %v6529_v54, %s6007_s28  ;;  %1100 = vst.msk [vmem:[#allocation2 + $0x221] sm:$0xff] %vm908_vm0, %v871_v35  ;;  %v869_v37 = vmax.f32 %v688_v36, 0.0  ;;  %v1665_v35 = vld [vmem:[#allocation2 + $0x112] sm:$0xff]  ;;  %v1664_v36 = vld [vmem:[#allocation2 + $0x102] sm:$0xff] }
 0x10c   : > { %2173 = vrot.lane.b32.xlu1 %v6517_v46, %s6007_s28  ;;  %v5831_v40 = vpop.f32.mrf.mxu0  ;;  %v6608_v41 = vld [vmem:[#allocation2 + $0x1a0] sm:$0xff] }
 0x10d   : > { %1098 = vst.msk [vmem:[#allocation2 + $0x201] sm:$0xff] %vm908_vm0, %v869_v37  ;;  %v874_v42 = vmax.f32 %v5831_v40, 0.0  ;;  %1223 = vst.msk [vmem:[#allocation3 + $0xb0] sm:$0xff] %vm908_vm0, %v6608_v41 }
 0x10e   : > { %v6613_v43 = vld [vmem:[#allocation2 + $0x210] sm:$0xff]  ;;  %v701_v44 = vpop.f32.mrf.mxu0 }
 0x10f   : > { %1417 = vrot.lane.b32.xlu0 %v1277_v39, %s6005_s26  ;;  %1103 = vst.msk [vmem:[#allocation2 + $0x251] sm:$0xff] %vm908_vm0, %v874_v42  ;;  %v872_v45 = vmax.f32 %v701_v44, 0.0  ;;  %1228 = vst.msk [vmem:[#allocation3 + $0xd8] sm:$0xff] %vm908_vm0, %v6613_v43  ;;  %v1278_v39 = vld [vmem:[#allocation2 + $0xf1] sm:$0xff] }
 0x110   : > { %1415 = vrot.lane.b32.xlu1 %v1276_v38, %s6005_s26  ;;  %v6620_v46 = vld [vmem:[#allocation2 + $0x1f0] sm:$0xff]  ;;  %v5832_v47 = vpop.f32.mrf.mxu0 }
 0x111   : > { %1101 = vst.msk [vmem:[#allocation2 + $0x231] sm:$0xff] %vm908_vm0, %v872_v45  ;;  %v875_v48 = vmax.f32 %v5832_v47, 0.0  ;;  %1226 = vst.msk [vmem:[#allocation3 + $0xc8] sm:$0xff] %vm908_vm0, %v6620_v46 }
 0x112   : > { %v704_v51 = vpop.f32.mrf.mxu0  ;;  %v6625_v52 = vld [vmem:[#allocation2 + $0x220] sm:$0xff] }
 0x113   : > { %1802 = vrot.lane.b32.xlu0 %v1662_v50, %s6006_s27  ;;  %1104 = vst.msk [vmem:[#allocation2 + $0x261] sm:$0xff] %vm908_vm0, %v875_v48  ;;  %v873_v53 = vmax.f32 %v704_v51, 0.0  ;;  %1229 = vst.msk [vmem:[#allocation3 + $0xe0] sm:$0xff] %vm908_vm0, %v6625_v52  ;;  %v1285_v51 = vld [vmem:[#allocation2 + $0x181] sm:$0xff] }
 0x114   : > { %1800 = vrot.lane.b32.xlu1 %v1661_v49, %s6006_s27  ;;  %v5835_v54 = vpop.f32.mrf.mxu0  ;;  %v6632_v55 = vld [vmem:[#allocation2 + $0x200] sm:$0xff]  ;;  %v1663_v49 = vld [vmem:[#allocation2 + $0xf2] sm:$0xff] }
 0x115   : > { %1102 = vst.msk [vmem:[#allocation2 + $0x241] sm:$0xff] %vm908_vm0, %v873_v53  ;;  %v878_v56 = vmax.f32 %v5835_v54, 0.0  ;;  %1227 = vst.msk [vmem:[#allocation3 + $0xd0] sm:$0xff] %vm908_vm0, %v6632_v55 }
 0x116   : > { %v6637_v60 = vld [vmem:[#allocation2 + $0x250] sm:$0xff]  ;;  %v717_v61 = vpop.f32.mrf.mxu0 }
 0x117   : > { %1413 = vrot.lane.b32.xlu0 %v1275_v58, %s6005_s26  ;;  %1107 = vst.msk [vmem:[#allocation2 + $0x2b1] sm:$0xff] %vm908_vm0, %v878_v56  ;;  %v876_v63 = vmax.f32 %v717_v61, 0.0  ;;  %1232 = vst.msk [vmem:[#allocation3 + $0xf8] sm:$0xff] %vm908_vm0, %v6637_v60  ;;  %v2050_v56 = vld [vmem:[#allocation2 + $0x120] sm:$0xff] }
 0x118   : > { %1411 = vrot.lane.b32.xlu1 %v1274_v57, %s6005_s26  ;;  %v6644_v0 = vld [vmem:[#allocation2 + $0x230] sm:$0xff]  ;;  %v5836_v2 = vpop.f32.mrf.mxu0  ;;  %v1670_v57 = vld [vmem:[#allocation2 + $0x182] sm:$0xff] }
 0x119   : > { %1105 = vst.msk [vmem:[#allocation2 + $0x291] sm:$0xff] %vm908_vm0, %v876_v63  ;;  %v879_v3 = vmax.f32 %v5836_v2, 0.0  ;;  %1230 = vst.msk [vmem:[#allocation3 + $0xe8] sm:$0xff] %vm908_vm0, %v6644_v0 }
 0x11a   : > { %v720_v7 = vpop.f32.mrf.mxu0 }
 0x11b   : > { %1798 = vrot.lane.b32.xlu0 %v1660_v6, %s6006_s27  ;;  %1108 = vst.msk [vmem:[#allocation2 + $0x2c1] sm:$0xff] %vm908_vm0, %v879_v3  ;;  %v877_v8 = vmax.f32 %v720_v7, 0.0  ;;  %v1284_v3 = vld [vmem:[#allocation2 + $0x171] sm:$0xff] }
 0x11c   : > { %1796 = vrot.lane.b32.xlu1 %v1659_v5, %s6006_s27  ;;  %v5839_v9 = vpop.f32.mrf.mxu0  ;;  %v6652_v11 = vld [vmem:[#allocation2 + $0x240] sm:$0xff] }
 0x11d   : > { %1106 = vst.msk [vmem:[#allocation2 + $0x2a1] sm:$0xff] %vm908_vm0, %v877_v8  ;;  %v882_v12 = vmax.f32 %v5839_v9, 0.0  ;;  %1231 = vst.msk [vmem:[#allocation3 + $0xf0] sm:$0xff] %vm908_vm0, %v6652_v11  ;;  %v1283_v5 = vld [vmem:[#allocation2 + $0x161] sm:$0xff]  ;;  %v1669_v8 = vld [vmem:[#allocation2 + $0x172] sm:$0xff] }
 0x11e   : > { %v6657_v13 = vld [vmem:[#allocation2 + $0x2b0] sm:$0xff]  ;;  %v733_v14 = vpop.f32.mrf.mxu0  ;;  %v1668_v9 = vld [vmem:[#allocation2 + $0x162] sm:$0xff] }
 0x11f   : > { %2191 = vrot.lane.b32.xlu0 %v6546_v1, %s6007_s28  ;;  %1111 = vst.msk [vmem:[#allocation2 + $0x2f1] sm:$0xff] %vm908_vm0, %v882_v12  ;;  %v880_v16 = vmax.f32 %v733_v14, 0.0  ;;  %1236 = vst.msk [vmem:[#allocation3 + $0x118] sm:$0xff] %vm908_vm0, %v6657_v13  ;;  %v1282_v14 = vld [vmem:[#allocation2 + $0x151] sm:$0xff] }
 0x120   : > { %2185 = vrot.lane.b32.xlu1 %v6534_v59, %s6007_s28  ;;  %v6666_v17 = vld [vmem:[#allocation2 + $0x290] sm:$0xff]  ;;  %v5840_v19 = vpop.f32.mrf.mxu0 }
 0x121   : > { %1109 = vst.msk [vmem:[#allocation2 + $0x2d1] sm:$0xff] %vm908_vm0, %v880_v16  ;;  %v883_v20 = vmax.f32 %v5840_v19, 0.0  ;;  %1234 = vst.msk [vmem:[#allocation3 + $0x108] sm:$0xff] %vm908_vm0, %v6666_v17 }
 0x122   : > { %v736_v21 = vpop.f32.mrf.mxu0  ;;  %v6671_v59 = vld [vmem:[#allocation2 + $0x2c0] sm:$0xff] }
 0x123   : > { %2187 = vrot.lane.b32.xlu0 %v6553_v4, %s6007_s28  ;;  %1112 = vst.msk [vmem:[#allocation2 + $0x301] sm:$0xff] %vm908_vm0, %v883_v20  ;;  %v881_v1 = vmax.f32 %v736_v21, 0.0  ;;  %1237 = vst.msk [vmem:[#allocation3 + $0x120] sm:$0xff] %vm908_vm0, %v6671_v59 }
 0x124   : > { %2181 = vrot.lane.b32.xlu1 %v6541_v62, %s6007_s28  ;;  %v5843_v25 = vpop.f32.mrf.mxu0  ;;  %v6680_v26 = vld [vmem:[#allocation2 + $0x2a0] sm:$0xff] }
 0x125   : > { %1110 = vst.msk [vmem:[#allocation2 + $0x2e1] sm:$0xff] %vm908_vm0, %v881_v1  ;;  %v886_v28 = vmax.f32 %v5843_v25, 0.0  ;;  %1235 = vst.msk [vmem:[#allocation3 + $0x110] sm:$0xff] %vm908_vm0, %v6680_v26  ;;  %v1667_v1 = vld [vmem:[#allocation2 + $0x152] sm:$0xff]  ;;  %v1287_v25 = vld [vmem:[#allocation2 + $0x1a1] sm:$0xff] }
 0x126   : > { %v6685_v62 = vld [vmem:[#allocation2 + $0x2f0] sm:$0xff]  ;;  %v749_v4 = vpop.f32.mrf.mxu0 }
 0x127   : > { %1421 = vrot.lane.b32.xlu0 %v1279_v23, %s6005_s26  ;;  %1115 = vst.msk [vmem:[#allocation2 + $0x351] sm:$0xff] %vm908_vm0, %v886_v28  ;;  %v884_v29 = vmax.f32 %v749_v4, 0.0  ;;  %1240 = vst.msk [vmem:[#allocation3 + $0x138] sm:$0xff] %vm908_vm0, %v6685_v62 }
 0x128   : > { %1423 = vrot.lane.b32.xlu1 %v1280_v22, %s6005_s26  ;;  %v6692_v31 = vld [vmem:[#allocation2 + $0x2d0] sm:$0xff]  ;;  %v5844_v32 = vpop.f32.mrf.mxu0 }
 0x129   : > { %1113 = vst.msk [vmem:[#allocation2 + $0x331] sm:$0xff] %vm908_vm0, %v884_v29  ;;  %v887_v34 = vmax.f32 %v5844_v32, 0.0  ;;  %1238 = vst.msk [vmem:[#allocation3 + $0x128] sm:$0xff] %vm908_vm0, %v6692_v31  ;;  %v1672_v29 = vld [vmem:[#allocation2 + $0x1a2] sm:$0xff] }
 0x12a   : > { %v752_v37 = vpop.f32.mrf.mxu0 }
 0x12b   : > { %1806 = vrot.lane.b32.xlu0 %v1664_v36, %s6006_s27  ;;  %1116 = vst.msk [vmem:[#allocation2 + $0x361] sm:$0xff] %vm908_vm0, %v887_v34  ;;  %v885_v38 = vmax.f32 %v752_v37, 0.0 }
 0x12c   : > { %1808 = vrot.lane.b32.xlu1 %v1665_v35, %s6006_s27  ;;  %v5847_v42 = vpop.f32.mrf.mxu0  ;;  %v6721_v61 = vld [vmem:[#allocation2 + $0x2e0] sm:$0xff] }
 0x12d   : > { %1114 = vst.msk [vmem:[#allocation2 + $0x341] sm:$0xff] %vm908_vm0, %v885_v38  ;;  %v890_v44 = vmax.f32 %v5847_v42, 0.0  ;;  %1239 = vst.msk [vmem:[#allocation3 + $0x130] sm:$0xff] %vm908_vm0, %v6721_v61  ;;  %v1288_v38 = vld [vmem:[#allocation2 + $0x1b1] sm:$0xff] }
 0x12e   : > { %v6700_v40 = vld [vmem:[#allocation2 + $0x350] sm:$0xff]  ;;  %v765_v47 = vpop.f32.mrf.mxu0 }
 0x12f   : > { %2199 = vrot.lane.b32.xlu0 %v6566_v15, %s6007_s28  ;;  %1244 = vst.msk [vmem:[#allocation3 + $0x158] sm:$0xff] %vm908_vm0, %v6700_v40  ;;  %1119 = vst.msk [vmem:[#allocation2 + $0x391] sm:$0xff] %vm908_vm0, %v890_v44  ;;  %v888_v48 = vmax.f32 %v765_v47, 0.0 }
 0x130   : > { %1419 = vrot.lane.b32.xlu1 %v1278_v39, %s6005_s26  ;;  %v6708_v45 = vld [vmem:[#allocation2 + $0x330] sm:$0xff]  ;;  %v5848_v50 = vpop.f32.mrf.mxu0 }
 0x131   : > { %1242 = vst.msk [vmem:[#allocation3 + $0x148] sm:$0xff] %vm908_vm0, %v6708_v45  ;;  %1117 = vst.msk [vmem:[#allocation2 + $0x371] sm:$0xff] %vm908_vm0, %v888_v48  ;;  %v891_v15 = vmax.f32 %v5848_v50, 0.0 }
 0x132   : > { %v768_v53 = vpop.f32.mrf.mxu0 }
 0x133   : > { %2195 = vrot.lane.b32.xlu0 %v6573_v18, %s6007_s28  ;;  %1120 = vst.msk [vmem:[#allocation2 + $0x3a1] sm:$0xff] %vm908_vm0, %v891_v15  ;;  %v889_v54 = vmax.f32 %v768_v53, 0.0  ;;  %v1293_v15 = vld [vmem:[#allocation2 + $0x221] sm:$0xff] }
 0x134   : > { %1804 = vrot.lane.b32.xlu1 %v1663_v49, %s6006_s27  ;;  %v5851_v58 = vpop.f32.mrf.mxu0  ;;  %v6749_v4 = vld [vmem:[#allocation2 + $0x340] sm:$0xff]  ;;  %v1673_v49 = vld [vmem:[#allocation2 + $0x1b2] sm:$0xff] }
 0x135   : > { %1118 = vst.msk [vmem:[#allocation2 + $0x381] sm:$0xff] %vm908_vm0, %v889_v54  ;;  %v894_v18 = vmax.f32 %v5851_v58, 0.0  ;;  %1243 = vst.msk [vmem:[#allocation3 + $0x150] sm:$0xff] %vm908_vm0, %v6749_v4  ;;  %v1286_v54 = vld [vmem:[#allocation2 + $0x191] sm:$0xff]  ;;  %v1678_v58 = vld [vmem:[#allocation2 + $0x222] sm:$0xff] }
 0x136   : > { %v781_v63 = vpop.f32.mrf.mxu0 }
 0x137   : > { %1433 = vrot.lane.b32.xlu0 %v1285_v51, %s6005_s26  ;;  %1123 = vst.msk [vmem:[#allocation2 + $0x3f1] sm:$0xff] %vm908_vm0, %v894_v18  ;;  %v892_v2 = vmax.f32 %v781_v63, 0.0 }
 0x138   : > { %2193 = vrot.lane.b32.xlu1 %v2050_v56, %s6007_s28  ;;  %v5852_v6 = vpop.f32.mrf.mxu0 }
 0x139   : > { %1121 = vst.msk [vmem:[#allocation2 + $0x3d1] sm:$0xff] %vm908_vm0, %v892_v2  ;;  %v895_v7 = vmax.f32 %v5852_v6, 0.0 }
 0x13b   : > { %1818 = vrot.lane.b32.xlu0 %v1670_v57, %s6006_s27  ;;  %1124 = vst.msk [vmem:[#allocation2 + $0x401] sm:$0xff] %vm908_vm0, %v895_v7  ;;  %v6787_v7 = vld [vmem:[#allocation2 + $0x370] sm:$0xff] }
 0x13c   : > { %2189 = vrot.lane.b32.xlu1 %v6561_v10, %s6007_s28  ;;  %v784_v10 = vpop.f32.mrf.mxu0  ;;  %1246 = vst.msk [vmem:[#allocation3 + $0x168] sm:$0xff] %vm908_vm0, %v6787_v7 }
 0x13d   : > { %v893_v12 = vmax.f32 %v784_v10, 0.0  ;;  %v6789_v10 = vld [vmem:[#allocation2 + $0x390] sm:$0xff] }
 0x13e   : > { %v5855_v16 = vpop.f32.mrf.mxu0  ;;  %1248 = vst.msk [vmem:[#allocation3 + $0x178] sm:$0xff] %vm908_vm0, %v6789_v10 }
 0x13f   : > { %1429 = vrot.lane.b32.xlu0 %v1283_v5, %s6005_s26  ;;  %1122 = vst.msk [vmem:[#allocation2 + $0x3e1] sm:$0xff] %vm908_vm0, %v893_v12  ;;  %v898_v19 = vmax.f32 %v5855_v16, 0.0  ;;  %v6791_v12 = vld [vmem:[#allocation2 + $0x380] sm:$0xff] }
 0x140   : > { %1431 = vrot.lane.b32.xlu1 %v1284_v3, %s6005_s26  ;;  %v797_v20 = vpop.f32.mrf.mxu0  ;;  %v1671_v3 = vld [vmem:[#allocation2 + $0x192] sm:$0xff]  ;;  %1247 = vst.msk [vmem:[#allocation3 + $0x170] sm:$0xff] %vm908_vm0, %v6791_v12 }
 0x141   : > { %1127 = vst.msk [vmem:[#allocation2 + $0x431] sm:$0xff] %vm908_vm0, %v898_v19  ;;  %v896_v21 = vmax.f32 %v797_v20, 0.0  ;;  %v2058_v20 = vld [vmem:[#allocation2 + $0x1c0] sm:$0xff] }
 0x142   : > { %v5856_v22 = vpop.f32.mrf.mxu0 }
 0x143   : > { %1814 = vrot.lane.b32.xlu0 %v1668_v9, %s6006_s27  ;;  %1125 = vst.msk [vmem:[#allocation2 + $0x411] sm:$0xff] %vm908_vm0, %v896_v21  ;;  %v899_v23 = vmax.f32 %v5856_v22, 0.0  ;;  %v1676_v21 = vld [vmem:[#allocation2 + $0x202] sm:$0xff] }
 0x144   : > { %1816 = vrot.lane.b32.xlu1 %v1669_v8, %s6006_s27  ;;  %v800_v28 = vpop.f32.mrf.mxu0  ;;  %v1291_v8 = vld [vmem:[#allocation2 + $0x201] sm:$0xff] }
 0x145   : > { %1128 = vst.msk [vmem:[#allocation2 + $0x441] sm:$0xff] %vm908_vm0, %v899_v23  ;;  %v1292_v23 = vld [vmem:[#allocation2 + $0x211] sm:$0xff] }
 0x146   : > { %v5859_v32 = vpop.f32.mrf.mxu0 }
 0x147   : > { %2207 = vrot.lane.b32.xlu0 %v6590_v30, %s6007_s28  ;;  %v897_v30 = vmax.f32 %v800_v28, 0.0  ;;  %v902_v36 = vmax.f32 %v5859_v32, 0.0  ;;  %v1295_v32 = vld [vmem:[#allocation2 + $0x241] sm:$0xff] }
 0x148   : > { %1427 = vrot.lane.b32.xlu1 %v1282_v14, %s6005_s26 }
 0x149   : > { %1126 = vst.msk [vmem:[#allocation2 + $0x421] sm:$0xff] %vm908_vm0, %v897_v30  ;;  %1131 = vst.msk [vmem:[#allocation2 + $0x491] sm:$0xff] %vm908_vm0, %v902_v36  ;;  %v6825_v36 = vld [vmem:[#allocation2 + $0x400] sm:$0xff] }
 0x14a   : > { %1253 = vst.msk [vmem:[#allocation3 + $0x1a0] sm:$0xff] %vm908_vm0, %v6825_v36 }
 0x14b   : > { %2203 = vrot.lane.b32.xlu0 %v6598_v33, %s6007_s28  ;;  %v6751_v33 = vld [vmem:[#allocation2 + $0x360] sm:$0xff] }
 0x14c   : > { %1812 = vrot.lane.b32.xlu1 %v1667_v1, %s6006_s27  ;;  %1245 = vst.msk [vmem:[#allocation3 + $0x160] sm:$0xff] %vm908_vm0, %v6751_v33 }
 0x14f   : > { %1437 = vrot.lane.b32.xlu0 %v1287_v25, %s6005_s26 }
 0x150   : > { %2201 = vrot.lane.b32.xlu1 %v6578_v24, %s6007_s28  ;;  %v813_v24 = vpop.f32.mrf.mxu0 }
 0x151   : > { %v6755_v34 = vpop.permute.xlu0 %2167  ;;  %v900_v37 = vmax.f32 %v813_v24, 0.0 }
 0x152   : > { %v1400_v35 = vpop.permute.xlu1 %1399  ;;  %v5860_v39 = vpop.f32.mrf.mxu0 }
 0x153   : > { %1589 = vst.msk [vmem:[#allocation3 + $0x18] sm:$0xff] %vm1585_vm4, %v1400_v35  ;;  %1822 = vrot.lane.b32.xlu0 %v1672_v29, %s6006_s27  ;;  %v903_v47 = vmax.f32 %v5860_v39, 0.0  ;;  %v6823_v35 = vld [vmem:[#allocation2 + $0x3f0] sm:$0xff] }
 0x154   : > { %2197 = vrot.lane.b32.xlu1 %v6585_v27, %s6007_s28  ;;  %1129 = vst.msk [vmem:[#allocation2 + $0x471] sm:$0xff] %vm908_vm0, %v900_v37  ;;  %v816_v50 = vpop.f32.mrf.mxu0  ;;  %1252 = vst.msk [vmem:[#allocation3 + $0x198] sm:$0xff] %vm908_vm0, %v6823_v35 }
 0x155   : > { %v1396_v44 = vpop.permute.xlu0 %1395  ;;  %1132 = vst.msk [vmem:[#allocation2 + $0x4a1] sm:$0xff] %vm908_vm0, %v903_v47  ;;  %v901_v51 = vmax.f32 %v816_v50, 0.0  ;;  %v6853_v50 = vld [vmem:[#allocation2 + $0x410] sm:$0xff] }
 0x156   : > { %v1785_v42 = vpop.permute.xlu1 %1784  ;;  %1587 = vst.msk [vmem:[#allocation3 + $0x8] sm:$0xff] %vm1585_vm4, %v1396_v44  ;;  %v5863_v56 = vpop.f32.mrf.mxu0  ;;  %v1675_v44 = vld [vmem:[#allocation2 + $0x1f2] sm:$0xff] }
 0x157   : > { %1974 = vst.msk [vmem:[#allocation3 + $0x18] sm:$0xff] %vm1970_vm5, %v1785_v42  ;;  %2215 = vrot.lane.b32.xlu0 %v6613_v43, %s6007_s28  ;;  %v906_v57 = vmax.f32 %v5863_v56, 0.0  ;;  %v1681_v56 = vld [vmem:[#allocation2 + $0x252] sm:$0xff] }
 0x158   : > { %1439 = vrot.lane.b32.xlu1 %v1288_v38, %s6005_s26  ;;  %1130 = vst.msk [vmem:[#allocation2 + $0x481] sm:$0xff] %vm908_vm0, %v901_v51  ;;  %v1680_v38 = vld [vmem:[#allocation2 + $0x242] sm:$0xff]  ;;  %1254 = vst.msk [vmem:[#allocation3 + $0x1a8] sm:$0xff] %vm908_vm0, %v6853_v50 }
 0x159   : > { %v2164_v48 = vpop.permute.xlu0 %2163  ;;  %1135 = vst.msk [vmem:[#allocation2 + $0x4d1] sm:$0xff] %vm908_vm0, %v906_v57  ;;  %v6863_v51 = vld [vmem:[#allocation2 + $0x420] sm:$0xff] }
 0x15a   : > { %v1781_v27 = vpop.permute.xlu1 %1780  ;;  %2356 = vst.msk [vmem:[#allocation3] sm:$0xff] %vm2355_vm6, %v2164_v48  ;;  %v1299_v57 = vld [vmem:[#allocation2 + $0x2a1] sm:$0xff] }
 0x15b   : > { %1972 = vst.msk [vmem:[#allocation3 + $0x8] sm:$0xff] %vm1970_vm5, %v1781_v27  ;;  %2211 = vrot.lane.b32.xlu0 %v6620_v46, %s6007_s28  ;;  %v829_v46 = vpop.f32.mrf.mxu0 }
 0x15c   : > { %1824 = vrot.lane.b32.xlu1 %v1673_v49, %s6006_s27  ;;  %v904_v2 = vmax.f32 %v829_v46, 0.0  ;;  %1255 = vst.msk [vmem:[#allocation3 + $0x1b0] sm:$0xff] %vm908_vm0, %v6863_v51 }
 0x15d   : > { %v1402_v43 = vpop.permute.xlu0 %1401  ;;  %v5864_v5 = vpop.f32.mrf.mxu0 }
 0x15e   : > { %v2170_v53 = vpop.permute.xlu1 %2169  ;;  %1590 = vst.msk [vmem:[#allocation3 + $0x20] sm:$0xff] %vm1585_vm4, %v1402_v43  ;;  %v907_v6 = vmax.f32 %v5864_v5, 0.0 }
 0x15f   : > { %2359 = vst.msk [vmem:[#allocation3 + $0x18] sm:$0xff] %vm2355_vm6, %v2170_v53  ;;  %1449 = vrot.lane.b32.xlu0 %v1293_v15, %s6005_s26  ;;  %v832_v9 = vpop.f32.mrf.mxu0  ;;  %v6859_v15 = vld [vmem:[#allocation2 + $0x430] sm:$0xff] }
 0x160   : > { %1435 = vrot.lane.b32.xlu1 %v1286_v54, %s6005_s26  ;;  %1133 = vst.msk [vmem:[#allocation2 + $0x4b1] sm:$0xff] %vm908_vm0, %v904_v2  ;;  %1136 = vst.msk [vmem:[#allocation2 + $0x4e1] sm:$0xff] %vm908_vm0, %v907_v6  ;;  %v905_v19 = vmax.f32 %v832_v9, 0.0  ;;  %v1684_v2 = vld [vmem:[#allocation2 + $0x2a2] sm:$0xff]  ;;  %v1679_v6 = vld [vmem:[#allocation2 + $0x232] sm:$0xff] }
 0x161   : > { %v1787_v18 = vpop.permute.xlu0 %1786  ;;  %1256 = vst.msk [vmem:[#allocation3 + $0x1b8] sm:$0xff] %vm908_vm0, %v6859_v15  ;;  %v6891_v9 = vld [vmem:[#allocation2 + $0x480] sm:$0xff] }
 0x162   : > { %v1398_v63 = vpop.permute.xlu1 %1397  ;;  %1975 = vst.msk [vmem:[#allocation3 + $0x20] sm:$0xff] %vm1970_vm5, %v1787_v18  ;;  %v1294_v18 = vld [vmem:[#allocation2 + $0x231] sm:$0xff] }
 0x163   : > { %1588 = vst.msk [vmem:[#allocation3 + $0x10] sm:$0xff] %vm1585_vm4, %v1398_v63  ;;  %1834 = vrot.lane.b32.xlu0 %v1678_v58, %s6006_s27  ;;  %v6879_v63 = vld [vmem:[#allocation2 + $0x470] sm:$0xff] }
 0x164   : > { %1820 = vrot.lane.b32.xlu1 %v1671_v3, %s6006_s27  ;;  %1134 = vst.msk [vmem:[#allocation2 + $0x4c1] sm:$0xff] %vm908_vm0, %v905_v19  ;;  %1258 = vst.msk [vmem:[#allocation3 + $0x1c8] sm:$0xff] %vm908_vm0, %v6879_v63 }
 0x165   : > { %v1783_v14 = vpop.permute.xlu0 %1782  ;;  %1259 = vst.msk [vmem:[#allocation3 + $0x1d0] sm:$0xff] %vm908_vm0, %v6891_v9 }
 0x166   : > { %v2166_v16 = vpop.permute.xlu1 %2165  ;;  %1973 = vst.msk [vmem:[#allocation3 + $0x10] sm:$0xff] %vm1970_vm5, %v1783_v14  ;;  %v6895_v14 = vld [vmem:[#allocation2 + $0x4a0] sm:$0xff] }
 0x167   : > { %2357 = vst.msk [vmem:[#allocation3 + $0x8] sm:$0xff] %vm2355_vm6, %v2166_v16  ;;  %2358 = vst.msk [vmem:[#allocation3 + $0x10] sm:$0xff] %vm2355_vm6, %v6755_v34  ;;  %1445 = vrot.lane.b32.xlu0 %v1291_v8, %s6005_s26  ;;  %v6821_v34 = vld [vmem:[#allocation2 + $0x3d0] sm:$0xff] }
 0x168   : > { %2209 = vrot.lane.b32.xlu1 %v2058_v20, %s6007_s28  ;;  %1250 = vst.msk [vmem:[#allocation3 + $0x188] sm:$0xff] %vm908_vm0, %v6821_v34  ;;  %v6887_v8 = vld [vmem:[#allocation2 + $0x490] sm:$0xff]  ;;  %1261 = vst.msk [vmem:[#allocation3 + $0x1e0] sm:$0xff] %vm908_vm0, %v6895_v14  ;;  %v2066_v20 = vld [vmem:[#allocation2 + $0x260] sm:$0xff] }
 0x169   : > { %v2176_v1 = vpop.permute.xlu0 %2175  ;;  %1260 = vst.msk [vmem:[#allocation3 + $0x1d8] sm:$0xff] %vm908_vm0, %v6887_v8 }
 0x16a   : > { %v1408_v22 = vpop.permute.xlu1 %1407 }
 0x16b   : > { %1593 = vst.msk [vmem:[#allocation3 + $0x38] sm:$0xff] %vm1585_vm4, %v1408_v22  ;;  %1830 = vrot.lane.b32.xlu0 %v1676_v21, %s6006_s27  ;;  %v6903_v21 = vld [vmem:[#allocation2 + $0x4b0] sm:$0xff] }
 0x16c   : > { %2205 = vrot.lane.b32.xlu1 %v6608_v41, %s6007_s28  ;;  %v1677_v41 = vld [vmem:[#allocation2 + $0x212] sm:$0xff]  ;;  %1262 = vst.msk [vmem:[#allocation3 + $0x1e8] sm:$0xff] %vm908_vm0, %v6903_v21 }
 0x16d   : > { %v2172_v28 = vpop.permute.xlu0 %2171 }
 0x16e   : > { %v1793_v25 = vpop.permute.xlu1 %1792  ;;  %2360 = vst.msk [vmem:[#allocation3 + $0x20] sm:$0xff] %vm2355_vm6, %v2172_v28 }
 0x16f   : > { %1978 = vst.msk [vmem:[#allocation3 + $0x38] sm:$0xff] %vm1970_vm5, %v1793_v25  ;;  %2223 = vrot.lane.b32.xlu0 %v6637_v60, %s6007_s28  ;;  %v6827_v60 = vld [vmem:[#allocation2 + $0x3e0] sm:$0xff] }
 0x170   : > { %1447 = vrot.lane.b32.xlu1 %v1292_v23, %s6005_s26  ;;  %1251 = vst.msk [vmem:[#allocation3 + $0x190] sm:$0xff] %vm908_vm0, %v6827_v60  ;;  %v6912_v23 = vld [vmem:[#allocation2 + $0x4d0] sm:$0xff]  ;;  %v1303_v25 = vld [vmem:[#allocation2 + $0x2e1] sm:$0xff] }
 0x171   : > { %v1406_v29 = vpop.permute.xlu0 %1405  ;;  %1264 = vst.msk [vmem:[#allocation3 + $0x1f8] sm:$0xff] %vm908_vm0, %v6912_v23 }
 0x172   : > { %v1404_v30 = vpop.permute.xlu1 %1403  ;;  %1592 = vst.msk [vmem:[#allocation3 + $0x30] sm:$0xff] %vm1585_vm4, %v1406_v29 }
 0x173   : > { %1591 = vst.msk [vmem:[#allocation3 + $0x28] sm:$0xff] %vm1585_vm4, %v1404_v30  ;;  %2219 = vrot.lane.b32.xlu0 %v6644_v0, %s6007_s28  ;;  %v1290_v0 = vld [vmem:[#allocation2 + $0x1f1] sm:$0xff] }
 0x174   : > { %1832 = vrot.lane.b32.xlu1 %v1677_v41, %s6006_s27  ;;  %v1685_v41 = vld [vmem:[#allocation2 + $0x2b2] sm:$0xff] }
 0x175   : > { %v1791_v37 = vpop.permute.xlu0 %1790 }
 0x176   : > { %v1789_v24 = vpop.permute.xlu1 %1788  ;;  %1977 = vst.msk [vmem:[#allocation3 + $0x30] sm:$0xff] %vm1970_vm5, %v1791_v37 }
 0x177   : > { %1976 = vst.msk [vmem:[#allocation3 + $0x28] sm:$0xff] %vm1970_vm5, %v1789_v24  ;;  %1453 = vrot.lane.b32.xlu0 %v1295_v32, %s6005_s26  ;;  %v6928_v32 = vld [vmem:[#allocation2 + $0x4c0] sm:$0xff] }
 0x178   : > { %2362 = vst.msk [vmem:[#allocation3 + $0x30] sm:$0xff] %vm2355_vm6, %v2176_v1  ;;  %1443 = vrot.lane.b32.xlu1 %v1290_v0, %s6005_s26  ;;  %v6934_v0 = vld [vmem:[#allocation2 + $0x291] sm:$0xff] }
 0x179   : > { %v2184_v42 = vpop.permute.xlu0 %2183  ;;  %1263 = vst.msk [vmem:[#allocation3 + $0x1f0] sm:$0xff] %vm908_vm0, %v6928_v32 }
 0x17a   : > { %v2178_v39 = vpop.permute.xlu1 %2177 }
 0x17b   : > { %2363 = vst.msk [vmem:[#allocation3 + $0x38] sm:$0xff] %vm2355_vm6, %v2178_v39  ;;  %1838 = vrot.lane.b32.xlu0 %v1680_v38, %s6006_s27 }
 0x17c   : > { %1828 = vrot.lane.b32.xlu1 %v1675_v44, %s6006_s27  ;;  %v1309_v44 = vld [vmem:[#allocation2 + $0x361] sm:$0xff] }
 0x17d   : > { %v2180_v27 = vpop.permute.xlu0 %2179 }
 0x17e   : > { %v2174_v47 = vpop.permute.xlu1 %2173  ;;  %2364 = vst.msk [vmem:[#allocation3 + $0x40] sm:$0xff] %vm2355_vm6, %v2180_v27 }
 0x17f   : > { %2361 = vst.msk [vmem:[#allocation3 + $0x28] sm:$0xff] %vm2355_vm6, %v2174_v47  ;;  %2231 = vrot.lane.b32.xlu0 %v6657_v13, %s6007_s28  ;;  %v1301_v13 = vld [vmem:[#allocation2 + $0x2c1] sm:$0xff] }
 0x180   : > { %2217 = vrot.lane.b32.xlu1 %v6625_v52, %s6007_s28  ;;  %v1296_v52 = vld [vmem:[#allocation2 + $0x251] sm:$0xff] }
 0x181   : > { %v1418_v49 = vpop.permute.xlu0 %1417 }
 0x182   : > { %v1416_v48 = vpop.permute.xlu1 %1415  ;;  %1598 = vst.msk [vmem:[#allocation3 + $0x60] sm:$0xff] %vm1585_vm4, %v1418_v49 }
 0x183   : > { %1597 = vst.msk [vmem:[#allocation3 + $0x58] sm:$0xff] %vm1585_vm4, %v1416_v48  ;;  %2227 = vrot.lane.b32.xlu0 %v6666_v17, %s6007_s28 }
 0x184   : > { %2213 = vrot.lane.b32.xlu1 %v6632_v55, %s6007_s28  ;;  %v1686_v55 = vld [vmem:[#allocation2 + $0x2c2] sm:$0xff] }
 0x185   : > { %v1803_v43 = vpop.permute.xlu0 %1802 }
 0x186   : > { %v1801_v53 = vpop.permute.xlu1 %1800  ;;  %1983 = vst.msk [vmem:[#allocation3 + $0x60] sm:$0xff] %vm1970_vm5, %v1803_v43 }
 0x187   : > { %1982 = vst.msk [vmem:[#allocation3 + $0x58] sm:$0xff] %vm1970_vm5, %v1801_v53  ;;  %1465 = vrot.lane.b32.xlu0 %v1301_v13, %s6005_s26 }
 0x188   : > { %1455 = vrot.lane.b32.xlu1 %v1296_v52, %s6005_s26  ;;  %v1307_v52 = vld [vmem:[#allocation2 + $0x341] sm:$0xff] }
 0x189   : > { %v1414_v54 = vpop.permute.xlu0 %1413 }
 0x18a   : > { %v1412_v17 = vpop.permute.xlu1 %1411  ;;  %1596 = vst.msk [vmem:[#allocation3 + $0x50] sm:$0xff] %vm1585_vm4, %v1414_v54 }
 0x18b   : > { %1595 = vst.msk [vmem:[#allocation3 + $0x48] sm:$0xff] %vm1585_vm4, %v1412_v17  ;;  %1850 = vrot.lane.b32.xlu0 %v1686_v55, %s6006_s27  ;;  %v1689_v55 = vld [vmem:[#allocation2 + $0x2f2] sm:$0xff]  ;;  %v1311_v17 = vld [vmem:[#allocation2 + $0x381] sm:$0xff] }
 0x18c   : > { %1840 = vrot.lane.b32.xlu1 %v1681_v56, %s6006_s27 }
 0x18d   : > { %v1799_v46 = vpop.permute.xlu0 %1798 }
 0x18e   : > { %v1797_v58 = vpop.permute.xlu1 %1796  ;;  %1981 = vst.msk [vmem:[#allocation3 + $0x50] sm:$0xff] %vm1970_vm5, %v1799_v46 }
 0x18f   : > { %1980 = vst.msk [vmem:[#allocation3 + $0x48] sm:$0xff] %vm1970_vm5, %v1797_v58  ;;  %1461 = vrot.lane.b32.xlu0 %v1299_v57, %s6005_s26  ;;  %v6968_v57 = vld [vmem:[#allocation2 + $0x2d1] sm:$0xff]  ;;  %v1696_v58 = vld [vmem:[#allocation2 + $0x382] sm:$0xff] }
 0x190   : > { %2366 = vst.msk [vmem:[#allocation3 + $0x50] sm:$0xff] %vm2355_vm6, %v2184_v42  ;;  %1451 = vrot.lane.b32.xlu1 %v1294_v18, %s6005_s26  ;;  %v1683_v42 = vld [vmem:[#allocation2 + $0x292] sm:$0xff] }
 0x191   : > { %v2192_v5 = vpop.permute.xlu0 %2191 }
 0x192   : > { %v2186_v3 = vpop.permute.xlu1 %2185 }
 0x193   : > { %2367 = vst.msk [vmem:[#allocation3 + $0x58] sm:$0xff] %vm2355_vm6, %v2186_v3  ;;  %1846 = vrot.lane.b32.xlu0 %v1684_v2, %s6006_s27  ;;  %v1687_v2 = vld [vmem:[#allocation2 + $0x2d2] sm:$0xff]  ;;  %v1317_v3 = vld [vmem:[#allocation2 + $0x401] sm:$0xff] }
 0x194   : > { %1836 = vrot.lane.b32.xlu1 %v1679_v6, %s6006_s27 }
 0x195   : > { %v2188_v19 = vpop.permute.xlu0 %2187 }
 0x196   : > { %v2182_v16 = vpop.permute.xlu1 %2181  ;;  %2368 = vst.msk [vmem:[#allocation3 + $0x60] sm:$0xff] %vm2355_vm6, %v2188_v19  ;;  %v1702_v19 = vld [vmem:[#allocation2 + $0x402] sm:$0xff] }
 0x197   : > { %2365 = vst.msk [vmem:[#allocation3 + $0x48] sm:$0xff] %vm2355_vm6, %v2182_v16  ;;  %2239 = vrot.lane.b32.xlu0 %v6685_v62, %s6007_s28  ;;  %v1300_v62 = vld [vmem:[#allocation2 + $0x2b1] sm:$0xff]  ;;  %v2074_v16 = vld [vmem:[#allocation2 + $0x300] sm:$0xff] }
 0x198   : > { %2225 = vrot.lane.b32.xlu1 %v2066_v20, %s6007_s28 }
 0x199   : > { %v1422_v22 = vpop.permute.xlu0 %1421 }
 0x19a   : > { %v1424_v1 = vpop.permute.xlu1 %1423  ;;  %1600 = vst.msk [vmem:[#allocation3 + $0x70] sm:$0xff] %vm1585_vm4, %v1422_v22  ;;  %v6986_v22 = vld [vmem:[#allocation2 + $0x351] sm:$0xff] }
 0x19b   : > { %1601 = vst.msk [vmem:[#allocation3 + $0x78] sm:$0xff] %vm1585_vm4, %v1424_v1  ;;  %2235 = vrot.lane.b32.xlu0 %v6692_v31, %s6007_s28 }
 0x19c   : > { %2221 = vrot.lane.b32.xlu1 %v6652_v11, %s6007_s28  ;;  %v1688_v11 = vld [vmem:[#allocation2 + $0x2e2] sm:$0xff] }
 0x19d   : > { %v1807_v30 = vpop.permute.xlu0 %1806 }
 0x19e   : > { %v1809_v28 = vpop.permute.xlu1 %1808  ;;  %1985 = vst.msk [vmem:[#allocation3 + $0x70] sm:$0xff] %vm1970_vm5, %v1807_v30  ;;  %v1700_v30 = vld [vmem:[#allocation2 + $0x3e2] sm:$0xff] }
 0x19f   : > { %1986 = vst.msk [vmem:[#allocation3 + $0x78] sm:$0xff] %vm1970_vm5, %v1809_v28  ;;  %1469 = vrot.lane.b32.xlu0 %v1303_v25, %s6005_s26 }
 0x1a0   : > { %2370 = vst.msk [vmem:[#allocation3 + $0x70] sm:$0xff] %vm2355_vm6, %v2192_v5  ;;  %1463 = vrot.lane.b32.xlu1 %v1300_v62, %s6005_s26  ;;  %v1315_v62 = vld [vmem:[#allocation2 + $0x3e1] sm:$0xff] }
 0x1a1   : > { %v2200_v31 = vpop.permute.xlu0 %2199 }
 0x1a2   : > { %v1420_v29 = vpop.permute.xlu1 %1419 }
 0x1a3   : > { %1599 = vst.msk [vmem:[#allocation3 + $0x68] sm:$0xff] %vm1585_vm4, %v1420_v29  ;;  %1854 = vrot.lane.b32.xlu0 %v1688_v11, %s6006_s27 }
 0x1a4   : > { %1848 = vrot.lane.b32.xlu1 %v1685_v41, %s6006_s27 }
 0x1a5   : > { %v2196_v37 = vpop.permute.xlu0 %2195 }
 0x1a6   : > { %v1805_v24 = vpop.permute.xlu1 %1804  ;;  %2372 = vst.msk [vmem:[#allocation3 + $0x80] sm:$0xff] %vm2355_vm6, %v2196_v37  ;;  %v6999_v37 = vld [vmem:[#allocation2 + $0x331] sm:$0xff] }
 0x1a7   : > { %1984 = vst.msk [vmem:[#allocation3 + $0x68] sm:$0xff] %vm1970_vm5, %v1805_v24  ;;  %2247 = vrot.lane.b32.xlu0 %v6700_v40, %s6007_s28  ;;  %v1694_v40 = vld [vmem:[#allocation2 + $0x362] sm:$0xff] }
 0x1a8   : > { %1459 = vrot.lane.b32.xlu1 %v6934_v0, %s6005_s26 }
 0x1a9   : > { %v1434_v39 = vpop.permute.xlu0 %1433 }
 0x1aa   : > { %v2194_v38 = vpop.permute.xlu1 %2193  ;;  %1606 = vst.msk [vmem:[#allocation3 + $0xa0] sm:$0xff] %vm1585_vm4, %v1434_v39 }
 0x1ab   : > { %2371 = vst.msk [vmem:[#allocation3 + $0x78] sm:$0xff] %vm2355_vm6, %v2194_v38  ;;  %2243 = vrot.lane.b32.xlu0 %v6708_v45, %s6007_s28  ;;  %v6955_v45 = vld [vmem:[#allocation2 + $0x2f1] sm:$0xff]  ;;  %v1704_v38 = vld [vmem:[#allocation2 + $0x422] sm:$0xff] }
 0x1ac   : > { %1844 = vrot.lane.b32.xlu1 %v1683_v42, %s6006_s27 }
 0x1ad   : > { %v1819_v27 = vpop.permute.xlu0 %1818 }
 0x1ae   : > { %v2190_v47 = vpop.permute.xlu1 %2189  ;;  %1991 = vst.msk [vmem:[#allocation3 + $0xa0] sm:$0xff] %vm1970_vm5, %v1819_v27 }
 0x1af   : > { %2369 = vst.msk [vmem:[#allocation3 + $0x68] sm:$0xff] %vm2355_vm6, %v2190_v47  ;;  %1481 = vrot.lane.b32.xlu0 %v1309_v44, %s6005_s26  ;;  %v1691_v44 = vld [vmem:[#allocation2 + $0x332] sm:$0xff]  ;;  %v1325_v47 = vld [vmem:[#allocation2 + $0x4a1] sm:$0xff] }
 0x1b0   : > { %2233 = vrot.lane.b32.xlu1 %v6671_v59, %s6007_s28  ;;  %v1692_v59 = vld [vmem:[#allocation2 + $0x342] sm:$0xff] }
 0x1b1   : > { %v1430_v49 = vpop.permute.xlu0 %1429 }
 0x1b2   : > { %v1432_v48 = vpop.permute.xlu1 %1431  ;;  %1604 = vst.msk [vmem:[#allocation3 + $0x90] sm:$0xff] %vm1585_vm4, %v1430_v49  ;;  %v1710_v49 = vld [vmem:[#allocation2 + $0x4a2] sm:$0xff] }
 0x1b3   : > { %1605 = vst.msk [vmem:[#allocation3 + $0x98] sm:$0xff] %vm1585_vm4, %v1432_v48  ;;  %1866 = vrot.lane.b32.xlu0 %v1694_v40, %s6006_s27  ;;  %v7014_v48 = vld [vmem:[#allocation2 + $0x391] sm:$0xff] }
 0x1b4   : > { %2229 = vrot.lane.b32.xlu1 %v6680_v26, %s6007_s28 }
 0x1b5   : > { %v1815_v53 = vpop.permute.xlu0 %1814 }
 0x1b6   : > { %v1817_v13 = vpop.permute.xlu1 %1816  ;;  %1989 = vst.msk [vmem:[#allocation3 + $0x90] sm:$0xff] %vm1970_vm5, %v1815_v53  ;;  %v1323_v53 = vld [vmem:[#allocation2 + $0x481] sm:$0xff] }
 0x1b7   : > { %1990 = vst.msk [vmem:[#allocation3 + $0x98] sm:$0xff] %vm1970_vm5, %v1817_v13  ;;  %1477 = vrot.lane.b32.xlu0 %v1307_v52, %s6005_s26 }
 0x1b8   : > { %2374 = vst.msk [vmem:[#allocation3 + $0x90] sm:$0xff] %vm2355_vm6, %v2200_v31  ;;  %1471 = vrot.lane.b32.xlu1 %v6955_v45, %s6005_s26  ;;  %v1319_v31 = vld [vmem:[#allocation2 + $0x421] sm:$0xff] }
 0x1b9   : > { %v2208_v43 = vpop.permute.xlu0 %2207 }
 0x1ba   : > { %v1428_v26 = vpop.permute.xlu1 %1427 }
 0x1bb   : > { %1603 = vst.msk [vmem:[#allocation3 + $0x88] sm:$0xff] %vm1585_vm4, %v1428_v26  ;;  %1862 = vrot.lane.b32.xlu0 %v1692_v59, %s6006_s27 }
 0x1bc   : > { %1856 = vrot.lane.b32.xlu1 %v1689_v55, %s6006_s27 }
 0x1bd   : > { %v2204_v56 = vpop.permute.xlu0 %2203 }
 0x1be   : > { %v1813_v54 = vpop.permute.xlu1 %1812  ;;  %2376 = vst.msk [vmem:[#allocation3 + $0xa0] sm:$0xff] %vm2355_vm6, %v2204_v56  ;;  %v1327_v56 = vld [vmem:[#allocation2 + $0x4c1] sm:$0xff] }
 0x1bf   : > { %1988 = vst.msk [vmem:[#allocation3 + $0x88] sm:$0xff] %vm1970_vm5, %v1813_v54  ;;  %1485 = vrot.lane.b32.xlu0 %v1311_v17, %s6005_s26  ;;  %v7026_v54 = vld [vmem:[#allocation2 + $0x371] sm:$0xff] }
 0x1c0   : > { %1467 = vrot.lane.b32.xlu1 %v6968_v57, %s6005_s26 }
 0x1c1   : > { %v1438_v18 = vpop.permute.xlu0 %1437 }
 0x1c2   : > { %v2202_v46 = vpop.permute.xlu1 %2201  ;;  %1608 = vst.msk [vmem:[#allocation3 + $0xb0] sm:$0xff] %vm1585_vm4, %v1438_v18  ;;  %v1695_v18 = vld [vmem:[#allocation2 + $0x372] sm:$0xff] }
 0x1c3   : > { %2375 = vst.msk [vmem:[#allocation3 + $0x98] sm:$0xff] %vm2355_vm6, %v2202_v46  ;;  %1870 = vrot.lane.b32.xlu0 %v1696_v58, %s6006_s27 }
 0x1c4   : > { %1852 = vrot.lane.b32.xlu1 %v1687_v2, %s6006_s27  ;;  %v7036_v2 = vld [vmem:[#allocation2 + $0x3f1] sm:$0xff] }
 0x1c5   : > { %v1823_v6 = vpop.permute.xlu0 %1822 }
 0x1c6   : > { %v2198_v5 = vpop.permute.xlu1 %2197  ;;  %1993 = vst.msk [vmem:[#allocation3 + $0xb0] sm:$0xff] %vm1970_vm5, %v1823_v6 }
 0x1c7   : > { %2373 = vst.msk [vmem:[#allocation3 + $0x88] sm:$0xff] %vm2355_vm6, %v2198_v5  ;;  %2378 = vst.msk [vmem:[#allocation3 + $0xb0] sm:$0xff] %vm2355_vm6, %v2208_v43  ;;  %1497 = vrot.lane.b32.xlu0 %v1317_v3, %s6005_s26  ;;  %v1708_v43 = vld [vmem:[#allocation2 + $0x482] sm:$0xff] }
 0x1c8   : > { %2241 = vrot.lane.b32.xlu1 %v2074_v16, %s6007_s28  ;;  %v1712_v3 = vld [vmem:[#allocation2 + $0x4c2] sm:$0xff] }
 0x1c9   : > { %v2216_v1 = vpop.permute.xlu0 %2215 }
 0x1ca   : > { %v1440_v20 = vpop.permute.xlu1 %1439 }
 0x1cb   : > { %1609 = vst.msk [vmem:[#allocation3 + $0xb8] sm:$0xff] %vm1585_vm4, %v1440_v20  ;;  %1882 = vrot.lane.b32.xlu0 %v1702_v19, %s6006_s27  ;;  %v1701_v20 = vld [vmem:[#allocation2 + $0x3f2] sm:$0xff] }
 0x1cc   : > { %2237 = vrot.lane.b32.xlu1 %v6721_v61, %s6007_s28  ;;  %v1693_v61 = vld [vmem:[#allocation2 + $0x352] sm:$0xff] }
 0x1cd   : > { %v2212_v28 = vpop.permute.xlu0 %2211 }
 0x1ce   : > { %v1825_v25 = vpop.permute.xlu1 %1824  ;;  %2380 = vst.msk [vmem:[#allocation3 + $0xc0] sm:$0xff] %vm2355_vm6, %v2212_v28 }
 0x1cf   : > { %1994 = vst.msk [vmem:[#allocation3 + $0xb8] sm:$0xff] %vm1970_vm5, %v1825_v25  ;;  %1493 = vrot.lane.b32.xlu0 %v1315_v62, %s6005_s26  ;;  %v7049_v25 = vld [vmem:[#allocation2 + $0x3d1] sm:$0xff] }
 0x1d0   : > { %1479 = vrot.lane.b32.xlu1 %v6986_v22, %s6005_s26 }
 0x1d1   : > { %v1450_v29 = vpop.permute.xlu0 %1449 }
 0x1d2   : > { %v1436_v11 = vpop.permute.xlu1 %1435  ;;  %1614 = vst.msk [vmem:[#allocation3 + $0xe0] sm:$0xff] %vm1585_vm4, %v1450_v29 }
 0x1d3   : > { %1607 = vst.msk [vmem:[#allocation3 + $0xa8] sm:$0xff] %vm1585_vm4, %v1436_v11  ;;  %1878 = vrot.lane.b32.xlu0 %v1700_v30, %s6006_s27  ;;  %v7060_v11 = vld [vmem:[#allocation2 + $0x431] sm:$0xff] }
 0x1d4   : > { %1864 = vrot.lane.b32.xlu1 %v1693_v61, %s6006_s27 }
 0x1d5   : > { %v1835_v24 = vpop.permute.xlu0 %1834 }
 0x1d6   : > { %v1821_v41 = vpop.permute.xlu1 %1820  ;;  %1999 = vst.msk [vmem:[#allocation3 + $0xe0] sm:$0xff] %vm1970_vm5, %v1835_v24 }
 0x1d7   : > { %1992 = vst.msk [vmem:[#allocation3 + $0xa8] sm:$0xff] %vm1970_vm5, %v1821_v41  ;;  %1501 = vrot.lane.b32.xlu0 %v1319_v31, %s6005_s26 }
 0x1d8   : > { %1475 = vrot.lane.b32.xlu1 %v6999_v37, %s6005_s26 }
 0x1d9   : > { %v1446_v42 = vpop.permute.xlu0 %1445 }
 0x1da   : > { %v2210_v39 = vpop.permute.xlu1 %2209  ;;  %1612 = vst.msk [vmem:[#allocation3 + $0xd0] sm:$0xff] %vm1585_vm4, %v1446_v42  ;;  %v1703_v42 = vld [vmem:[#allocation2 + $0x412] sm:$0xff] }
 0x1db   : > { %2379 = vst.msk [vmem:[#allocation3 + $0xb8] sm:$0xff] %vm2355_vm6, %v2210_v39  ;;  %1886 = vrot.lane.b32.xlu0 %v1704_v38, %s6006_s27  ;;  %v7075_v38 = vld [vmem:[#allocation2 + $0x411] sm:$0xff] }
 0x1dc   : > { %1860 = vrot.lane.b32.xlu1 %v1691_v44, %s6006_s27 }
 0x1dd   : > { %v1831_v40 = vpop.permute.xlu0 %1830 }
 0x1de   : > { %v2206_v27 = vpop.permute.xlu1 %2205  ;;  %1997 = vst.msk [vmem:[#allocation3 + $0xd0] sm:$0xff] %vm1970_vm5, %v1831_v40 }
 0x1df   : > { %2377 = vst.msk [vmem:[#allocation3 + $0xa8] sm:$0xff] %vm2355_vm6, %v2206_v27  ;;  %2382 = vst.msk [vmem:[#allocation3 + $0xd0] sm:$0xff] %vm2355_vm6, %v2216_v1  ;;  %1513 = vrot.lane.b32.xlu0 %v1325_v47, %s6005_s26 }
 0x1e0   : > { %2245 = vrot.lane.b32.xlu1 %v6749_v4, %s6007_s28  ;;  %v1697_v4 = vld [vmem:[#allocation2 + $0x392] sm:$0xff] }
 0x1e1   : > { %v2224_v13 = vpop.permute.xlu0 %2223 }
 0x1e2   : > { %v1448_v52 = vpop.permute.xlu1 %1447 }
 0x1e3   : > { %1613 = vst.msk [vmem:[#allocation3 + $0xd8] sm:$0xff] %vm1585_vm4, %v1448_v52  ;;  %1898 = vrot.lane.b32.xlu0 %v1710_v49, %s6006_s27  ;;  %v7101_v52 = vld [vmem:[#allocation2 + $0x471] sm:$0xff] }
 0x1e4   : > { %1487 = vrot.lane.b32.xlu1 %v7014_v48, %s6005_s26 }
 0x1e5   : > { %v2220_v26 = vpop.permute.xlu0 %2219 }
 0x1e6   : > { %v1833_v59 = vpop.permute.xlu1 %1832  ;;  %2384 = vst.msk [vmem:[#allocation3 + $0xe0] sm:$0xff] %vm2355_vm6, %v2220_v26 }
 0x1e7   : > { %1998 = vst.msk [vmem:[#allocation3 + $0xd8] sm:$0xff] %vm1970_vm5, %v1833_v59  ;;  %1509 = vrot.lane.b32.xlu0 %v1323_v53, %s6005_s26  ;;  %v1707_v53 = vld [vmem:[#allocation2 + $0x472] sm:$0xff] }
 0x1e8   : > { %1872 = vrot.lane.b32.xlu1 %v1697_v4, %s6006_s27  ;;  %v7111_v59 = vld [vmem:[#allocation2 + $0x4d1] sm:$0xff] }
 0x1e9   : > { %v1454_v17 = vpop.permute.xlu0 %1453 }
 0x1ea   : > { %v1444_v55 = vpop.permute.xlu1 %1443  ;;  %1616 = vst.msk [vmem:[#allocation3 + $0xf0] sm:$0xff] %vm1585_vm4, %v1454_v17  ;;  %v1713_v17 = vld [vmem:[#allocation2 + $0x4d2] sm:$0xff] }
 0x1eb   : > { %1611 = vst.msk [vmem:[#allocation3 + $0xc8] sm:$0xff] %vm1585_vm4, %v1444_v55  ;;  %1894 = vrot.lane.b32.xlu0 %v1708_v43, %s6006_s27 }
 0x1ec   : > { %1483 = vrot.lane.b32.xlu1 %v7026_v54, %s6005_s26 }
 0x1ed   : > { %v1839_v46 = vpop.permute.xlu0 %1838 }
 0x1ee   : > { %v1829_v58 = vpop.permute.xlu1 %1828  ;;  %2001 = vst.msk [vmem:[#allocation3 + $0xf0] sm:$0xff] %vm1970_vm5, %v1839_v46 }
 0x1ef   : > { %1996 = vst.msk [vmem:[#allocation3 + $0xc8] sm:$0xff] %vm1970_vm5, %v1829_v58  ;;  %1517 = vrot.lane.b32.xlu0 %v1327_v56, %s6005_s26  ;;  %v2424_v56 = vld [vmem:[#allocation2 + $0x51] sm:$0xff] }
 0x1f0   : > { %2386 = vst.msk [vmem:[#allocation3 + $0xf0] sm:$0xff] %vm2355_vm6, %v2224_v13  ;;  %1868 = vrot.lane.b32.xlu1 %v1695_v18, %s6006_s27  ;;  %v7124_v18 = vld [vmem:[#allocation2 + $0x4b1] sm:$0xff] }
 0x1f1   : > { %v2232_v6 = vpop.permute.xlu0 %2231 }
 0x1f2   : > { %v2218_v5 = vpop.permute.xlu1 %2217 }
 0x1f3   : > { %2383 = vst.msk [vmem:[#allocation3 + $0xd8] sm:$0xff] %vm2355_vm6, %v2218_v5  ;;  %1902 = vrot.lane.b32.xlu0 %v1712_v3, %s6006_s27  ;;  %v2426_v3 = vld [vmem:[#allocation2 + $0x71] sm:$0xff] }
 0x1f4   : > { %1495 = vrot.lane.b32.xlu1 %v7036_v2, %s6005_s26 }
 0x1f5   : > { %v2228_v19 = vpop.permute.xlu0 %2227 }
 0x1f6   : > { %v2214_v16 = vpop.permute.xlu1 %2213  ;;  %2388 = vst.msk [vmem:[#allocation3 + $0x100] sm:$0xff] %vm2355_vm6, %v2228_v19  ;;  %v2428_v19 = vld [vmem:[#allocation2 + $0xb1] sm:$0xff] }
 0x1f7   : > { %2381 = vst.msk [vmem:[#allocation3 + $0xc8] sm:$0xff] %vm2355_vm6, %v2214_v16  ;;  %2251 = vrot.lane.b32.xlu0 %v6787_v7, %s6007_s28  ;;  %v1699_v7 = vld [vmem:[#allocation2 + $0x3d2] sm:$0xff] }
 0x1f8   : > { %1880 = vrot.lane.b32.xlu1 %v1701_v20, %s6006_s27  ;;  %v1711_v16 = vld [vmem:[#allocation2 + $0x4b2] sm:$0xff] }
 0x1f9   : > { %v1466_v62 = vpop.permute.xlu0 %1465 }
 0x1fa   : > { %v1456_v1 = vpop.permute.xlu1 %1455  ;;  %1622 = vst.msk [vmem:[#allocation3 + $0x120] sm:$0xff] %vm1585_vm4, %v1466_v62  ;;  %v2430_v62 = vld [vmem:[#allocation2 + $0xd1] sm:$0xff] }
 0x1fb   : > { %1617 = vst.msk [vmem:[#allocation3 + $0xf8] sm:$0xff] %vm1585_vm4, %v1456_v1  ;;  %2255 = vrot.lane.b32.xlu0 %v6789_v10, %s6007_s28 }
 0x1fc   : > { %1491 = vrot.lane.b32.xlu1 %v7049_v25, %s6005_s26 }
 0x1fd   : > { %v1851_v30 = vpop.permute.xlu0 %1850 }
 0x1fe   : > { %v1841_v28 = vpop.permute.xlu1 %1840  ;;  %2007 = vst.msk [vmem:[#allocation3 + $0x120] sm:$0xff] %vm1970_vm5, %v1851_v30 }
 0x1ff   : > { %2002 = vst.msk [vmem:[#allocation3 + $0xf8] sm:$0xff] %vm1970_vm5, %v1841_v28  ;;  %2259 = vrot.lane.b32.xlu0 %v6821_v34, %s6007_s28  ;;  %v1705_v34 = vld [vmem:[#allocation2 + $0x432] sm:$0xff] }
 0x200   : > { %1876 = vrot.lane.b32.xlu1 %v1699_v7, %s6006_s27  ;;  %v2432_v7 = vld [vmem:[#allocation2 + $0xf1] sm:$0xff] }
 0x201   : > { %v1462_v61 = vpop.permute.xlu0 %1461 }
 0x202   : > { %v1452_v29 = vpop.permute.xlu1 %1451  ;;  %1620 = vst.msk [vmem:[#allocation3 + $0x110] sm:$0xff] %vm1585_vm4, %v1462_v61 }
 0x203   : > { %1615 = vst.msk [vmem:[#allocation3 + $0xe8] sm:$0xff] %vm1585_vm4, %v1452_v29  ;;  %2263 = vrot.lane.b32.xlu0 %v6823_v35, %s6007_s28 }
 0x204   : > { %1503 = vrot.lane.b32.xlu1 %v7060_v11, %s6005_s26 }
 0x205   : > { %v1847_v31 = vpop.permute.xlu0 %1846 }
 0x206   : > { %v1837_v10 = vpop.permute.xlu1 %1836  ;;  %2005 = vst.msk [vmem:[#allocation3 + $0x110] sm:$0xff] %vm1970_vm5, %v1847_v31 }
 0x207   : > { %2000 = vst.msk [vmem:[#allocation3 + $0xe8] sm:$0xff] %vm1970_vm5, %v1837_v10  ;;  %2267 = vrot.lane.b32.xlu0 %v6853_v50, %s6007_s28  ;;  %v7086_v50 = vld [vmem:[#allocation2 + $0x491] sm:$0xff] }
 0x208   : > { %2390 = vst.msk [vmem:[#allocation3 + $0x110] sm:$0xff] %vm2355_vm6, %v2232_v6  ;;  %1888 = vrot.lane.b32.xlu1 %v1705_v34, %s6006_s27  ;;  %v2434_v10 = vld [vmem:[#allocation2 + $0x111] sm:$0xff] }
 0x209   : > { %v2240_v24 = vpop.permute.xlu0 %2239 }
 0x20a   : > { %v2226_v41 = vpop.permute.xlu1 %2225 }
 0x20b   : > { %2387 = vst.msk [vmem:[#allocation3 + $0xf8] sm:$0xff] %vm2355_vm6, %v2226_v41  ;;  %2271 = vrot.lane.b32.xlu0 %v6859_v15, %s6007_s28 }
 0x20c   : > { %1499 = vrot.lane.b32.xlu1 %v7075_v38, %s6005_s26 }
 0x20d   : > { %v2236_v39 = vpop.permute.xlu0 %2235 }
 0x20e   : > { %v2222_v35 = vpop.permute.xlu1 %2221  ;;  %2392 = vst.msk [vmem:[#allocation3 + $0x120] sm:$0xff] %vm2355_vm6, %v2236_v39 }
 0x20f   : > { %2385 = vst.msk [vmem:[#allocation3 + $0xe8] sm:$0xff] %vm2355_vm6, %v2222_v35  ;;  %2275 = vrot.lane.b32.xlu0 %v6879_v63, %s6007_s28  ;;  %v1709_v63 = vld [vmem:[#allocation2 + $0x492] sm:$0xff] }
 0x210   : > { %1884 = vrot.lane.b32.xlu1 %v1703_v42, %s6006_s27  ;;  %v2438_v35 = vld [vmem:[#allocation2 + $0x171] sm:$0xff] }
 0x211   : > { %v1470_v47 = vpop.permute.xlu0 %1469 }
 0x212   : > { %v1464_v44 = vpop.permute.xlu1 %1463  ;;  %1624 = vst.msk [vmem:[#allocation3 + $0x130] sm:$0xff] %vm1585_vm4, %v1470_v47 }
 0x213   : > { %1621 = vst.msk [vmem:[#allocation3 + $0x118] sm:$0xff] %vm1585_vm4, %v1464_v44  ;;  %2279 = vrot.lane.b32.xlu0 %v6887_v8, %s6007_s28 }
 0x214   : > { %1511 = vrot.lane.b32.xlu1 %v7086_v50, %s6005_s26 }
 0x215   : > { %v1855_v27 = vpop.permute.xlu0 %1854 }
 0x216   : > { %v1849_v15 = vpop.permute.xlu1 %1848  ;;  %2009 = vst.msk [vmem:[#allocation3 + $0x130] sm:$0xff] %vm1970_vm5, %v1855_v27 }
 0x217   : > { %2006 = vst.msk [vmem:[#allocation3 + $0x118] sm:$0xff] %vm1970_vm5, %v1849_v15  ;;  %2283 = vrot.lane.b32.xlu0 %v6903_v21, %s6007_s28  ;;  %v2420_v21 = vld [vmem:[#allocation2 + $0x11] sm:$0xff] }
 0x218   : > { %2394 = vst.msk [vmem:[#allocation3 + $0x130] sm:$0xff] %vm2355_vm6, %v2240_v24  ;;  %1896 = vrot.lane.b32.xlu1 %v1709_v63, %s6006_s27  ;;  %v2442_v15 = vld [vmem:[#allocation2 + $0x1b1] sm:$0xff] }
 0x219   : > { %v2248_v49 = vpop.permute.xlu0 %2247 }
 0x21a   : > { %v1460_v40 = vpop.permute.xlu1 %1459 }
 0x21b   : > { %1619 = vst.msk [vmem:[#allocation3 + $0x108] sm:$0xff] %vm1585_vm4, %v1460_v40  ;;  %2287 = vrot.lane.b32.xlu0 %v6912_v23, %s6007_s28  ;;  %v2422_v23 = vld [vmem:[#allocation2 + $0x31] sm:$0xff] }
 0x21c   : > { %1507 = vrot.lane.b32.xlu1 %v7101_v52, %s6005_s26 }
 0x21d   : > { %v2244_v13 = vpop.permute.xlu0 %2243 }
 0x21e   : > { %v1845_v8 = vpop.permute.xlu1 %1844  ;;  %2396 = vst.msk [vmem:[#allocation3 + $0x140] sm:$0xff] %vm2355_vm6, %v2244_v13 }
 0x21f   : > { %2004 = vst.msk [vmem:[#allocation3 + $0x108] sm:$0xff] %vm1970_vm5, %v1845_v8  ;;  %2548 = vrot.lane.b32.xlu0 %v2420_v21, %s6008_s29  ;;  %v2446_v8 = vld [vmem:[#allocation2 + $0x211] sm:$0xff] }
 0x220   : > { %1892 = vrot.lane.b32.xlu1 %v1707_v53, %s6006_s27 }
 0x221   : > { %v1482_v4 = vpop.permute.xlu0 %1481 }
 0x222   : > { %v2234_v26 = vpop.permute.xlu1 %2233  ;;  %1630 = vst.msk [vmem:[#allocation3 + $0x160] sm:$0xff] %vm1585_vm4, %v1482_v4  ;;  %v2450_v4 = vld [vmem:[#allocation2 + $0x251] sm:$0xff] }
 0x223   : > { %2391 = vst.msk [vmem:[#allocation3 + $0x118] sm:$0xff] %vm2355_vm6, %v2234_v26  ;;  %2552 = vrot.lane.b32.xlu0 %v2422_v23, %s6008_s29 }
 0x224   : > { %1519 = vrot.lane.b32.xlu1 %v7111_v59, %s6005_s26 }
 0x225   : > { %v1867_v55 = vpop.permute.xlu0 %1866 }
 0x226   : > { %v2230_v43 = vpop.permute.xlu1 %2229  ;;  %2015 = vst.msk [vmem:[#allocation3 + $0x160] sm:$0xff] %vm1970_vm5, %v1867_v55 }
 0x227   : > { %2389 = vst.msk [vmem:[#allocation3 + $0x108] sm:$0xff] %vm2355_vm6, %v2230_v43  ;;  %2556 = vrot.lane.b32.xlu0 %v2424_v56, %s6008_s29  ;;  %v7196_v56 = vld [vmem:[#allocation2 + $0x41] sm:$0xff] }
 0x228   : > { %1904 = vrot.lane.b32.xlu1 %v1713_v17, %s6006_s27 }
 0x229   : > { %v1478_v46 = vpop.permute.xlu0 %1477 }
 0x22a   : > { %v1472_v58 = vpop.permute.xlu1 %1471  ;;  %1628 = vst.msk [vmem:[#allocation3 + $0x150] sm:$0xff] %vm1585_vm4, %v1478_v46 }
 0x22b   : > { %1625 = vst.msk [vmem:[#allocation3 + $0x138] sm:$0xff] %vm1585_vm4, %v1472_v58  ;;  %2560 = vrot.lane.b32.xlu0 %v2426_v3, %s6008_s29  ;;  %v2454_v58 = vld [vmem:[#allocation2 + $0x2b1] sm:$0xff] }
 0x22c   : > { %1515 = vrot.lane.b32.xlu1 %v7124_v18, %s6005_s26  ;;  %s216_s26 = scalar_lea.vmem %s8348_s4, %s5490_s19 }
 0x22d   : > { %v1863_v6 = vpop.permute.xlu0 %1862 }
 0x22e   : > { %v1857_v5 = vpop.permute.xlu1 %1856  ;;  %2013 = vst.msk [vmem:[#allocation3 + $0x150] sm:$0xff] %vm1970_vm5, %v1863_v6 }
 0x22f   : > { %2010 = vst.msk [vmem:[#allocation3 + $0x138] sm:$0xff] %vm1970_vm5, %v1857_v5  ;;  %2564 = vrot.lane.b32.xlu0 %v2428_v19, %s6008_s29 }
 0x230   : > { %2398 = vst.msk [vmem:[#allocation3 + $0x150] sm:$0xff] %vm2355_vm6, %v2248_v49  ;;  %1900 = vrot.lane.b32.xlu1 %v1711_v16, %s6006_s27  ;;  %v7211_v16 = vld [vmem:[#allocation2 + $0x81] sm:$0xff] }
 0x231   : > { %v1486_v1 = vpop.permute.xlu0 %1485 }
 0x232   : > { %v1468_v20 = vpop.permute.xlu1 %1467  ;;  %1632 = vst.msk [vmem:[#allocation3 + $0x170] sm:$0xff] %vm1585_vm4, %v1486_v1 }
 0x233   : > { %1623 = vst.msk [vmem:[#allocation3 + $0x128] sm:$0xff] %vm1585_vm4, %v1468_v20  ;;  %2568 = vrot.lane.b32.xlu0 %v2430_v62, %s6008_s29 }
 0x234   : > { %2249 = vrot.lane.b32.xlu1 %v6751_v33, %s6007_s28  ;;  %v2082_v33 = vld [vmem:[#allocation2 + $0x3a0] sm:$0xff] }
 0x235   : > { %v1871_v30 = vpop.permute.xlu0 %1870 }
 0x236   : > { %v1853_v28 = vpop.permute.xlu1 %1852  ;;  %2017 = vst.msk [vmem:[#allocation3 + $0x170] sm:$0xff] %vm1970_vm5, %v1871_v30 }
 0x237   : > { %2008 = vst.msk [vmem:[#allocation3 + $0x128] sm:$0xff] %vm1970_vm5, %v1853_v28  ;;  %2572 = vrot.lane.b32.xlu0 %v2432_v7, %s6008_s29 }
 0x238   : > { %2253 = vrot.lane.b32.xlu1 %v6791_v12, %s6007_s28  ;;  %v2436_v12 = vld [vmem:[#allocation2 + $0x151] sm:$0xff] }
 0x239   : > { %v1498_v61 = vpop.permute.xlu0 %1497 }
 0x23a   : > { %v2242_v29 = vpop.permute.xlu1 %2241  ;;  %1638 = vst.msk [vmem:[#allocation3 + $0x1a0] sm:$0xff] %vm1585_vm4, %v1498_v61 }
 0x23b   : > { %2395 = vst.msk [vmem:[#allocation3 + $0x138] sm:$0xff] %vm2355_vm6, %v2242_v29  ;;  %2576 = vrot.lane.b32.xlu0 %v2434_v10, %s6008_s29 }
 0x23c   : > { %2257 = vrot.lane.b32.xlu1 %v2082_v33, %s6007_s28 }
 0x23d   : > { %v1883_v34 = vpop.permute.xlu0 %1882 }
 0x23e   : > { %v2238_v31 = vpop.permute.xlu1 %2237  ;;  %2023 = vst.msk [vmem:[#allocation3 + $0x1a0] sm:$0xff] %vm1970_vm5, %v1883_v34 }
 0x23f   : > { %2393 = vst.msk [vmem:[#allocation3 + $0x128] sm:$0xff] %vm2355_vm6, %v2238_v31  ;;  %2580 = vrot.lane.b32.xlu0 %v2436_v12, %s6008_s29 }
 0x240   : > { %2261 = vrot.lane.b32.xlu1 %v6827_v60, %s6007_s28  ;;  %v2440_v60 = vld [vmem:[#allocation2 + $0x191] sm:$0xff] }
 0x241   : > { %v1494_v24 = vpop.permute.xlu0 %1493 }
 0x242   : > { %v1480_v41 = vpop.permute.xlu1 %1479  ;;  %1636 = vst.msk [vmem:[#allocation3 + $0x190] sm:$0xff] %vm1585_vm4, %v1494_v24 }
 0x243   : > { %1629 = vst.msk [vmem:[#allocation3 + $0x158] sm:$0xff] %vm1585_vm4, %v1480_v41  ;;  %2584 = vrot.lane.b32.xlu0 %v2438_v35, %s6008_s29  ;;  %v2443_v35 = vld [vmem:[#allocation2 + $0x1c1] sm:$0xff] }
 0x244   : > { %2265 = vrot.lane.b32.xlu1 %v6825_v36, %s6007_s28  ;;  %v2090_v36 = vld [vmem:[#allocation2 + $0x440] sm:$0xff] }
 0x245   : > { %v1879_v42 = vpop.permute.xlu0 %1878 }
 0x246   : > { %v1865_v39 = vpop.permute.xlu1 %1864  ;;  %2021 = vst.msk [vmem:[#allocation3 + $0x190] sm:$0xff] %vm1970_vm5, %v1879_v42  ;;  %v2445_v42 = vld [vmem:[#allocation2 + $0x201] sm:$0xff] }
 0x247   : > { %2014 = vst.msk [vmem:[#allocation3 + $0x158] sm:$0xff] %vm1970_vm5, %v1865_v39  ;;  %2588 = vrot.lane.b32.xlu0 %v2440_v60, %s6008_s29 }
 0x248   : > { %2269 = vrot.lane.b32.xlu1 %v6863_v51, %s6007_s28  ;;  %v2444_v51 = vld [vmem:[#allocation2 + $0x1f1] sm:$0xff] }
 0x249   : > { %v1502_v47 = vpop.permute.xlu0 %1501 }
 0x24a   : > { %v1476_v44 = vpop.permute.xlu1 %1475  ;;  %1640 = vst.msk [vmem:[#allocation3 + $0x1b0] sm:$0xff] %vm1585_vm4, %v1502_v47 }
 0x24b   : > { %1627 = vst.msk [vmem:[#allocation3 + $0x148] sm:$0xff] %vm1585_vm4, %v1476_v44  ;;  %2592 = vrot.lane.b32.xlu0 %v2442_v15, %s6008_s29 }
 0x24c   : > { %2273 = vrot.lane.b32.xlu1 %v2090_v36, %s6007_s28 }
 0x24d   : > { %v1887_v63 = vpop.permute.xlu0 %1886 }
 0x24e   : > { %v1861_v27 = vpop.permute.xlu1 %1860  ;;  %2025 = vst.msk [vmem:[#allocation3 + $0x1b0] sm:$0xff] %vm1970_vm5, %v1887_v63 }
 0x24f   : > { %2012 = vst.msk [vmem:[#allocation3 + $0x148] sm:$0xff] %vm1970_vm5, %v1861_v27  ;;  %2596 = vrot.lane.b32.xlu0 %v2444_v51, %s6008_s29  ;;  %v2451_v27 = vld [vmem:[#allocation2 + $0x261] sm:$0xff] }
 0x250   : > { %2277 = vrot.lane.b32.xlu1 %v6891_v9, %s6007_s28  ;;  %v2448_v9 = vld [vmem:[#allocation2 + $0x231] sm:$0xff]  ;;  %v2453_v51 = vld [vmem:[#allocation2 + $0x2a1] sm:$0xff] }
 0x251   : > { %v1514_v49 = vpop.permute.xlu0 %1513 }
 0x252   : > { %v2246_v40 = vpop.permute.xlu1 %2245  ;;  %1646 = vst.msk [vmem:[#allocation3 + $0x1e0] sm:$0xff] %vm1585_vm4, %v1514_v49 }
 0x253   : > { %2397 = vst.msk [vmem:[#allocation3 + $0x148] sm:$0xff] %vm2355_vm6, %v2246_v40  ;;  %2600 = vrot.lane.b32.xlu0 %v2446_v8, %s6008_s29  ;;  %v7301_v8 = vld [vmem:[#allocation2 + $0x32] sm:$0xff] }
 0x254   : > { %2281 = vrot.lane.b32.xlu1 %v6895_v14, %s6007_s28  ;;  %v2098_v14 = vld [vmem:[#allocation2 + $0x4e0] sm:$0xff] }
 0x255   : > { %v1899_v53 = vpop.permute.xlu0 %1898 }
 0x256   : > { %v1488_v13 = vpop.permute.xlu1 %1487  ;;  %2031 = vst.msk [vmem:[#allocation3 + $0x1e0] sm:$0xff] %vm1970_vm5, %v1899_v53 }
 0x257   : > { %1633 = vst.msk [vmem:[#allocation3 + $0x178] sm:$0xff] %vm1585_vm4, %v1488_v13  ;;  %2604 = vrot.lane.b32.xlu0 %v2448_v9, %s6008_s29  ;;  %v2457_v9 = vld [vmem:[#allocation2 + $0x2e1] sm:$0xff] }
 0x258   : > { %2285 = vrot.lane.b32.xlu1 %v6928_v32, %s6007_s28  ;;  %v7188_v32 = vld [vmem:[#allocation2 + $0x21] sm:$0xff] }
 0x259   : > { %v1510_v26 = vpop.permute.xlu0 %1509 }
 0x25a   : > { %v1873_v21 = vpop.permute.xlu1 %1872  ;;  %1644 = vst.msk [vmem:[#allocation3 + $0x1d0] sm:$0xff] %vm1585_vm4, %v1510_v26 }
 0x25b   : > { %2018 = vst.msk [vmem:[#allocation3 + $0x178] sm:$0xff] %vm1970_vm5, %v1873_v21  ;;  %2608 = vrot.lane.b32.xlu0 %v2450_v4, %s6008_s29  ;;  %v7308_v21 = vld [vmem:[#allocation2 + $0x52] sm:$0xff]  ;;  %v2459_v4 = vld [vmem:[#allocation2 + $0x301] sm:$0xff] }
 0x25c   : > { %2289 = vrot.lane.b32.xlu1 %v2098_v14, %s6007_s28 }
 0x25d   : > { %v1895_v43 = vpop.permute.xlu0 %1894 }
 0x25e   : > { %v1484_v23 = vpop.permute.xlu1 %1483  ;;  %2029 = vst.msk [vmem:[#allocation3 + $0x1d0] sm:$0xff] %vm1970_vm5, %v1895_v43 }
 0x25f   : > { %1631 = vst.msk [vmem:[#allocation3 + $0x168] sm:$0xff] %vm1585_vm4, %v1484_v23  ;;  %2612 = vrot.lane.b32.xlu0 %v6934_v0, %s6008_s29  ;;  %v7203_v0 = vld [vmem:[#allocation2 + $0x61] sm:$0xff]  ;;  %v7315_v23 = vld [vmem:[#allocation2 + $0x72] sm:$0xff] }
 0x260   : > { %2550 = vrot.lane.b32.xlu1 %v7188_v32, %s6008_s29 }
 0x261   : > { %v1518_v17 = vpop.permute.xlu0 %1517 }
 0x262   : > { %v1869_v55 = vpop.permute.xlu1 %1868  ;;  %1648 = vst.msk [vmem:[#allocation3 + $0x1f0] sm:$0xff] %vm1585_vm4, %v1518_v17  ;;  %v2461_v17 = vld [vmem:[#allocation2 + $0x341] sm:$0xff] }
 0x263   : > { %2016 = vst.msk [vmem:[#allocation3 + $0x168] sm:$0xff] %vm1970_vm5, %v1869_v55  ;;  %2616 = vrot.lane.b32.xlu0 %v2454_v58, %s6008_s29  ;;  %v2813_v58 = vld [vmem:[#allocation2 + $0xb2] sm:$0xff] }
 0x264   : > { %2554 = vrot.lane.b32.xlu1 %v7196_v56, %s6008_s29 }
 0x265   : > { %v1903_v3 = vpop.permute.xlu0 %1902 }
 0x266   : > { %v1496_v46 = vpop.permute.xlu1 %1495  ;;  %2033 = vst.msk [vmem:[#allocation3 + $0x1f0] sm:$0xff] %vm1970_vm5, %v1903_v3 }
 0x267   : > { %1637 = vst.msk [vmem:[#allocation3 + $0x198] sm:$0xff] %vm1585_vm4, %v1496_v46  ;;  %2620 = vrot.lane.b32.xlu0 %v6968_v57, %s6008_s29  ;;  %v7219_v57 = vld [vmem:[#allocation2 + $0xc1] sm:$0xff] }
 0x268   : > { %2558 = vrot.lane.b32.xlu1 %v7203_v0, %s6008_s29 }
 0x269   : > { %v2252_v6 = vpop.permute.xlu0 %2251 }
 0x26a   : > { %v1881_v5 = vpop.permute.xlu1 %1880  ;;  %2400 = vst.msk [vmem:[#allocation3 + $0x160] sm:$0xff] %vm2355_vm6, %v2252_v6  ;;  %v7326_v6 = vld [vmem:[#allocation2 + $0xd2] sm:$0xff] }
 0x26b   : > { %2022 = vst.msk [vmem:[#allocation3 + $0x198] sm:$0xff] %vm1970_vm5, %v1881_v5  ;;  %2624 = vrot.lane.b32.xlu0 %v6955_v45, %s6008_s29  ;;  %v7227_v45 = vld [vmem:[#allocation2 + $0xe1] sm:$0xff] }
 0x26c   : > { %2562 = vrot.lane.b32.xlu1 %v7211_v16, %s6008_s29  ;;  %v2463_v5 = vld [vmem:[#allocation2 + $0x361] sm:$0xff] }
 0x26d   : > { %v2256_v20 = vpop.permute.xlu0 %2255 }
 0x26e   : > { %v1492_v19 = vpop.permute.xlu1 %1491  ;;  %2402 = vst.msk [vmem:[#allocation3 + $0x170] sm:$0xff] %vm2355_vm6, %v2256_v20 }
 0x26f   : > { %1635 = vst.msk [vmem:[#allocation3 + $0x188] sm:$0xff] %vm1585_vm4, %v1492_v19  ;;  %2628 = vrot.lane.b32.xlu0 %v6999_v37, %s6008_s29  ;;  %v7235_v37 = vld [vmem:[#allocation2 + $0x101] sm:$0xff] }
 0x270   : > { %2566 = vrot.lane.b32.xlu1 %v7219_v57, %s6008_s29 }
 0x271   : > { %v2260_v62 = vpop.permute.xlu0 %2259 }
 0x272   : > { %v1877_v1 = vpop.permute.xlu1 %1876  ;;  %2404 = vst.msk [vmem:[#allocation3 + $0x180] sm:$0xff] %vm2355_vm6, %v2260_v62  ;;  %v7333_v62 = vld [vmem:[#allocation2 + $0xf2] sm:$0xff] }
 0x273   : > { %2020 = vst.msk [vmem:[#allocation3 + $0x188] sm:$0xff] %vm1970_vm5, %v1877_v1  ;;  %2632 = vrot.lane.b32.xlu0 %v6986_v22, %s6008_s29  ;;  %v7243_v22 = vld [vmem:[#allocation2 + $0x121] sm:$0xff] }
 0x274   : > { %2570 = vrot.lane.b32.xlu1 %v7227_v45, %s6008_s29  ;;  %v2465_v1 = vld [vmem:[#allocation2 + $0x381] sm:$0xff] }
 0x275   : > { %v2264_v30 = vpop.permute.xlu0 %2263 }
 0x276   : > { %v1504_v28 = vpop.permute.xlu1 %1503  ;;  %2406 = vst.msk [vmem:[#allocation3 + $0x190] sm:$0xff] %vm2355_vm6, %v2264_v30 }
 0x277   : > { %1641 = vst.msk [vmem:[#allocation3 + $0x1b8] sm:$0xff] %vm1585_vm4, %v1504_v28  ;;  %2636 = vrot.lane.b32.xlu0 %v7026_v54, %s6008_s29  ;;  %v7251_v54 = vld [vmem:[#allocation2 + $0x161] sm:$0xff] }
 0x278   : > { %2574 = vrot.lane.b32.xlu1 %v7235_v37, %s6008_s29 }
 0x279   : > { %v2268_v29 = vpop.permute.xlu0 %2267 }
 0x27a   : > { %v1889_v7 = vpop.permute.xlu1 %1888  ;;  %2408 = vst.msk [vmem:[#allocation3 + $0x1a0] sm:$0xff] %vm2355_vm6, %v2268_v29  ;;  %v7340_v29 = vld [vmem:[#allocation2 + $0x112] sm:$0xff] }
 0x27b   : > { %2026 = vst.msk [vmem:[#allocation3 + $0x1b8] sm:$0xff] %vm1970_vm5, %v1889_v7  ;;  %2640 = vrot.lane.b32.xlu0 %v7014_v48, %s6008_s29  ;;  %v7259_v48 = vld [vmem:[#allocation2 + $0x181] sm:$0xff] }
 0x27c   : > { %2578 = vrot.lane.b32.xlu1 %v7243_v22, %s6008_s29  ;;  %v2467_v7 = vld [vmem:[#allocation2 + $0x3a1] sm:$0xff] }
 0x27d   : > { %v2272_v33 = vpop.permute.xlu0 %2271 }
 0x27e   : > { %v1500_v61 = vpop.permute.xlu1 %1499  ;;  %2410 = vst.msk [vmem:[#allocation3 + $0x1b0] sm:$0xff] %vm2355_vm6, %v2272_v33 }
 0x27f   : > { %1639 = vst.msk [vmem:[#allocation3 + $0x1a8] sm:$0xff] %vm1585_vm4, %v1500_v61  ;;  %2644 = vrot.lane.b32.xlu0 %v7049_v25, %s6008_s29  ;;  %v2441_v25 = vld [vmem:[#allocation2 + $0x1a1] sm:$0xff] }
 0x280   : > { %2582 = vrot.lane.b32.xlu1 %v7251_v54, %s6008_s29 }
 0x281   : > { %v2276_v31 = vpop.permute.xlu0 %2275 }
 0x282   : > { %v1885_v10 = vpop.permute.xlu1 %1884  ;;  %2412 = vst.msk [vmem:[#allocation3 + $0x1c0] sm:$0xff] %vm2355_vm6, %v2276_v31  ;;  %v2821_v31 = vld [vmem:[#allocation2 + $0x152] sm:$0xff] }
 0x283   : > { %2024 = vst.msk [vmem:[#allocation3 + $0x1a8] sm:$0xff] %vm1970_vm5, %v1885_v10  ;;  %2648 = vrot.lane.b32.xlu0 %v7036_v2, %s6008_s29  ;;  %v2469_v10 = vld [vmem:[#allocation2 + $0x3e1] sm:$0xff] }
 0x284   : > { %2586 = vrot.lane.b32.xlu1 %v7259_v48, %s6008_s29 }
 0x285   : > { %v2280_v12 = vpop.permute.xlu0 %2279 }
 0x286   : > { %v1512_v34 = vpop.permute.xlu1 %1511  ;;  %2414 = vst.msk [vmem:[#allocation3 + $0x1d0] sm:$0xff] %vm2355_vm6, %v2280_v12 }
 0x287   : > { %1645 = vst.msk [vmem:[#allocation3 + $0x1d8] sm:$0xff] %vm1585_vm4, %v1512_v34  ;;  %2652 = vrot.lane.b32.xlu0 %v7075_v38, %s6008_s29 }
 0x288   : > { %2590 = vrot.lane.b32.xlu1 %v2441_v25, %s6008_s29  ;;  %v2471_v25 = vld [vmem:[#allocation2 + $0x401] sm:$0xff] }
 0x289   : > { %v2284_v24 = vpop.permute.xlu0 %2283 }
 0x28a   : > { %v1897_v41 = vpop.permute.xlu1 %1896  ;;  %2416 = vst.msk [vmem:[#allocation3 + $0x1e0] sm:$0xff] %vm2355_vm6, %v2284_v24 }
 0x28b   : > { %2030 = vst.msk [vmem:[#allocation3 + $0x1d8] sm:$0xff] %vm1970_vm5, %v1897_v41  ;;  %2656 = vrot.lane.b32.xlu0 %v7060_v11, %s6008_s29  ;;  %v2447_v11 = vld [vmem:[#allocation2 + $0x221] sm:$0xff]  ;;  %v7351_v41 = vld [vmem:[#allocation2 + $0x172] sm:$0xff] }
 0x28c   : > { %2594 = vrot.lane.b32.xlu1 %v2443_v35, %s6008_s29 }
 0x28d   : > { %v2288_v39 = vpop.permute.xlu0 %2287 }
 0x28e   : > { %v1508_v2 = vpop.permute.xlu1 %1507  ;;  %2418 = vst.msk [vmem:[#allocation3 + $0x1f0] sm:$0xff] %vm2355_vm6, %v2288_v39  ;;  %v7358_v39 = vld [vmem:[#allocation2 + $0x192] sm:$0xff] }
 0x28f   : > { %1643 = vst.msk [vmem:[#allocation3 + $0x1c8] sm:$0xff] %vm1585_vm4, %v1508_v2  ;;  %2660 = vrot.lane.b32.xlu0 %v7101_v52, %s6008_s29  ;;  %v2449_v52 = vld [vmem:[#allocation2 + $0x241] sm:$0xff] }
 0x290   : > { %2598 = vrot.lane.b32.xlu1 %v2445_v42, %s6008_s29  ;;  %v2473_v2 = vld [vmem:[#allocation2 + $0x421] sm:$0xff] }
 0x291   : > { %v2549_v60 = vpop.permute.xlu0 %2548 }
 0x292   : > { %v1893_v38 = vpop.permute.xlu1 %1892  ;;  %2741 = vst.msk [vmem:[#allocation3] sm:$0xff] %vm2740_vm7, %v2549_v60  ;;  %v2475_v60 = vld [vmem:[#allocation2 + $0x441] sm:$0xff] }
 0x293   : > { %2028 = vst.msk [vmem:[#allocation3 + $0x1c8] sm:$0xff] %vm1970_vm5, %v1893_v38  ;;  %2664 = vrot.lane.b32.xlu0 %v7086_v50, %s6008_s29 }
 0x294   : > { %2602 = vrot.lane.b32.xlu1 %v2447_v11, %s6008_s29  ;;  %v2827_v11 = vld [vmem:[#allocation2 + $0x1b2] sm:$0xff] }
 0x295   : > { %v2553_v47 = vpop.permute.xlu0 %2552 }
 0x296   : > { %v1520_v44 = vpop.permute.xlu1 %1519  ;;  %2743 = vst.msk [vmem:[#allocation3 + $0x10] sm:$0xff] %vm2740_vm7, %v2553_v47 }
 0x297   : > { %1649 = vst.msk [vmem:[#allocation3 + $0x1f8] sm:$0xff] %vm1585_vm4, %v1520_v44  ;;  %2668 = vrot.lane.b32.xlu0 %v7124_v18, %s6008_s29  ;;  %v2805_v18 = vld [vmem:[#allocation2 + $0x12] sm:$0xff] }
 0x298   : > { %2606 = vrot.lane.b32.xlu1 %v2449_v52, %s6008_s29  ;;  %v2477_v52 = vld [vmem:[#allocation2 + $0x481] sm:$0xff] }
 0x299   : > { %v2557_v15 = vpop.permute.xlu0 %2556 }
 0x29a   : > { %v1905_v36 = vpop.permute.xlu1 %1904  ;;  %2745 = vst.msk [vmem:[#allocation3 + $0x20] sm:$0xff] %vm2740_vm7, %v2557_v15 }
 0x29b   : > { %2034 = vst.msk [vmem:[#allocation3 + $0x1f8] sm:$0xff] %vm1970_vm5, %v1905_v36  ;;  %2672 = vrot.lane.b32.xlu0 %v7111_v59, %s6008_s29  ;;  %v2455_v59 = vld [vmem:[#allocation2 + $0x2c1] sm:$0xff]  ;;  %v2829_v36 = vld [vmem:[#allocation2 + $0x1f2] sm:$0xff] }
 0x29c   : > { %2610 = vrot.lane.b32.xlu1 %v2451_v27, %s6008_s29 }
 0x29d   : > { %v2561_v63 = vpop.permute.xlu0 %2560 }
 0x29e   : > { %v1516_v50 = vpop.permute.xlu1 %1515  ;;  %2747 = vst.msk [vmem:[#allocation3 + $0x30] sm:$0xff] %vm2740_vm7, %v2561_v63  ;;  %v2831_v63 = vld [vmem:[#allocation2 + $0x212] sm:$0xff] }
 0x29f   : > { %1647 = vst.msk [vmem:[#allocation3 + $0x1e8] sm:$0xff] %vm1585_vm4, %v1516_v50  ;;  %2933 = vrot.lane.b32.xlu0 %v2805_v18, %s6009_s30  ;;  %v2479_v50 = vld [vmem:[#allocation2 + $0x4a1] sm:$0xff]  ;;  %vm5382_vm4 = vcmask 1045509  }
 0x2a0   : > { %2614 = vrot.lane.b32.xlu1 %v2453_v51, %s6008_s29 }
 0x2a1   : > { %v2565_v49 = vpop.permute.xlu0 %2564 }
 0x2a2   : > { %v1901_v40 = vpop.permute.xlu1 %1900  ;;  %2749 = vst.msk [vmem:[#allocation3 + $0x40] sm:$0xff] %vm2740_vm7, %v2565_v49  ;;  %v2833_v49 = vld [vmem:[#allocation2 + $0x232] sm:$0xff] }
 0x2a3   : > { %2032 = vst.msk [vmem:[#allocation3 + $0x1e8] sm:$0xff] %vm1970_vm5, %v1901_v40  ;;  %2937 = vrot.lane.b32.xlu0 %v7301_v8, %s6009_s30  ;;  %v2481_v40 = vld [vmem:[#allocation2 + $0x4c1] sm:$0xff]  ;;  %vm5384_vm5 = vcmask 1046534  }
 0x2a4   : > { %2618 = vrot.lane.b32.xlu1 %v2455_v59, %s6008_s29 }
 0x2a5   : > { %v2569_v53 = vpop.permute.xlu0 %2568 }
 0x2a6   : > { %v2250_v13 = vpop.permute.xlu1 %2249  ;;  %2751 = vst.msk [vmem:[#allocation3 + $0x50] sm:$0xff] %vm2740_vm7, %v2569_v53  ;;  %v2483_v53 = vld [vmem:[#allocation2 + $0x4e1] sm:$0xff] }
 0x2a7   : > { %2399 = vst.msk [vmem:[#allocation3 + $0x158] sm:$0xff] %vm2355_vm6, %v2250_v13  ;;  %2941 = vrot.lane.b32.xlu0 %v7308_v21, %s6009_s30 }
 0x2a8   : > { %2622 = vrot.lane.b32.xlu1 %v2457_v9, %s6008_s29  ;;  %v2835_v9 = vld [vmem:[#allocation2 + $0x252] sm:$0xff] }
 0x2a9   : > { %v2573_v14 = vpop.permute.xlu0 %2572 }
 0x2aa   : > { %v2254_v26 = vpop.permute.xlu1 %2253  ;;  %2753 = vst.msk [vmem:[#allocation3 + $0x60] sm:$0xff] %vm2740_vm7, %v2573_v14 }
 0x2ab   : > { %2401 = vst.msk [vmem:[#allocation3 + $0x168] sm:$0xff] %vm2355_vm6, %v2254_v26  ;;  %2945 = vrot.lane.b32.xlu0 %v7315_v23, %s6009_s30 }
 0x2ac   : > { %2626 = vrot.lane.b32.xlu1 %v2459_v4, %s6008_s29  ;;  %v7385_v4 = vld [vmem:[#allocation2 + $0x22] sm:$0xff] }
 0x2ad   : > { %v2577_v55 = vpop.permute.xlu0 %2576 }
 0x2ae   : > { %v2258_v43 = vpop.permute.xlu1 %2257  ;;  %2755 = vst.msk [vmem:[#allocation3 + $0x70] sm:$0xff] %vm2740_vm7, %v2577_v55 }
 0x2af   : > { %2403 = vst.msk [vmem:[#allocation3 + $0x178] sm:$0xff] %vm2355_vm6, %v2258_v43  ;;  %2949 = vrot.lane.b32.xlu0 %v2813_v58, %s6009_s30  ;;  %v2837_v43 = vld [vmem:[#allocation2 + $0x292] sm:$0xff]  ;;  %v7392_v58 = vld [vmem:[#allocation2 + $0x42] sm:$0xff] }
 0x2b0   : > { %2630 = vrot.lane.b32.xlu1 %v2461_v17, %s6008_s29 }
 0x2b1   : > { %v2581_v3 = vpop.permute.xlu0 %2580 }
 0x2b2   : > { %v2262_v46 = vpop.permute.xlu1 %2261  ;;  %2757 = vst.msk [vmem:[#allocation3 + $0x80] sm:$0xff] %vm2740_vm7, %v2581_v3 }
 0x2b3   : > { %2405 = vst.msk [vmem:[#allocation3 + $0x188] sm:$0xff] %vm2355_vm6, %v2262_v46  ;;  %2953 = vrot.lane.b32.xlu0 %v7326_v6, %s6009_s30  ;;  %v2839_v46 = vld [vmem:[#allocation2 + $0x2b2] sm:$0xff] }
 0x2b4   : > { %2634 = vrot.lane.b32.xlu1 %v2463_v5, %s6008_s29 }
 0x2b5   : > { %v2585_v20 = vpop.permute.xlu0 %2584 }
 0x2b6   : > { %v2266_v19 = vpop.permute.xlu1 %2265  ;;  %2759 = vst.msk [vmem:[#allocation3 + $0x90] sm:$0xff] %vm2740_vm7, %v2585_v20  ;;  %v2841_v20 = vld [vmem:[#allocation2 + $0x2d2] sm:$0xff] }
 0x2b7   : > { %2407 = vst.msk [vmem:[#allocation3 + $0x198] sm:$0xff] %vm2355_vm6, %v2266_v19  ;;  %2957 = vrot.lane.b32.xlu0 %v7333_v62, %s6009_s30  ;;  %v7399_v19 = vld [vmem:[#allocation2 + $0x62] sm:$0xff] }
 0x2b8   : > { %2638 = vrot.lane.b32.xlu1 %v2465_v1, %s6008_s29 }
 0x2b9   : > { %v2589_v30 = vpop.permute.xlu0 %2588 }
 0x2ba   : > { %v2270_v28 = vpop.permute.xlu1 %2269  ;;  %2761 = vst.msk [vmem:[#allocation3 + $0xa0] sm:$0xff] %vm2740_vm7, %v2589_v30  ;;  %v7406_v30 = vld [vmem:[#allocation2 + $0x82] sm:$0xff] }
 0x2bb   : > { %2409 = vst.msk [vmem:[#allocation3 + $0x1a8] sm:$0xff] %vm2355_vm6, %v2270_v28  ;;  %2961 = vrot.lane.b32.xlu0 %v7340_v29, %s6009_s30 }
 0x2bc   : > { %2642 = vrot.lane.b32.xlu1 %v2467_v7, %s6008_s29  ;;  %v2843_v7 = vld [vmem:[#allocation2 + $0x2f2] sm:$0xff] }
 0x2bd   : > { %v2593_v33 = vpop.permute.xlu0 %2592 }
 0x2be   : > { %v2274_v61 = vpop.permute.xlu1 %2273  ;;  %2763 = vst.msk [vmem:[#allocation3 + $0xb0] sm:$0xff] %vm2740_vm7, %v2593_v33 }
 0x2bf   : > { %2411 = vst.msk [vmem:[#allocation3 + $0x1b8] sm:$0xff] %vm2355_vm6, %v2274_v61  ;;  %2965 = vrot.lane.b32.xlu0 %v2821_v31, %s6009_s30  ;;  %v2845_v31 = vld [vmem:[#allocation2 + $0x332] sm:$0xff] }
 0x2c0   : > { %2646 = vrot.lane.b32.xlu1 %v2469_v10, %s6008_s29  ;;  %v7413_v10 = vld [vmem:[#allocation2 + $0xc2] sm:$0xff] }
 0x2c1   : > { %v2597_v12 = vpop.permute.xlu0 %2596 }
 0x2c2   : > { %v2278_v34 = vpop.permute.xlu1 %2277  ;;  %2765 = vst.msk [vmem:[#allocation3 + $0xc0] sm:$0xff] %vm2740_vm7, %v2597_v12 }
 0x2c3   : > { %2413 = vst.msk [vmem:[#allocation3 + $0x1c8] sm:$0xff] %vm2355_vm6, %v2278_v34  ;;  %2969 = vrot.lane.b32.xlu0 %v7351_v41, %s6009_s30 }
 0x2c4   : > { %2650 = vrot.lane.b32.xlu1 %v2471_v25, %s6008_s29  ;;  %v7420_v25 = vld [vmem:[#allocation2 + $0xe2] sm:$0xff] }
 0x2c5   : > { %v2601_v35 = vpop.permute.xlu0 %2600 }
 0x2c6   : > { %v2282_v24 = vpop.permute.xlu1 %2281  ;;  %2767 = vst.msk [vmem:[#allocation3 + $0xd0] sm:$0xff] %vm2740_vm7, %v2601_v35 }
 0x2c7   : > { %2415 = vst.msk [vmem:[#allocation3 + $0x1d8] sm:$0xff] %vm2355_vm6, %v2282_v24  ;;  %2973 = vrot.lane.b32.xlu0 %v7358_v39, %s6009_s30  ;;  %v2847_v24 = vld [vmem:[#allocation2 + $0x352] sm:$0xff] }
 0x2c8   : > { %2654 = vrot.lane.b32.xlu1 %v2473_v2, %s6008_s29 }
 0x2c9   : > { %v2605_v38 = vpop.permute.xlu0 %2604 }
 0x2ca   : > { %v2286_v42 = vpop.permute.xlu1 %2285  ;;  %2769 = vst.msk [vmem:[#allocation3 + $0xe0] sm:$0xff] %vm2740_vm7, %v2605_v38  ;;  %v2849_v38 = vld [vmem:[#allocation2 + $0x372] sm:$0xff] }
 0x2cb   : > { %2417 = vst.msk [vmem:[#allocation3 + $0x1e8] sm:$0xff] %vm2355_vm6, %v2286_v42  ;;  %2977 = vrot.lane.b32.xlu0 %v2827_v11, %s6009_s30  ;;  %v7427_v42 = vld [vmem:[#allocation2 + $0x102] sm:$0xff] }
 0x2cc   : > { %2658 = vrot.lane.b32.xlu1 %v2475_v60, %s6008_s29 }
 0x2cd   : > { %v2609_v47 = vpop.permute.xlu0 %2608 }
 0x2ce   : > { %v2290_v44 = vpop.permute.xlu1 %2289  ;;  %2771 = vst.msk [vmem:[#allocation3 + $0xf0] sm:$0xff] %vm2740_vm7, %v2609_v47  ;;  %v2851_v47 = vld [vmem:[#allocation2 + $0x392] sm:$0xff] }
 0x2cf   : > { %2419 = vst.msk [vmem:[#allocation3 + $0x1f8] sm:$0xff] %vm2355_vm6, %v2290_v44  ;;  %2981 = vrot.lane.b32.xlu0 %v2829_v36, %s6009_s30  ;;  %v7434_v44 = vld [vmem:[#allocation2 + $0x122] sm:$0xff]  ;;  %vm5386_vm6 = vcmask 1047559  }
 0x2d0   : > { %2662 = vrot.lane.b32.xlu1 %v2477_v52, %s6008_s29 }
 0x2d1   : > { %v2613_v27 = vpop.permute.xlu0 %2612 }
 0x2d2   : > { %v2551_v15 = vpop.permute.xlu1 %2550  ;;  %2773 = vst.msk [vmem:[#allocation3 + $0x100] sm:$0xff] %vm2740_vm7, %v2613_v27  ;;  %v2853_v27 = vld [vmem:[#allocation2 + $0x3d2] sm:$0xff] }
 0x2d3   : > { %2742 = vst.msk [vmem:[#allocation3 + $0x8] sm:$0xff] %vm2740_vm7, %v2551_v15  ;;  %2985 = vrot.lane.b32.xlu0 %v2831_v63, %s6009_s30  ;;  %v7441_v15 = vld [vmem:[#allocation2 + $0x162] sm:$0xff] }
 0x2d4   : > { %2666 = vrot.lane.b32.xlu1 %v2479_v50, %s6008_s29 }
 0x2d5   : > { %v2617_v18 = vpop.permute.xlu0 %2616 }
 0x2d6   : > { %v2555_v51 = vpop.permute.xlu1 %2554  ;;  %2775 = vst.msk [vmem:[#allocation3 + $0x110] sm:$0xff] %vm2740_vm7, %v2617_v18  ;;  %v3191_v18 = vld [vmem:[#allocation2 + $0x20] sm:$0xff] }
 0x2d7   : > { %2744 = vst.msk [vmem:[#allocation3 + $0x18] sm:$0xff] %vm2740_vm7, %v2555_v51  ;;  %2989 = vrot.lane.b32.xlu0 %v2833_v49, %s6009_s30  ;;  %v7448_v51 = vld [vmem:[#allocation2 + $0x182] sm:$0xff] }
 0x2d8   : > { %2670 = vrot.lane.b32.xlu1 %v2481_v40, %s6008_s29 }
 0x2d9   : > { %v2621_v13 = vpop.permute.xlu0 %2620 }
 0x2da   : > { %v2559_v59 = vpop.permute.xlu1 %2558  ;;  %2777 = vst.msk [vmem:[#allocation3 + $0x120] sm:$0xff] %vm2740_vm7, %v2621_v13  ;;  %v3193_v13 = vld [vmem:[#allocation2 + $0x40] sm:$0xff] }
 0x2db   : > { %2746 = vst.msk [vmem:[#allocation3 + $0x28] sm:$0xff] %vm2740_vm7, %v2559_v59  ;;  %2993 = vrot.lane.b32.xlu0 %v2835_v9, %s6009_s30  ;;  %v7455_v59 = vld [vmem:[#allocation2 + $0x1a2] sm:$0xff] }
 0x2dc   : > { %2674 = vrot.lane.b32.xlu1 %v2483_v53, %s6008_s29 }
 0x2dd   : > { %v2625_v14 = vpop.permute.xlu0 %2624 }
 0x2de   : > { %v2563_v26 = vpop.permute.xlu1 %2562  ;;  %2779 = vst.msk [vmem:[#allocation3 + $0x130] sm:$0xff] %vm2740_vm7, %v2625_v14 }
 0x2df   : > { %2748 = vst.msk [vmem:[#allocation3 + $0x38] sm:$0xff] %vm2740_vm7, %v2563_v26  ;;  %2997 = vrot.lane.b32.xlu0 %v2837_v43, %s6009_s30  ;;  %v7462_v26 = vld [vmem:[#allocation2 + $0x1c2] sm:$0xff] }
 0x2e0   : > { %2935 = vrot.lane.b32.xlu1 %v7385_v4, %s6009_s30 }
 0x2e1   : > { %v2629_v17 = vpop.permute.xlu0 %2628 }
 0x2e2   : > { %v2567_v55 = vpop.permute.xlu1 %2566  ;;  %2781 = vst.msk [vmem:[#allocation3 + $0x140] sm:$0xff] %vm2740_vm7, %v2629_v17 }
 0x2e3   : > { %2750 = vst.msk [vmem:[#allocation3 + $0x48] sm:$0xff] %vm2740_vm7, %v2567_v55  ;;  %3001 = vrot.lane.b32.xlu0 %v2839_v46, %s6009_s30  ;;  %v7470_v55 = vld [vmem:[#allocation2 + $0x202] sm:$0xff] }
 0x2e4   : > { %2939 = vrot.lane.b32.xlu1 %v7392_v58, %s6009_s30 }
 0x2e5   : > { %v2633_v5 = vpop.permute.xlu0 %2632 }
 0x2e6   : > { %v2571_v3 = vpop.permute.xlu1 %2570  ;;  %2783 = vst.msk [vmem:[#allocation3 + $0x150] sm:$0xff] %vm2740_vm7, %v2633_v5 }
 0x2e7   : > { %2752 = vst.msk [vmem:[#allocation3 + $0x58] sm:$0xff] %vm2740_vm7, %v2571_v3  ;;  %3005 = vrot.lane.b32.xlu0 %v2841_v20, %s6009_s30 }
 0x2e8   : > { %2943 = vrot.lane.b32.xlu1 %v7399_v19, %s6009_s30 }
 0x2e9   : > { %v2637_v28 = vpop.permute.xlu0 %2636 }
 0x2ea   : > { %v2575_v1 = vpop.permute.xlu1 %2574  ;;  %2785 = vst.msk [vmem:[#allocation3 + $0x160] sm:$0xff] %vm2740_vm7, %v2637_v28  ;;  %v3195_v28 = vld [vmem:[#allocation2 + $0x60] sm:$0xff] }
 0x2eb   : > { %2754 = vst.msk [vmem:[#allocation3 + $0x68] sm:$0xff] %vm2740_vm7, %v2575_v1  ;;  %3009 = vrot.lane.b32.xlu0 %v2843_v7, %s6009_s30 }
 0x2ec   : > { %2947 = vrot.lane.b32.xlu1 %v7406_v30, %s6009_s30 }
 0x2ed   : > { %v2641_v33 = vpop.permute.xlu0 %2640 }
 0x2ee   : > { %v2579_v61 = vpop.permute.xlu1 %2578  ;;  %2787 = vst.msk [vmem:[#allocation3 + $0x170] sm:$0xff] %vm2740_vm7, %v2641_v33  ;;  %v3197_v33 = vld [vmem:[#allocation2 + $0x80] sm:$0xff] }
 0x2ef   : > { %2756 = vst.msk [vmem:[#allocation3 + $0x78] sm:$0xff] %vm2740_vm7, %v2579_v61  ;;  %3013 = vrot.lane.b32.xlu0 %v2845_v31, %s6009_s30 }
 0x2f0   : > { %2951 = vrot.lane.b32.xlu1 %v7413_v10, %s6009_s30 }
 0x2f1   : > { %v2645_v12 = vpop.permute.xlu0 %2644 }
 0x2f2   : > { %v2583_v34 = vpop.permute.xlu1 %2582  ;;  %2789 = vst.msk [vmem:[#allocation3 + $0x180] sm:$0xff] %vm2740_vm7, %v2645_v12  ;;  %v7508_v12 = vld [vmem:[#allocation2 + $0x2c2] sm:$0xff] }
 0x2f3   : > { %2758 = vst.msk [vmem:[#allocation3 + $0x88] sm:$0xff] %vm2740_vm7, %v2583_v34  ;;  %3017 = vrot.lane.b32.xlu0 %v2847_v24, %s6009_s30 }
 0x2f4   : > { %2955 = vrot.lane.b32.xlu1 %v7420_v25, %s6009_s30 }
 0x2f5   : > { %v2649_v2 = vpop.permute.xlu0 %2648 }
 0x2f6   : > { %v2587_v35 = vpop.permute.xlu1 %2586  ;;  %2791 = vst.msk [vmem:[#allocation3 + $0x190] sm:$0xff] %vm2740_vm7, %v2649_v2  ;;  %v7516_v2 = vld [vmem:[#allocation2 + $0x2e2] sm:$0xff] }
 0x2f7   : > { %2760 = vst.msk [vmem:[#allocation3 + $0x98] sm:$0xff] %vm2740_vm7, %v2587_v35  ;;  %3021 = vrot.lane.b32.xlu0 %v2849_v38, %s6009_s30 }
 0x2f8   : > { %2959 = vrot.lane.b32.xlu1 %v7427_v42, %s6009_s30 }
 0x2f9   : > { %v2653_v11 = vpop.permute.xlu0 %2652 }
 0x2fa   : > { %v2591_v60 = vpop.permute.xlu1 %2590  ;;  %2793 = vst.msk [vmem:[#allocation3 + $0x1a0] sm:$0xff] %vm2740_vm7, %v2653_v11 }
 0x2fb   : > { %2762 = vst.msk [vmem:[#allocation3 + $0xa8] sm:$0xff] %vm2740_vm7, %v2591_v60  ;;  %3025 = vrot.lane.b32.xlu0 %v2851_v47, %s6009_s30 }
 0x2fc   : > { %2963 = vrot.lane.b32.xlu1 %v7434_v44, %s6009_s30 }
 0x2fd   : > { %v2657_v36 = vpop.permute.xlu0 %2656 }
 0x2fe   : > { %v2595_v52 = vpop.permute.xlu1 %2594  ;;  %2795 = vst.msk [vmem:[#allocation3 + $0x1b0] sm:$0xff] %vm2740_vm7, %v2657_v36 }
 0x2ff   : > { %2764 = vst.msk [vmem:[#allocation3 + $0xb8] sm:$0xff] %vm2740_vm7, %v2595_v52  ;;  %3029 = vrot.lane.b32.xlu0 %v2853_v27, %s6009_s30  ;;  %v3199_v27 = vld [vmem:[#allocation2 + $0xc0] sm:$0xff] }
 0x300   : > { %2967 = vrot.lane.b32.xlu1 %v7441_v15, %s6009_s30 }
 0x301   : > { %v2661_v63 = vpop.permute.xlu0 %2660 }
 0x302   : > { %v2599_v50 = vpop.permute.xlu1 %2598  ;;  %2797 = vst.msk [vmem:[#allocation3 + $0x1c0] sm:$0xff] %vm2740_vm7, %v2661_v63 }
 0x303   : > { %2766 = vst.msk [vmem:[#allocation3 + $0xc8] sm:$0xff] %vm2740_vm7, %v2599_v50  ;;  %3319 = vrot.lane.b32.xlu0 %v3191_v18, %s6010_s5  ;;  %v3201_v18 = vld [vmem:[#allocation2 + $0xe0] sm:$0xff] }
 0x304   : > { %2971 = vrot.lane.b32.xlu1 %v7448_v51, %s6009_s30 }
 0x305   : > { %v2665_v49 = vpop.permute.xlu0 %2664 }
 0x306   : > { %v2603_v40 = vpop.permute.xlu1 %2602  ;;  %2799 = vst.msk [vmem:[#allocation3 + $0x1d0] sm:$0xff] %vm2740_vm7, %v2665_v49 }
 0x307   : > { %2768 = vst.msk [vmem:[#allocation3 + $0xd8] sm:$0xff] %vm2740_vm7, %v2603_v40  ;;  %3323 = vrot.lane.b32.xlu0 %v3193_v13, %s6010_s5  ;;  %v2852_v13 = vld [vmem:[#allocation2 + $0x3a2] sm:$0xff] }
 0x308   : > { %2975 = vrot.lane.b32.xlu1 %v7455_v59, %s6009_s30 }
 0x309   : > { %v2669_v9 = vpop.permute.xlu0 %2668 }
 0x30a   : > { %v2607_v53 = vpop.permute.xlu1 %2606  ;;  %2801 = vst.msk [vmem:[#allocation3 + $0x1e0] sm:$0xff] %vm2740_vm7, %v2669_v9 }
 0x30b   : > { %2770 = vst.msk [vmem:[#allocation3 + $0xe8] sm:$0xff] %vm2740_vm7, %v2607_v53  ;;  %3704 = vrot.lane.b32.xlu0 %v7188_v32, %s6011_s6  ;;  %v7478_v32 = vld [vmem:[#allocation2 + $0x222] sm:$0xff] }
 0x30c   : > { %2979 = vrot.lane.b32.xlu1 %v7462_v26, %s6009_s30 }
 0x30d   : > { %v2673_v43 = vpop.permute.xlu0 %2672 }
 0x30e   : > { %v2611_v14 = vpop.permute.xlu1 %2610  ;;  %2803 = vst.msk [vmem:[#allocation3 + $0x1f0] sm:$0xff] %vm2740_vm7, %v2673_v43  ;;  %v5991_v43 = vld [vmem:[%s8346_s2 + $0x20] ss:$0 sps:$4 sm:$0xff]  }
 0x30f   : > { %2772 = vst.msk [vmem:[#allocation3 + $0xf8] sm:$0xff] %vm2740_vm7, %v2611_v14  ;;  %3708 = vrot.lane.b32.xlu0 %v7196_v56, %s6011_s6  ;;  %v7486_v56 = vld [vmem:[#allocation2 + $0x242] sm:$0xff]  ;;  %5939 = vmatprep.subr.msk.bf16.mxu1 %vm4575_vm9, %v5991_v43 }
 0x310   : > { %2983 = vrot.lane.b32.xlu1 %v7470_v55, %s6009_s30  ;;  %v2854_v14 = vld [vmem:[#allocation2 + $0x3e2] sm:$0xff] }
 0x311   : > { %v2934_v46 = vpop.permute.xlu0 %2933 }
 0x312   : > { %v2615_v17 = vpop.permute.xlu1 %2614  ;;  %3126 = vst.msk [vmem:[#allocation3] sm:$0xff] %vm3125_vm8, %v2934_v46 }
 0x313   : > { %2774 = vst.msk [vmem:[#allocation3 + $0x108] sm:$0xff] %vm2740_vm7, %v2615_v17  ;;  %4089 = vrot.lane.b32.xlu0 %v7385_v4, %s6012_s7  ;;  %v7494_v4 = vld [vmem:[#allocation2 + $0x262] sm:$0xff] }
 0x314   : > { %2987 = vrot.lane.b32.xlu1 %v7478_v32, %s6009_s30 }
 0x315   : > { %v2938_v5 = vpop.permute.xlu0 %2937 }
 0x316   : > { %v2619_v3 = vpop.permute.xlu1 %2618  ;;  %3128 = vst.msk [vmem:[#allocation3 + $0x10] sm:$0xff] %vm3125_vm8, %v2938_v5 }
 0x317   : > { %2776 = vst.msk [vmem:[#allocation3 + $0x118] sm:$0xff] %vm2740_vm7, %v2619_v3  ;;  %4093 = vrot.lane.b32.xlu0 %v7392_v58, %s6012_s7  ;;  %v7501_v58 = vld [vmem:[#allocation2 + $0x2a2] sm:$0xff]  ;;  %v3192_v3 = vld [vmem:[#allocation2 + $0x30] sm:$0xff] }
 0x318   : > { %2991 = vrot.lane.b32.xlu1 %v7486_v56, %s6009_s30 }
 0x319   : > { %v2942_v1 = vpop.permute.xlu0 %2941 }
 0x31a   : > { %v2623_v20 = vpop.permute.xlu1 %2622  ;;  %3130 = vst.msk [vmem:[#allocation3 + $0x20] sm:$0xff] %vm3125_vm8, %v2942_v1  ;;  %v3194_v1 = vld [vmem:[#allocation2 + $0x50] sm:$0xff] }
 0x31b   : > { %2778 = vst.msk [vmem:[#allocation3 + $0x128] sm:$0xff] %vm2740_vm7, %v2623_v20  ;;  %3327 = vrot.lane.b32.xlu0 %v3195_v28, %s6010_s5 }
 0x31c   : > { %2995 = vrot.lane.b32.xlu1 %v7494_v4, %s6009_s30 }
 0x31d   : > { %v2946_v61 = vpop.permute.xlu0 %2945 }
 0x31e   : > { %v2627_v7 = vpop.permute.xlu1 %2626  ;;  %3132 = vst.msk [vmem:[#allocation3 + $0x30] sm:$0xff] %vm3125_vm8, %v2946_v61  ;;  %v3577_v61 = vld [vmem:[#allocation2 + $0x31] sm:$0xff] }
 0x31f   : > { %2780 = vst.msk [vmem:[#allocation3 + $0x138] sm:$0xff] %vm2740_vm7, %v2627_v7  ;;  %3331 = vrot.lane.b32.xlu0 %v3197_v33, %s6010_s5  ;;  %v3203_v33 = vld [vmem:[#allocation2 + $0x100] sm:$0xff] }
 0x320   : > { %2999 = vrot.lane.b32.xlu1 %v7501_v58, %s6009_s30 }
 0x321   : > { %v2950_v34 = vpop.permute.xlu0 %2949 }
 0x322   : > { %v2631_v31 = vpop.permute.xlu1 %2630  ;;  %3134 = vst.msk [vmem:[#allocation3 + $0x40] sm:$0xff] %vm3125_vm8, %v2950_v34 }
 0x323   : > { %2782 = vst.msk [vmem:[#allocation3 + $0x148] sm:$0xff] %vm2740_vm7, %v2631_v31  ;;  %3712 = vrot.lane.b32.xlu0 %v7203_v0, %s6011_s6  ;;  %v7524_v0 = vld [vmem:[#allocation2 + $0x302] sm:$0xff] }
 0x324   : > { %3003 = vrot.lane.b32.xlu1 %v7508_v12, %s6009_s30 }
 0x325   : > { %v2954_v35 = vpop.permute.xlu0 %2953 }
 0x326   : > { %v2635_v24 = vpop.permute.xlu1 %2634  ;;  %3136 = vst.msk [vmem:[#allocation3 + $0x50] sm:$0xff] %vm3125_vm8, %v2954_v35  ;;  %v3205_v35 = vld [vmem:[#allocation2 + $0x120] sm:$0xff] }
 0x327   : > { %2784 = vst.msk [vmem:[#allocation3 + $0x158] sm:$0xff] %vm2740_vm7, %v2635_v24  ;;  %3716 = vrot.lane.b32.xlu0 %v7211_v16, %s6011_s6  ;;  %v7532_v16 = vld [vmem:[#allocation2 + $0x342] sm:$0xff]  ;;  %v3579_v24 = vld [vmem:[#allocation2 + $0x51] sm:$0xff] }
 0x328   : > { %3007 = vrot.lane.b32.xlu1 %v7516_v2, %s6009_s30 }
 0x329   : > { %v2958_v60 = vpop.permute.xlu0 %2957 }
 0x32a   : > { %v2639_v38 = vpop.permute.xlu1 %2638  ;;  %3138 = vst.msk [vmem:[#allocation3 + $0x60] sm:$0xff] %vm3125_vm8, %v2958_v60 }
 0x32b   : > { %2786 = vst.msk [vmem:[#allocation3 + $0x168] sm:$0xff] %vm2740_vm7, %v2639_v38  ;;  %4097 = vrot.lane.b32.xlu0 %v7399_v19, %s6012_s7  ;;  %v7540_v19 = vld [vmem:[#allocation2 + $0x362] sm:$0xff] }
 0x32c   : > { %3011 = vrot.lane.b32.xlu1 %v7524_v0, %s6009_s30  ;;  %v5995_v38 = vld [vmem:[%s8346_s2] sm:$0xff]  }
 0x32d   : > { %v2962_v47 = vpop.permute.xlu0 %2961 }
 0x32e   : > { %v2643_v11 = vpop.permute.xlu1 %2642  ;;  %3140 = vst.msk [vmem:[#allocation3 + $0x70] sm:$0xff] %vm3125_vm8, %v2962_v47 }
 0x32f   : > { %2788 = vst.msk [vmem:[#allocation3 + $0x178] sm:$0xff] %vm2740_vm7, %v2643_v11  ;;  %4101 = vrot.lane.b32.xlu0 %v7406_v30, %s6012_s7  ;;  %v2850_v30 = vld [vmem:[#allocation2 + $0x382] sm:$0xff] }
 0x330   : > { %3015 = vrot.lane.b32.xlu1 %v7532_v16, %s6009_s30 }
 0x331   : > { %v2966_v36 = vpop.permute.xlu0 %2965 }
 0x332   : > { %v2647_v52 = vpop.permute.xlu1 %2646  ;;  %3142 = vst.msk [vmem:[#allocation3 + $0x80] sm:$0xff] %vm3125_vm8, %v2966_v36 }
 0x333   : > { %2790 = vst.msk [vmem:[#allocation3 + $0x188] sm:$0xff] %vm2740_vm7, %v2647_v52  ;;  %3335 = vrot.lane.b32.xlu0 %v3199_v27, %s6010_s5 }
 0x334   : > { %3019 = vrot.lane.b32.xlu1 %v7540_v19, %s6009_s30 }
 0x335   : > { %v2970_v63 = vpop.permute.xlu0 %2969 }
 0x336   : > { %v2651_v50 = vpop.permute.xlu1 %2650  ;;  %3144 = vst.msk [vmem:[#allocation3 + $0x90] sm:$0xff] %vm3125_vm8, %v2970_v63 }
 0x337   : > { %2792 = vst.msk [vmem:[#allocation3 + $0x198] sm:$0xff] %vm2740_vm7, %v2651_v50  ;;  %3339 = vrot.lane.b32.xlu0 %v3201_v18, %s6010_s5  ;;  %v3583_v18 = vld [vmem:[#allocation2 + $0x91] sm:$0xff] }
 0x338   : > { %3023 = vrot.lane.b32.xlu1 %v2850_v30, %s6009_s30  ;;  %v3581_v30 = vld [vmem:[#allocation2 + $0x71] sm:$0xff] }
 0x339   : > { %v2974_v49 = vpop.permute.xlu0 %2973 }
 0x33a   : > { %v2655_v40 = vpop.permute.xlu1 %2654  ;;  %3146 = vst.msk [vmem:[#allocation3 + $0xa0] sm:$0xff] %vm3125_vm8, %v2974_v49 }
 0x33b   : > { %2794 = vst.msk [vmem:[#allocation3 + $0x1a8] sm:$0xff] %vm2740_vm7, %v2655_v40  ;;  %3720 = vrot.lane.b32.xlu0 %v7219_v57, %s6011_s6  ;;  %v4577_v57 = vsel %vm4575_vm9, %v5991_v43, 0 }
 0x33c   : > { %3027 = vrot.lane.b32.xlu1 %v2852_v13, %s6009_s30  ;;  %5866 = vmatpush3.bf16.msra.mxu1 %v4577_v57 }
 0x33d   : > { %v2978_v9 = vpop.permute.xlu0 %2977 }
 0x33e   : > { %v2659_v53 = vpop.permute.xlu1 %2658  ;;  %3148 = vst.msk [vmem:[#allocation3 + $0xb0] sm:$0xff] %vm3125_vm8, %v2978_v9  ;;  %v3968_v9 = vld [vmem:[#allocation2 + $0x92] sm:$0xff] }
 0x33f   : > { %2796 = vst.msk [vmem:[#allocation3 + $0x1b8] sm:$0xff] %vm2740_vm7, %v2659_v53  ;;  %3724 = vrot.lane.b32.xlu0 %v7227_v45, %s6011_s6  ;;  %v5992_v45 = vld [vmem:[%s8346_s2 + $0x18] sm:$0xff]  }
 0x340   : > { %3031 = vrot.lane.b32.xlu1 %v2854_v14, %s6009_s30  ;;  %5867 = vmatprep.subr.bf16.mxu1 %v5992_v45 }
 0x341   : > { %v2982_v46 = vpop.permute.xlu0 %2981  ;;  %5868 = vmatpush3.bf16.msra.mxu1 %v5992_v45 }
 0x342   : > { %v2663_v17 = vpop.permute.xlu1 %2662  ;;  %3150 = vst.msk [vmem:[#allocation3 + $0xc0] sm:$0xff] %vm3125_vm8, %v2982_v46 }
 0x343   : > { %2798 = vst.msk [vmem:[#allocation3 + $0x1c8] sm:$0xff] %vm2740_vm7, %v2663_v17  ;;  %4105 = vrot.lane.b32.xlu0 %v7413_v10, %s6012_s7  ;;  %v5993_v10 = vld [vmem:[%s8346_s2 + $0x10] sm:$0xff]  }
 0x344   : > { %3321 = vrot.lane.b32.xlu1 %v3192_v3, %s6010_s5  ;;  %5869 = vmatprep.subr.bf16.mxu1 %v5993_v10 }
 0x345   : > { %v2986_v20 = vpop.permute.xlu0 %2985  ;;  %5870 = vmatpush3.bf16.msra.mxu1 %v5993_v10  ;;  %v3213_v10 = vld [vmem:[#allocation2 + $0x1c0] sm:$0xff] }
 0x346   : > { %v2667_v5 = vpop.permute.xlu1 %2666  ;;  %3152 = vst.msk [vmem:[#allocation3 + $0xd0] sm:$0xff] %vm3125_vm8, %v2986_v20 }
 0x347   : > { %2800 = vst.msk [vmem:[#allocation3 + $0x1d8] sm:$0xff] %vm2740_vm7, %v2667_v5  ;;  %4109 = vrot.lane.b32.xlu0 %v7420_v25, %s6012_s7  ;;  %v5994_v25 = vld [vmem:[%s8346_s2 + $0x8] sm:$0xff]   ;;  %v3211_v5 = vld [vmem:[#allocation2 + $0x1a0] sm:$0xff] }
 0x348   : > { %3325 = vrot.lane.b32.xlu1 %v3194_v1, %s6010_s5  ;;  %5871 = vmatprep.subr.bf16.mxu1 %v5994_v25 }
 0x349   : > { %v2990_v7 = vpop.permute.xlu0 %2989  ;;  %5872 = vmatpush3.bf16.msra.mxu1 %v5994_v25 }
 0x34a   : > { %v2671_v28 = vpop.permute.xlu1 %2670  ;;  %3154 = vst.msk [vmem:[#allocation3 + $0xe0] sm:$0xff] %vm3125_vm8, %v2990_v7  ;;  %5873 = vmatprep.subr.bf16.mxu1 %v5995_v38 }
 0x34b   : > { %2802 = vst.msk [vmem:[#allocation3 + $0x1e8] sm:$0xff] %vm2740_vm7, %v2671_v28  ;;  %3343 = vrot.lane.b32.xlu0 %v3203_v33, %s6010_s5 }
 0x34c   : > { %3706 = vrot.lane.b32.xlu1 %v3577_v61, %s6011_s6  ;;  %v3596_v61 = vld [vmem:[#allocation2 + $0x1a1] sm:$0xff] }
 0x34d   : > { %v2994_v34 = vpop.permute.xlu0 %2993  ;;  %5874 = vmatpush3.bf16.msra.mxu1 %v5995_v38 }
 0x34e   : > { %v2675_v31 = vpop.permute.xlu1 %2674  ;;  %3156 = vst.msk [vmem:[#allocation3 + $0xf0] sm:$0xff] %vm3125_vm8, %v2994_v34 }
 0x34f   : > { %2804 = vst.msk [vmem:[#allocation3 + $0x1f8] sm:$0xff] %vm2740_vm7, %v2675_v31  ;;  %3347 = vrot.lane.b32.xlu0 %v3205_v35, %s6010_s5  ;;  %v3598_v31 = vld [vmem:[#allocation2 + $0x1c1] sm:$0xff]  ;;  %v3206_v35 = vld [vmem:[#allocation2 + $0x130] sm:$0xff] }
 0x350   : > { %3710 = vrot.lane.b32.xlu1 %v3579_v24, %s6011_s6 }
 0x351   : > { %v2998_v11 = vpop.permute.xlu0 %2997 }
 0x352   : > { %v2936_v60 = vpop.permute.xlu1 %2935  ;;  %3158 = vst.msk [vmem:[#allocation3 + $0x100] sm:$0xff] %vm3125_vm8, %v2998_v11 }
 0x353   : > { %3127 = vst.msk [vmem:[#allocation3 + $0x8] sm:$0xff] %vm3125_vm8, %v2936_v60  ;;  %3728 = vrot.lane.b32.xlu0 %v7235_v37, %s6011_s6  ;;  %v3198_v37 = vld [vmem:[#allocation2 + $0x90] sm:$0xff] }
 0x354   : > { %4091 = vrot.lane.b32.xlu1 %v7301_v8, %s6012_s7  ;;  %v3196_v8 = vld [vmem:[#allocation2 + $0x70] sm:$0xff] }
 0x355   : > { %v3002_v52 = vpop.permute.xlu0 %3001 }
 0x356   : > { %v2940_v47 = vpop.permute.xlu1 %2939  ;;  %3160 = vst.msk [vmem:[#allocation3 + $0x110] sm:$0xff] %vm3125_vm8, %v3002_v52  ;;  %v3591_v52 = vld [vmem:[#allocation2 + $0x131] sm:$0xff] }
 0x357   : > { %3129 = vst.msk [vmem:[#allocation3 + $0x18] sm:$0xff] %vm3125_vm8, %v2940_v47  ;;  %3732 = vrot.lane.b32.xlu0 %v7243_v22, %s6011_s6  ;;  %v3589_v47 = vld [vmem:[#allocation2 + $0x111] sm:$0xff] }
 0x358   : > { %4095 = vrot.lane.b32.xlu1 %v7308_v21, %s6012_s7 }
 0x359   : > { %v3006_v27 = vpop.permute.xlu0 %3005 }
 0x35a   : > { %v2944_v36 = vpop.permute.xlu1 %2943  ;;  %3162 = vst.msk [vmem:[#allocation3 + $0x120] sm:$0xff] %vm3125_vm8, %v3006_v27 }
 0x35b   : > { %3131 = vst.msk [vmem:[#allocation3 + $0x28] sm:$0xff] %vm3125_vm8, %v2944_v36  ;;  %4113 = vrot.lane.b32.xlu0 %v7427_v42, %s6012_s7  ;;  %v3207_v42 = vld [vmem:[#allocation2 + $0x160] sm:$0xff] }
 0x35c   : > { %3329 = vrot.lane.b32.xlu1 %v3196_v8, %s6010_s5 }
 0x35d   : > { %v3010_v63 = vpop.permute.xlu0 %3009 }
 0x35e   : > { %v2948_v50 = vpop.permute.xlu1 %2947  ;;  %3164 = vst.msk [vmem:[#allocation3 + $0x130] sm:$0xff] %vm3125_vm8, %v3010_v63  ;;  %v3976_v63 = vld [vmem:[#allocation2 + $0x132] sm:$0xff] }
 0x35f   : > { %3133 = vst.msk [vmem:[#allocation3 + $0x38] sm:$0xff] %vm3125_vm8, %v2948_v50  ;;  %4117 = vrot.lane.b32.xlu0 %v7434_v44, %s6012_s7  ;;  %v3209_v44 = vld [vmem:[#allocation2 + $0x180] sm:$0xff] }
 0x360   : > { %3333 = vrot.lane.b32.xlu1 %v3198_v37, %s6010_s5  ;;  %v3600_v50 = vld [vmem:[#allocation2 + $0x201] sm:$0xff] }
 0x361   : > { %v3014_v21 = vpop.permute.xlu0 %3013 }
 0x362   : > { %v2952_v22 = vpop.permute.xlu1 %2951  ;;  %3166 = vst.msk [vmem:[#allocation3 + $0x140] sm:$0xff] %vm3125_vm8, %v3014_v21 }
 0x363   : > { %3135 = vst.msk [vmem:[#allocation3 + $0x48] sm:$0xff] %vm3125_vm8, %v2952_v22  ;;  %3351 = vrot.lane.b32.xlu0 %v3207_v42, %s6010_s5 }
 0x364   : > { %3714 = vrot.lane.b32.xlu1 %v3581_v30, %s6011_s6  ;;  %v3602_v30 = vld [vmem:[#allocation2 + $0x221] sm:$0xff] }
 0x365   : > { %v3018_v49 = vpop.permute.xlu0 %3017 }
 0x366   : > { %v2956_v40 = vpop.permute.xlu1 %2955  ;;  %3168 = vst.msk [vmem:[#allocation3 + $0x150] sm:$0xff] %vm3125_vm8, %v3018_v49 }
 0x367   : > { %3137 = vst.msk [vmem:[#allocation3 + $0x58] sm:$0xff] %vm3125_vm8, %v2956_v40  ;;  %3355 = vrot.lane.b32.xlu0 %v3209_v44, %s6010_s5  ;;  %v3210_v44 = vld [vmem:[#allocation2 + $0x190] sm:$0xff] }
 0x368   : > { %3718 = vrot.lane.b32.xlu1 %v3583_v18, %s6011_s6 }
 0x369   : > { %v3022_v53 = vpop.permute.xlu0 %3021 }
 0x36a   : > { %v2960_v13 = vpop.permute.xlu1 %2959  ;;  %3170 = vst.msk [vmem:[#allocation3 + $0x160] sm:$0xff] %vm3125_vm8, %v3022_v53 }
 0x36b   : > { %3139 = vst.msk [vmem:[#allocation3 + $0x68] sm:$0xff] %vm3125_vm8, %v2960_v13  ;;  %3736 = vrot.lane.b32.xlu0 %v7251_v54, %s6011_s6 }
 0x36c   : > { %4099 = vrot.lane.b32.xlu1 %v7315_v23, %s6012_s7  ;;  %v3200_v23 = vld [vmem:[#allocation2 + $0xd0] sm:$0xff] }
 0x36d   : > { %v3026_v43 = vpop.permute.xlu0 %3025 }
 0x36e   : > { %v2964_v14 = vpop.permute.xlu1 %2963  ;;  %3172 = vst.msk [vmem:[#allocation3 + $0x170] sm:$0xff] %vm3125_vm8, %v3026_v43 }
 0x36f   : > { %3141 = vst.msk [vmem:[#allocation3 + $0x78] sm:$0xff] %vm3125_vm8, %v2964_v14  ;;  %3740 = vrot.lane.b32.xlu0 %v7259_v48, %s6011_s6  ;;  %v3202_v48 = vld [vmem:[#allocation2 + $0xf0] sm:$0xff] }
 0x370   : > { %4103 = vrot.lane.b32.xlu1 %v3968_v9, %s6012_s7  ;;  %v3593_v9 = vld [vmem:[#allocation2 + $0x171] sm:$0xff] }
 0x371   : > { %v3030_v46 = vpop.permute.xlu0 %3029 }
 0x372   : > { %v2968_v17 = vpop.permute.xlu1 %2967  ;;  %3174 = vst.msk [vmem:[#allocation3 + $0x180] sm:$0xff] %vm3125_vm8, %v3030_v46 }
 0x373   : > { %3143 = vst.msk [vmem:[#allocation3 + $0x88] sm:$0xff] %vm3125_vm8, %v2968_v17  ;;  %4121 = vrot.lane.b32.xlu0 %v7441_v15, %s6012_s7  ;;  %v3585_v15 = vld [vmem:[#allocation2 + $0xd1] sm:$0xff] }
 0x374   : > { %3337 = vrot.lane.b32.xlu1 %v3200_v23, %s6010_s5  ;;  %v3595_v17 = vld [vmem:[#allocation2 + $0x191] sm:$0xff] }
 0x375   : > { %v3320_v57 = vpop.permute.xlu0 %3319 }
 0x376   : > { %v2972_v54 = vpop.permute.xlu1 %2971  ;;  %3512 = vst.msk [vmem:[#allocation3] sm:$0xff] %vm3511_vm10, %v3320_v57 }
 0x377   : > { %3145 = vst.msk [vmem:[#allocation3 + $0x98] sm:$0xff] %vm3125_vm8, %v2972_v54  ;;  %4125 = vrot.lane.b32.xlu0 %v7448_v51, %s6012_s7  ;;  %v3587_v51 = vld [vmem:[#allocation2 + $0xf1] sm:$0xff]  ;;  %v3604_v54 = vld [vmem:[#allocation2 + $0x241] sm:$0xff] }
 0x378   : > { %3341 = vrot.lane.b32.xlu1 %v3202_v48, %s6010_s5 }
 0x379   : > { %v3324_v45 = vpop.permute.xlu0 %3323 }
 0x37a   : > { %v2976_v3 = vpop.permute.xlu1 %2975  ;;  %3514 = vst.msk [vmem:[#allocation3 + $0x10] sm:$0xff] %vm3511_vm10, %v3324_v45 }
 0x37b   : > { %3147 = vst.msk [vmem:[#allocation3 + $0xa8] sm:$0xff] %vm3125_vm8, %v2976_v3  ;;  %3359 = vrot.lane.b32.xlu0 %v3211_v5, %s6010_s5  ;;  %v3606_v3 = vld [vmem:[#allocation2 + $0x261] sm:$0xff]  ;;  %v3214_v5 = vld [vmem:[#allocation2 + $0x1d0] sm:$0xff] }
 0x37c   : > { %3722 = vrot.lane.b32.xlu1 %v3585_v15, %s6011_s6 }
 0x37d   : > { %v3705_v1 = vpop.permute.xlu0 %3704 }
 0x37e   : > { %v2980_v20 = vpop.permute.xlu1 %2979  ;;  %3897 = vst.msk [vmem:[#allocation3] sm:$0xff] %vm3896_vm11, %v3705_v1 }
 0x37f   : > { %3149 = vst.msk [vmem:[#allocation3 + $0xb8] sm:$0xff] %vm3125_vm8, %v2980_v20  ;;  %3363 = vrot.lane.b32.xlu0 %v3213_v10, %s6010_s5  ;;  %v3597_v10 = vld [vmem:[#allocation2 + $0x1b1] sm:$0xff] }
 0x380   : > { %3726 = vrot.lane.b32.xlu1 %v3587_v51, %s6011_s6 }
 0x381   : > { %v3709_v7 = vpop.permute.xlu0 %3708 }
 0x382   : > { %v2984_v28 = vpop.permute.xlu1 %2983  ;;  %3899 = vst.msk [vmem:[#allocation3 + $0x10] sm:$0xff] %vm3896_vm11, %v3709_v7 }
 0x383   : > { %3151 = vst.msk [vmem:[#allocation3 + $0xc8] sm:$0xff] %vm3125_vm8, %v2984_v28  ;;  %3744 = vrot.lane.b32.xlu0 %v3596_v61, %s6011_s6  ;;  %v3599_v28 = vld [vmem:[#allocation2 + $0x1d1] sm:$0xff] }
 0x384   : > { %4107 = vrot.lane.b32.xlu1 %v7326_v6, %s6012_s7  ;;  %v3204_v6 = vld [vmem:[#allocation2 + $0x110] sm:$0xff] }
 0x385   : > { %v4090_v25 = vpop.permute.xlu0 %4089 }
 0x386   : > { %v2988_v33 = vpop.permute.xlu1 %2987  ;;  %4282 = vst.msk [vmem:[#allocation3] sm:$0xff] %vm4281_vm12, %v4090_v25 }
 0x387   : > { %3153 = vst.msk [vmem:[#allocation3 + $0xd8] sm:$0xff] %vm3125_vm8, %v2988_v33  ;;  %3748 = vrot.lane.b32.xlu0 %v3598_v31, %s6011_s6  ;;  %v3982_v31 = vld [vmem:[#allocation2 + $0x1b2] sm:$0xff] }
 0x388   : > { %4111 = vrot.lane.b32.xlu1 %v7333_v62, %s6012_s7 }
 0x389   : > { %v4094_v24 = vpop.permute.xlu0 %4093 }
 0x38a   : > { %v2992_v34 = vpop.permute.xlu1 %2991  ;;  %4284 = vst.msk [vmem:[#allocation3 + $0x10] sm:$0xff] %vm4281_vm12, %v4094_v24  ;;  %v3984_v24 = vld [vmem:[#allocation2 + $0x1d2] sm:$0xff] }
 0x38b   : > { %3155 = vst.msk [vmem:[#allocation3 + $0xe8] sm:$0xff] %vm3125_vm8, %v2992_v34  ;;  %4129 = vrot.lane.b32.xlu0 %v7455_v59, %s6012_s7  ;;  %v3215_v59 = vld [vmem:[#allocation2 + $0x200] sm:$0xff] }
 0x38c   : > { %3345 = vrot.lane.b32.xlu1 %v3204_v6, %s6010_s5  ;;  %v3608_v34 = vld [vmem:[#allocation2 + $0x2a1] sm:$0xff] }
 0x38d   : > { %v3328_v60 = vpop.permute.xlu0 %3327 }
 0x38e   : > { %v2996_v38 = vpop.permute.xlu1 %2995  ;;  %3516 = vst.msk [vmem:[#allocation3 + $0x20] sm:$0xff] %vm3511_vm10, %v3328_v60 }
 0x38f   : > { %3157 = vst.msk [vmem:[#allocation3 + $0xf8] sm:$0xff] %vm3125_vm8, %v2996_v38  ;;  %4133 = vrot.lane.b32.xlu0 %v7462_v26, %s6012_s7  ;;  %v3217_v26 = vld [vmem:[#allocation2 + $0x220] sm:$0xff] }
 0x390   : > { %3349 = vrot.lane.b32.xlu1 %v3206_v35, %s6010_s5  ;;  %v4346_v38 = vld [vmem:[#allocation3] sm:$0xff] }
 0x391   : > { %v3332_v11 = vpop.permute.xlu0 %3331 }
 0x392   : > { %v3000_v62 = vpop.permute.xlu1 %2999  ;;  %3518 = vst.msk [vmem:[#allocation3 + $0x30] sm:$0xff] %vm3511_vm10, %v3332_v11 }
 0x393   : > { %3159 = vst.msk [vmem:[#allocation3 + $0x108] sm:$0xff] %vm3125_vm8, %v3000_v62  ;;  %3367 = vrot.lane.b32.xlu0 %v3215_v59, %s6010_s5  ;;  %v3610_v62 = vld [vmem:[#allocation2 + $0x2c1] sm:$0xff] }
 0x394   : > { %3730 = vrot.lane.b32.xlu1 %v3589_v47, %s6011_s6 }
 0x395   : > { %v3713_v27 = vpop.permute.xlu0 %3712 }
 0x396   : > { %v3004_v36 = vpop.permute.xlu1 %3003  ;;  %3901 = vst.msk [vmem:[#allocation3 + $0x20] sm:$0xff] %vm3896_vm11, %v3713_v27  ;;  %v3216_v27 = vld [vmem:[#allocation2 + $0x210] sm:$0xff] }
 0x397   : > { %3161 = vst.msk [vmem:[#allocation3 + $0x118] sm:$0xff] %vm3125_vm8, %v3004_v36  ;;  %3371 = vrot.lane.b32.xlu0 %v3217_v26, %s6010_s5 }
 0x398   : > { %3734 = vrot.lane.b32.xlu1 %v3591_v52, %s6011_s6  ;;  %v4348_v52 = vld [vmem:[#allocation3 + $0x10] sm:$0xff] }
 0x399   : > { %v3717_v37 = vpop.permute.xlu0 %3716 }
 0x39a   : > { %v3008_v8 = vpop.permute.xlu1 %3007  ;;  %3903 = vst.msk [vmem:[#allocation3 + $0x30] sm:$0xff] %vm3896_vm11, %v3717_v37 }
 0x39b   : > { %3163 = vst.msk [vmem:[#allocation3 + $0x128] sm:$0xff] %vm3125_vm8, %v3008_v8  ;;  %3752 = vrot.lane.b32.xlu0 %v3600_v50, %s6011_s6  ;;  %v3218_v50 = vld [vmem:[#allocation2 + $0x230] sm:$0xff] }
 0x39c   : > { %4115 = vrot.lane.b32.xlu1 %v7340_v29, %s6012_s7  ;;  %v3208_v29 = vld [vmem:[#allocation2 + $0x170] sm:$0xff] }
 0x39d   : > { %v4098_v21 = vpop.permute.xlu0 %4097 }
 0x39e   : > { %v3012_v22 = vpop.permute.xlu1 %3011  ;;  %4286 = vst.msk [vmem:[#allocation3 + $0x20] sm:$0xff] %vm4281_vm12, %v4098_v21  ;;  %v3227_v21 = vld [vmem:[#allocation2 + $0x2e0] sm:$0xff] }
 0x39f   : > { %3165 = vst.msk [vmem:[#allocation3 + $0x138] sm:$0xff] %vm3125_vm8, %v3012_v22  ;;  %3756 = vrot.lane.b32.xlu0 %v3602_v30, %s6011_s6 }
 0x3a0   : > { %4119 = vrot.lane.b32.xlu1 %v3976_v63, %s6012_s7 }
 0x3a1   : > { %v4102_v18 = vpop.permute.xlu0 %4101 }
 0x3a2   : > { %v3016_v42 = vpop.permute.xlu1 %3015  ;;  %4288 = vst.msk [vmem:[#allocation3 + $0x30] sm:$0xff] %vm4281_vm12, %v4102_v18  ;;  %v3603_v18 = vld [vmem:[#allocation2 + $0x231] sm:$0xff] }
 0x3a3   : > { %3167 = vst.msk [vmem:[#allocation3 + $0x148] sm:$0xff] %vm3125_vm8, %v3016_v42  ;;  %4137 = vrot.lane.b32.xlu0 %v7470_v55, %s6012_s7  ;;  %v3219_v55 = vld [vmem:[#allocation2 + $0x240] sm:$0xff] }
 0x3a4   : > { %3353 = vrot.lane.b32.xlu1 %v3208_v29, %s6010_s5 }
 0x3a5   : > { %v3336_v49 = vpop.permute.xlu0 %3335 }
 0x3a6   : > { %v3020_v40 = vpop.permute.xlu1 %3019  ;;  %3520 = vst.msk [vmem:[#allocation3 + $0x40] sm:$0xff] %vm3511_vm10, %v3336_v49  ;;  %v3986_v49 = vld [vmem:[#allocation2 + $0x212] sm:$0xff] }
 0x3a7   : > { %3169 = vst.msk [vmem:[#allocation3 + $0x158] sm:$0xff] %vm3125_vm8, %v3020_v40  ;;  %4141 = vrot.lane.b32.xlu0 %v7478_v32, %s6012_s7  ;;  %v3221_v32 = vld [vmem:[#allocation2 + $0x260] sm:$0xff] }
 0x3a8   : > { %3357 = vrot.lane.b32.xlu1 %v3210_v44, %s6010_s5  ;;  %v3612_v44 = vld [vmem:[#allocation2 + $0x2e1] sm:$0xff] }
 0x3a9   : > { %v3340_v53 = vpop.permute.xlu0 %3339 }
 0x3aa   : > { %v3024_v13 = vpop.permute.xlu1 %3023  ;;  %3522 = vst.msk [vmem:[#allocation3 + $0x50] sm:$0xff] %vm3511_vm10, %v3340_v53 }
 0x3ab   : > { %3171 = vst.msk [vmem:[#allocation3 + $0x168] sm:$0xff] %vm3125_vm8, %v3024_v13  ;;  %3375 = vrot.lane.b32.xlu0 %v3219_v55, %s6010_s5 }
 0x3ac   : > { %3738 = vrot.lane.b32.xlu1 %v3593_v9, %s6011_s6  ;;  %v4350_v9 = vld [vmem:[#allocation3 + $0x20] sm:$0xff] }
 0x3ad   : > { %v3721_v43 = vpop.permute.xlu0 %3720 }
 0x3ae   : > { %v3028_v14 = vpop.permute.xlu1 %3027  ;;  %3905 = vst.msk [vmem:[#allocation3 + $0x40] sm:$0xff] %vm3896_vm11, %v3721_v43  ;;  %v3614_v43 = vld [vmem:[#allocation2 + $0x301] sm:$0xff] }
 0x3af   : > { %3173 = vst.msk [vmem:[#allocation3 + $0x178] sm:$0xff] %vm3125_vm8, %v3028_v14  ;;  %3379 = vrot.lane.b32.xlu0 %v3221_v32, %s6010_s5  ;;  %v3988_v14 = vld [vmem:[#allocation2 + $0x232] sm:$0xff] }
 0x3b0   : > { %3742 = vrot.lane.b32.xlu1 %v3595_v17, %s6011_s6 }
 0x3b1   : > { %v3725_v23 = vpop.permute.xlu0 %3724 }
 0x3b2   : > { %v3032_v46 = vpop.permute.xlu1 %3031  ;;  %3907 = vst.msk [vmem:[#allocation3 + $0x50] sm:$0xff] %vm3896_vm11, %v3725_v23  ;;  %v4352_v23 = vld [vmem:[#allocation3 + $0x30] sm:$0xff] }
 0x3b3   : > { %3175 = vst.msk [vmem:[#allocation3 + $0x188] sm:$0xff] %vm3125_vm8, %v3032_v46  ;;  %3760 = vrot.lane.b32.xlu0 %v3604_v54, %s6011_s6 }
 0x3b4   : > { %4123 = vrot.lane.b32.xlu1 %v7351_v41, %s6012_s7  ;;  %v3212_v41 = vld [vmem:[#allocation2 + $0x1b0] sm:$0xff] }
 0x3b5   : > { %v4106_v48 = vpop.permute.xlu0 %4105 }
 0x3b6   : > { %v3322_v57 = vpop.permute.xlu1 %3321  ;;  %4290 = vst.msk [vmem:[#allocation3 + $0x40] sm:$0xff] %vm4281_vm12, %v4106_v48 }
 0x3b7   : > { %3513 = vst.msk [vmem:[#allocation3 + $0x8] sm:$0xff] %vm3511_vm10, %v3322_v57  ;;  %3764 = vrot.lane.b32.xlu0 %v3606_v3, %s6011_s6  ;;  %v3220_v57 = vld [vmem:[#allocation2 + $0x250] sm:$0xff] }
 0x3b8   : > { %4127 = vrot.lane.b32.xlu1 %v7358_v39, %s6012_s7  ;;  %v3222_v3 = vld [vmem:[#allocation2 + $0x270] sm:$0xff] }
 0x3b9   : > { %v4110_v15 = vpop.permute.xlu0 %4109 }
 0x3ba   : > { %v3326_v45 = vpop.permute.xlu1 %3325  ;;  %4292 = vst.msk [vmem:[#allocation3 + $0x50] sm:$0xff] %vm4281_vm12, %v4110_v15 }
 0x3bb   : > { %3515 = vst.msk [vmem:[#allocation3 + $0x18] sm:$0xff] %vm3511_vm10, %v3326_v45  ;;  %4145 = vrot.lane.b32.xlu0 %v7486_v56, %s6012_s7  ;;  %v3223_v56 = vld [vmem:[#allocation2 + $0x2a0] sm:$0xff] }
 0x3bc   : > { %3361 = vrot.lane.b32.xlu1 %v3212_v41, %s6010_s5 }
 0x3bd   : > { %v3344_v1 = vpop.permute.xlu0 %3343 }
 0x3be   : > { %v3707_v20 = vpop.permute.xlu1 %3706  ;;  %3524 = vst.msk [vmem:[#allocation3 + $0x60] sm:$0xff] %vm3511_vm10, %v3344_v1  ;;  %v3607_v1 = vld [vmem:[#allocation2 + $0x271] sm:$0xff] }
 0x3bf   : > { %3898 = vst.msk [vmem:[#allocation3 + $0x8] sm:$0xff] %vm3896_vm11, %v3707_v20  ;;  %4149 = vrot.lane.b32.xlu0 %v7494_v4, %s6012_s7  ;;  %v3225_v4 = vld [vmem:[#allocation2 + $0x2c0] sm:$0xff] }
 0x3c0   : > { %3365 = vrot.lane.b32.xlu1 %v3214_v5, %s6010_s5  ;;  %v3231_v20 = vld [vmem:[#allocation2 + $0x340] sm:$0xff] }
 0x3c1   : > { %v3348_v51 = vpop.permute.xlu0 %3347 }
 0x3c2   : > { %v3711_v39 = vpop.permute.xlu1 %3710  ;;  %3526 = vst.msk [vmem:[#allocation3 + $0x70] sm:$0xff] %vm3511_vm10, %v3348_v51 }
 0x3c3   : > { %3900 = vst.msk [vmem:[#allocation3 + $0x18] sm:$0xff] %vm3896_vm11, %v3711_v39  ;;  %3383 = vrot.lane.b32.xlu0 %v3223_v56, %s6010_s5 }
 0x3c4   : > { %3746 = vrot.lane.b32.xlu1 %v3597_v10, %s6011_s6 }
 0x3c5   : > { %v3729_v61 = vpop.permute.xlu0 %3728 }
 0x3c6   : > { %v4092_v7 = vpop.permute.xlu1 %4091  ;;  %3909 = vst.msk [vmem:[#allocation3 + $0x60] sm:$0xff] %vm3896_vm11, %v3729_v61  ;;  %v3992_v61 = vld [vmem:[#allocation2 + $0x272] sm:$0xff] }
 0x3c7   : > { %4283 = vst.msk [vmem:[#allocation3 + $0x8] sm:$0xff] %vm4281_vm12, %v4092_v7  ;;  %3387 = vrot.lane.b32.xlu0 %v3225_v4, %s6010_s5  ;;  %v3616_v7 = vld [vmem:[#allocation2 + $0x341] sm:$0xff] }
 0x3c8   : > { %3750 = vrot.lane.b32.xlu1 %v3599_v28, %s6011_s6  ;;  %v3990_v28 = vld [vmem:[#allocation2 + $0x252] sm:$0xff] }
 0x3c9   : > { %v3733_v25 = vpop.permute.xlu0 %3732 }
 0x3ca   : > { %v4096_v33 = vpop.permute.xlu1 %4095  ;;  %3911 = vst.msk [vmem:[#allocation3 + $0x70] sm:$0xff] %vm3896_vm11, %v3733_v25  ;;  %v4354_v25 = vld [vmem:[#allocation3 + $0x40] sm:$0xff] }
 0x3cb   : > { %4285 = vst.msk [vmem:[#allocation3 + $0x18] sm:$0xff] %vm4281_vm12, %v4096_v33  ;;  %3768 = vrot.lane.b32.xlu0 %v3608_v34, %s6011_s6  ;;  %v3618_v34 = vld [vmem:[#allocation2 + $0x361] sm:$0xff] }
 0x3cc   : > { %4131 = vrot.lane.b32.xlu1 %v3982_v31, %s6012_s7 }
 0x3cd   : > { %v4114_v35 = vpop.permute.xlu0 %4113 }
 0x3ce   : > { %v3330_v6 = vpop.permute.xlu1 %3329  ;;  %v4347_v60 = vld [vmem:[#allocation3 + $0x8] sm:$0xff]  ;;  %4294 = vst.msk [vmem:[#allocation3 + $0x60] sm:$0xff] %vm4281_vm12, %v4114_v35 }
 0x3cf   : > { %3517 = vst.msk [vmem:[#allocation3 + $0x28] sm:$0xff] %vm3511_vm10, %v3330_v6  ;;  %v4410_v11 = vpack.c.bf16 %v4347_v60, %v4346_v38  ;;  %3772 = vrot.lane.b32.xlu0 %v3610_v62, %s6011_s6  ;;  %v4356_v38 = vld [vmem:[#allocation3 + $0x50] sm:$0xff] }
 0x3d0   : > { %4135 = vrot.lane.b32.xlu1 %v3984_v24, %s6012_s7  ;;  %v3224_v62 = vld [vmem:[#allocation2 + $0x2b0] sm:$0xff] }
 0x3d1   : > { %5875 = vmatprep.mubr.msk.bf16.mxu1 %vm4478_vm13, %v4410_v11  ;;  %v4118_v59 = vpop.permute.xlu0 %4117 }
 0x3d2   : > { %v3334_v47 = vpop.permute.xlu1 %3333  ;;  %v4349_v36 = vld [vmem:[#allocation3 + $0x18] sm:$0xff]  ;;  %4296 = vst.msk [vmem:[#allocation3 + $0x70] sm:$0xff] %vm4281_vm12, %v4118_v59 }
 0x3d3   : > { %3519 = vst.msk [vmem:[#allocation3 + $0x38] sm:$0xff] %vm3511_vm10, %v3334_v47  ;;  %v4411_v26 = vpack.c.bf16 %v4349_v36, %v4348_v52  ;;  %4153 = vrot.lane.b32.xlu0 %v7501_v58, %s6012_s7  ;;  %v3601_v58 = vld [vmem:[#allocation2 + $0x211] sm:$0xff] }
 0x3d4   : > { %3369 = vrot.lane.b32.xlu1 %v3216_v27, %s6010_s5  ;;  %v3226_v52 = vld [vmem:[#allocation2 + $0x2d0] sm:$0xff] }
 0x3d5   : > { %5876 = vmatmul.mubr.msk.bf16.vlgmr.msra.gmra.mxu1 %vm4478_vm13, %v4411_v26  ;;  %v3352_v37 = vpop.permute.xlu0 %3351  ;;  %v3235_v26 = vld [vmem:[#allocation2 + $0x380] sm:$0xff] }
 0x3d6   : > { %v3715_v8 = vpop.permute.xlu1 %3714  ;;  %3528 = vst.msk [vmem:[#allocation3 + $0x80] sm:$0xff] %vm3511_vm10, %v3352_v37 }
 0x3d7   : > { %3902 = vst.msk [vmem:[#allocation3 + $0x28] sm:$0xff] %vm3896_vm11, %v3715_v8  ;;  %4157 = vrot.lane.b32.xlu0 %v7508_v12, %s6012_s7  ;;  %v3229_v12 = vld [vmem:[#allocation2 + $0x300] sm:$0xff] }
 0x3d8   : > { %3373 = vrot.lane.b32.xlu1 %v3218_v50, %s6010_s5  ;;  %v3611_v50 = vld [vmem:[#allocation2 + $0x2d1] sm:$0xff] }
 0x3d9   : > { %v3356_v22 = vpop.permute.xlu0 %3355 }
 0x3da   : > { %v3719_v63 = vpop.permute.xlu1 %3718  ;;  %3530 = vst.msk [vmem:[#allocation3 + $0x90] sm:$0xff] %vm3511_vm10, %v3356_v22 }
 0x3db   : > { %3904 = vst.msk [vmem:[#allocation3 + $0x38] sm:$0xff] %vm3896_vm11, %v3719_v63  ;;  %3391 = vrot.lane.b32.xlu0 %v3227_v21, %s6010_s5  ;;  %v3620_v21 = vld [vmem:[#allocation2 + $0x381] sm:$0xff] }
 0x3dc   : > { %3754 = vrot.lane.b32.xlu1 %v3601_v58, %s6011_s6  ;;  %v3994_v58 = vld [vmem:[#allocation2 + $0x2b2] sm:$0xff] }
 0x3dd   : > { %v3737_v42 = vpop.permute.xlu0 %3736 }
 0x3de   : > { %v4100_v30 = vpop.permute.xlu1 %4099  ;;  %3913 = vst.msk [vmem:[#allocation3 + $0x80] sm:$0xff] %vm3896_vm11, %v3737_v42 }
 0x3df   : > { %4287 = vst.msk [vmem:[#allocation3 + $0x28] sm:$0xff] %vm4281_vm12, %v4100_v30  ;;  %3395 = vrot.lane.b32.xlu0 %v3229_v12, %s6010_s5 }
 0x3e0   : > { %3758 = vrot.lane.b32.xlu1 %v3603_v18, %s6011_s6  ;;  %v4358_v18 = vld [vmem:[#allocation3 + $0x60] sm:$0xff] }
 0x3e1   : > { %v3741_v40 = vpop.permute.xlu0 %3740 }
 0x3e2   : > { %v4104_v29 = vpop.permute.xlu1 %4103  ;;  %3915 = vst.msk [vmem:[#allocation3 + $0x90] sm:$0xff] %vm3896_vm11, %v3741_v40  ;;  %v3622_v40 = vld [vmem:[#allocation2 + $0x3a1] sm:$0xff] }
 0x3e3   : > { %4289 = vst.msk [vmem:[#allocation3 + $0x38] sm:$0xff] %vm4281_vm12, %v4104_v29  ;;  %3776 = vrot.lane.b32.xlu0 %v3612_v44, %s6011_s6  ;;  %v3996_v29 = vld [vmem:[#allocation2 + $0x2d2] sm:$0xff] }
 0x3e4   : > { %4139 = vrot.lane.b32.xlu1 %v3986_v49, %s6012_s7 }
 0x3e5   : > { %v4122_v53 = vpop.permute.xlu0 %4121 }
 0x3e6   : > { %v3338_v13 = vpop.permute.xlu1 %3337  ;;  %v4351_v55 = vld [vmem:[#allocation3 + $0x28] sm:$0xff]  ;;  %4298 = vst.msk [vmem:[#allocation3 + $0x80] sm:$0xff] %vm4281_vm12, %v4122_v53  ;;  %v4360_v53 = vld [vmem:[#allocation3 + $0x70] sm:$0xff] }
 0x3e7   : > { %3521 = vst.msk [vmem:[#allocation3 + $0x48] sm:$0xff] %vm3511_vm10, %v3338_v13  ;;  %v4412_v17 = vpack.c.bf16 %v4351_v55, %v4350_v9  ;;  %3780 = vrot.lane.b32.xlu0 %v3614_v43, %s6011_s6  ;;  %v3228_v55 = vld [vmem:[#allocation2 + $0x2f0] sm:$0xff] }
 0x3e8   : > { %4143 = vrot.lane.b32.xlu1 %v3988_v14, %s6012_s7  ;;  %v4005_v14 = vld [vmem:[#allocation2 + $0x382] sm:$0xff] }
 0x3e9   : > { %5879 = vmatprep.mubr.msk.bf16.mxu1 %vm4478_vm13, %v4412_v17  ;;  %v4126_v46 = vpop.permute.xlu0 %4125  ;;  %v3230_v17 = vld [vmem:[#allocation2 + $0x310] sm:$0xff] }
 0x3ea   : > { %v3342_v32 = vpop.permute.xlu1 %3341  ;;  %v4353_v54 = vld [vmem:[#allocation3 + $0x38] sm:$0xff]  ;;  %4300 = vst.msk [vmem:[#allocation3 + $0x90] sm:$0xff] %vm4281_vm12, %v4126_v46 }
 0x3eb   : > { %3523 = vst.msk [vmem:[#allocation3 + $0x58] sm:$0xff] %vm3511_vm10, %v3342_v32  ;;  %v4413_v48 = vpack.c.bf16 %v4353_v54, %v4352_v23  ;;  %4161 = vrot.lane.b32.xlu0 %v7516_v2, %s6012_s7  ;;  %v3605_v2 = vld [vmem:[#allocation2 + $0x251] sm:$0xff]  ;;  %v4007_v23 = vld [vmem:[#allocation2 + $0x3a2] sm:$0xff] }
 0x3ec   : > { %3377 = vrot.lane.b32.xlu1 %v3220_v57, %s6010_s5 }
 0x3ed   : > { %5880 = vmatmul.mubr.msk.bf16.gmra.mxu1 %vm4478_vm13, %v4413_v48  ;;  %v3360_v15 = vpop.permute.xlu0 %3359  ;;  %v3613_v48 = vld [vmem:[#allocation2 + $0x2f1] sm:$0xff] }
 0x3ee   : > { %v3723_v45 = vpop.permute.xlu1 %3722  ;;  %3532 = vst.msk [vmem:[#allocation3 + $0xa0] sm:$0xff] %vm3511_vm10, %v3360_v15 }
 0x3ef   : > { %3906 = vst.msk [vmem:[#allocation3 + $0x48] sm:$0xff] %vm3896_vm11, %v3723_v45  ;;  %4165 = vrot.lane.b32.xlu0 %v7524_v0, %s6012_s7  ;;  %v3233_v0 = vld [vmem:[#allocation2 + $0x360] sm:$0xff]  ;;  %v3615_v45 = vld [vmem:[#allocation2 + $0x311] sm:$0xff] }
 0x3f0   : > { %3381 = vrot.lane.b32.xlu1 %v3222_v3, %s6010_s5  ;;  %v7838_v3 = vld [vmem:[#allocation2 + $0x3f2] sm:$0xff] }
 0x3f1   : > { %v3364_v5 = vpop.permute.xlu0 %3363 }
 0x3f2   : > { %v3727_v41 = vpop.permute.xlu1 %3726  ;;  %3534 = vst.msk [vmem:[#allocation3 + $0xb0] sm:$0xff] %vm3511_vm10, %v3364_v5  ;;  %v3239_v5 = vld [vmem:[#allocation2 + $0x3e0] sm:$0xff] }
 0x3f3   : > { %3908 = vst.msk [vmem:[#allocation3 + $0x58] sm:$0xff] %vm3896_vm11, %v3727_v41  ;;  %3399 = vrot.lane.b32.xlu0 %v3231_v20, %s6010_s5 }
 0x3f4   : > { %3762 = vrot.lane.b32.xlu1 %v3605_v2, %s6011_s6 }
 0x3f5   : > { %v3745_v51 = vpop.permute.xlu0 %3744 }
 0x3f6   : > { %v4108_v39 = vpop.permute.xlu1 %4107  ;;  %3917 = vst.msk [vmem:[#allocation3 + $0xa0] sm:$0xff] %vm3896_vm11, %v3745_v51  ;;  %v4000_v51 = vld [vmem:[#allocation2 + $0x312] sm:$0xff] }
 0x3f7   : > { %4291 = vst.msk [vmem:[#allocation3 + $0x48] sm:$0xff] %vm4281_vm12, %v4108_v39  ;;  %3403 = vrot.lane.b32.xlu0 %v3233_v0, %s6010_s5  ;;  %v3241_v39 = vld [vmem:[#allocation2 + $0x400] sm:$0xff] }
 0x3f8   : > { %3766 = vrot.lane.b32.xlu1 %v3607_v1, %s6011_s6  ;;  %v3998_v1 = vld [vmem:[#allocation2 + $0x2f2] sm:$0xff] }
 0x3f9   : > { %v3749_v56 = vpop.permute.xlu0 %3748 }
 0x3fa   : > { %v4112_v10 = vpop.permute.xlu1 %4111  ;;  %3919 = vst.msk [vmem:[#allocation3 + $0xb0] sm:$0xff] %vm3896_vm11, %v3749_v56  ;;  %v4362_v56 = vld [vmem:[#allocation3 + $0x80] sm:$0xff] }
 0x3fb   : > { %4293 = vst.msk [vmem:[#allocation3 + $0x58] sm:$0xff] %vm4281_vm12, %v4112_v10  ;;  %3784 = vrot.lane.b32.xlu0 %v3616_v7, %s6011_s6  ;;  %v3624_v7 = vld [vmem:[#allocation2 + $0x3e1] sm:$0xff] }
 0x3fc   : > { %4147 = vrot.lane.b32.xlu1 %v3990_v28, %s6012_s7 }
 0x3fd   : > { %v4130_v33 = vpop.permute.xlu0 %4129 }
 0x3fe   : > { %v3346_v4 = vpop.permute.xlu1 %3345  ;;  %v4355_v31 = vld [vmem:[#allocation3 + $0x48] sm:$0xff]  ;;  %4302 = vst.msk [vmem:[#allocation3 + $0xa0] sm:$0xff] %vm4281_vm12, %v4130_v33 }
 0x3ff   : > { %3525 = vst.msk [vmem:[#allocation3 + $0x68] sm:$0xff] %vm3511_vm10, %v3346_v4  ;;  %v4414_v24 = vpack.c.bf16 %v4355_v31, %v4354_v25  ;;  %3788 = vrot.lane.b32.xlu0 %v3618_v34, %s6011_s6  ;;  %v4364_v25 = vld [vmem:[#allocation3 + $0x90] sm:$0xff] }
 0x400   : > { %4151 = vrot.lane.b32.xlu1 %v3992_v61, %s6012_s7  ;;  %v3232_v34 = vld [vmem:[#allocation2 + $0x350] sm:$0xff] }
 0x401   : > { %5883 = vmatprep.mubr.msk.bf16.mxu1 %vm4478_vm13, %v4414_v24  ;;  %v4134_v35 = vpop.permute.xlu0 %4133  ;;  %v3626_v24 = vld [vmem:[#allocation2 + $0x401] sm:$0xff] }
 0x402   : > { %v3350_v6 = vpop.permute.xlu1 %3349  ;;  %v4357_v60 = vld [vmem:[#allocation3 + $0x58] sm:$0xff]  ;;  %4304 = vst.msk [vmem:[#allocation3 + $0xb0] sm:$0xff] %vm4281_vm12, %v4134_v35 }
 0x403   : > { %3527 = vst.msk [vmem:[#allocation3 + $0x78] sm:$0xff] %vm3511_vm10, %v3350_v6  ;;  %v4415_v11 = vpack.c.bf16 %v4357_v60, %v4356_v38  ;;  %4169 = vrot.lane.b32.xlu0 %v7532_v16, %s6012_s7  ;;  %v3609_v16 = vld [vmem:[#allocation2 + $0x2b1] sm:$0xff] }
 0x404   : > { %3385 = vrot.lane.b32.xlu1 %v3224_v62, %s6010_s5  ;;  %v3234_v60 = vld [vmem:[#allocation2 + $0x370] sm:$0xff]  ;;  %v4009_v62 = vld [vmem:[#allocation2 + $0x3e2] sm:$0xff] }
 0x405   : > { %5884 = vmatmul.mubr.msk.bf16.gmra.mxu1 %vm4478_vm13, %v4415_v11  ;;  %v3368_v59 = vpop.permute.xlu0 %3367 }
 0x406   : > { %v3731_v47 = vpop.permute.xlu1 %3730  ;;  %3536 = vst.msk [vmem:[#allocation3 + $0xc0] sm:$0xff] %vm3511_vm10, %v3368_v59  ;;  %v3617_v59 = vld [vmem:[#allocation2 + $0x351] sm:$0xff] }
 0x407   : > { %3910 = vst.msk [vmem:[#allocation3 + $0x68] sm:$0xff] %vm3896_vm11, %v3731_v47  ;;  %4173 = vrot.lane.b32.xlu0 %v7540_v19, %s6012_s7  ;;  %v3237_v19 = vld [vmem:[#allocation2 + $0x3a0] sm:$0xff] }
 0x408   : > { %3389 = vrot.lane.b32.xlu1 %v3226_v52, %s6010_s5  ;;  %v7867_v52 = vld [vmem:[#allocation2 + $0x402] sm:$0xff] }
 0x409   : > { %v3372_v27 = vpop.permute.xlu0 %3371 }
 0x40a   : > { %v3735_v36 = vpop.permute.xlu1 %3734  ;;  %3538 = vst.msk [vmem:[#allocation3 + $0xd0] sm:$0xff] %vm3511_vm10, %v3372_v27 }
 0x40b   : > { %3912 = vst.msk [vmem:[#allocation3 + $0x78] sm:$0xff] %vm3896_vm11, %v3735_v36  ;;  %3407 = vrot.lane.b32.xlu0 %v3235_v26, %s6010_s5  ;;  %v7874_v26 = vld [vmem:[#allocation2 + $0x412] sm:$0xff] }
 0x40c   : > { %3770 = vrot.lane.b32.xlu1 %v3609_v16, %s6011_s6  ;;  %v3619_v16 = vld [vmem:[#allocation2 + $0x371] sm:$0xff] }
 0x40d   : > { %v3753_v37 = vpop.permute.xlu0 %3752 }
 0x40e   : > { %v4116_v8 = vpop.permute.xlu1 %4115  ;;  %3921 = vst.msk [vmem:[#allocation3 + $0xc0] sm:$0xff] %vm3896_vm11, %v3753_v37 }
 0x40f   : > { %4295 = vst.msk [vmem:[#allocation3 + $0x68] sm:$0xff] %vm4281_vm12, %v4116_v8  ;;  %3411 = vrot.lane.b32.xlu0 %v3237_v19, %s6010_s5  ;;  %v7881_v19 = vld [vmem:[#allocation2 + $0x432] sm:$0xff] }
 0x410   : > { %3774 = vrot.lane.b32.xlu1 %v3611_v50, %s6011_s6  ;;  %v4002_v50 = vld [vmem:[#allocation2 + $0x352] sm:$0xff] }
 0x411   : > { %v3757_v22 = vpop.permute.xlu0 %3756 }
 0x412   : > { %v4120_v63 = vpop.permute.xlu1 %4119  ;;  %3923 = vst.msk [vmem:[#allocation3 + $0xd0] sm:$0xff] %vm3896_vm11, %v3757_v22 }
 0x413   : > { %4297 = vst.msk [vmem:[#allocation3 + $0x78] sm:$0xff] %vm4281_vm12, %v4120_v63  ;;  %3792 = vrot.lane.b32.xlu0 %v3620_v21, %s6011_s6 }
 0x414   : > { %4155 = vrot.lane.b32.xlu1 %v3994_v58, %s6012_s7  ;;  %v4366_v58 = vld [vmem:[#allocation3 + $0xa0] sm:$0xff] }
 0x415   : > { %v4138_v42 = vpop.permute.xlu0 %4137 }
 0x416   : > { %v3354_v30 = vpop.permute.xlu1 %3353  ;;  %v4359_v12 = vld [vmem:[#allocation3 + $0x68] sm:$0xff]  ;;  %4306 = vst.msk [vmem:[#allocation3 + $0xc0] sm:$0xff] %vm4281_vm12, %v4138_v42  ;;  %v3243_v42 = vld [vmem:[#allocation2 + $0x420] sm:$0xff] }
 0x417   : > { %3529 = vst.msk [vmem:[#allocation3 + $0x88] sm:$0xff] %vm3511_vm10, %v3354_v30  ;;  %v4416_v49 = vpack.c.bf16 %v4359_v12, %v4358_v18  ;;  %3796 = vrot.lane.b32.xlu0 %v3622_v40, %s6011_s6  ;;  %v4004_v30 = vld [vmem:[#allocation2 + $0x372] sm:$0xff] }
 0x418   : > { %4159 = vrot.lane.b32.xlu1 %v3996_v29, %s6012_s7  ;;  %v4368_v40 = vld [vmem:[#allocation3 + $0xb0] sm:$0xff] }
 0x419   : > { %5887 = vmatprep.mubr.msk.bf16.mxu1 %vm4478_vm13, %v4416_v49  ;;  %v4142_v13 = vpop.permute.xlu0 %4141 }
 0x41a   : > { %v3358_v44 = vpop.permute.xlu1 %3357  ;;  %v4361_v9 = vld [vmem:[#allocation3 + $0x78] sm:$0xff]  ;;  %4308 = vst.msk [vmem:[#allocation3 + $0xd0] sm:$0xff] %vm4281_vm12, %v4142_v13  ;;  %v3245_v13 = vld [vmem:[#allocation2 + $0x440] sm:$0xff] }
 0x41b   : > { %3531 = vst.msk [vmem:[#allocation3 + $0x98] sm:$0xff] %vm3511_vm10, %v3358_v44  ;;  %v4417_v43 = vpack.c.bf16 %v4361_v9, %v4360_v53  ;;  %4177 = vrot.lane.b32.xlu0 %v4005_v14, %s6012_s7  ;;  %v3236_v44 = vld [vmem:[#allocation2 + $0x390] sm:$0xff] }
 0x41c   : > { %3393 = vrot.lane.b32.xlu1 %v3228_v55, %s6010_s5  ;;  %v3238_v9 = vld [vmem:[#allocation2 + $0x3b0] sm:$0xff] }
 0x41d   : > { %5888 = vmatmul.mubr.msk.bf16.gmra.mxu1 %vm4478_vm13, %v4417_v43  ;;  %v3376_v46 = vpop.permute.xlu0 %3375  ;;  %v3628_v43 = vld [vmem:[#allocation2 + $0x421] sm:$0xff] }
 0x41e   : > { %v3739_v32 = vpop.permute.xlu1 %3738  ;;  %3540 = vst.msk [vmem:[#allocation3 + $0xe0] sm:$0xff] %vm3511_vm10, %v3376_v46  ;;  %v3621_v46 = vld [vmem:[#allocation2 + $0x391] sm:$0xff] }
 0x41f   : > { %3914 = vst.msk [vmem:[#allocation3 + $0x88] sm:$0xff] %vm3896_vm11, %v3739_v32  ;;  %4181 = vrot.lane.b32.xlu0 %v4007_v23, %s6012_s7  ;;  %v3630_v23 = vld [vmem:[#allocation2 + $0x441] sm:$0xff] }
 0x420   : > { %3397 = vrot.lane.b32.xlu1 %v3230_v17, %s6010_s5 }
 0x421   : > { %v3380_v57 = vpop.permute.xlu0 %3379 }
 0x422   : > { %v3743_v54 = vpop.permute.xlu1 %3742  ;;  %3542 = vst.msk [vmem:[#allocation3 + $0xf0] sm:$0xff] %vm3511_vm10, %v3380_v57 }
 0x423   : > { %3916 = vst.msk [vmem:[#allocation3 + $0x98] sm:$0xff] %vm3896_vm11, %v3743_v54  ;;  %3033 = vrot.lane.b32.xlu0 %v7838_v3, %s6009_s30  ;;  %v3623_v54 = vld [vmem:[#allocation2 + $0x3b1] sm:$0xff] }
 0x424   : > { %3778 = vrot.lane.b32.xlu1 %v3613_v48, %s6011_s6 }
 0x425   : > { %v3761_v41 = vpop.permute.xlu0 %3760 }
 0x426   : > { %v4124_v15 = vpop.permute.xlu1 %4123  ;;  %3925 = vst.msk [vmem:[#allocation3 + $0xe0] sm:$0xff] %vm3896_vm11, %v3761_v41 }
 0x427   : > { %4299 = vst.msk [vmem:[#allocation3 + $0x88] sm:$0xff] %vm4281_vm12, %v4124_v15  ;;  %3415 = vrot.lane.b32.xlu0 %v3239_v5, %s6010_s5  ;;  %v4006_v5 = vld [vmem:[#allocation2 + $0x392] sm:$0xff] }
 0x428   : > { %3782 = vrot.lane.b32.xlu1 %v3615_v45, %s6011_s6  ;;  %v7906_v45 = vld [vmem:[#allocation2 + $0x422] sm:$0xff] }
 0x429   : > { %v3765_v20 = vpop.permute.xlu0 %3764 }
 0x42a   : > { %v4128_v2 = vpop.permute.xlu1 %4127  ;;  %3927 = vst.msk [vmem:[#allocation3 + $0xf0] sm:$0xff] %vm3896_vm11, %v3765_v20  ;;  %v4008_v20 = vld [vmem:[#allocation2 + $0x3b2] sm:$0xff] }
 0x42b   : > { %4301 = vst.msk [vmem:[#allocation3 + $0x98] sm:$0xff] %vm4281_vm12, %v4128_v2  ;;  %3419 = vrot.lane.b32.xlu0 %v3241_v39, %s6010_s5  ;;  %v7913_v2 = vld [vmem:[#allocation2 + $0x442] sm:$0xff] }
 0x42c   : > { %4163 = vrot.lane.b32.xlu1 %v3998_v1, %s6012_s7 }
 0x42d   : > { %v4146_v10 = vpop.permute.xlu0 %4145 }
 0x42e   : > { %v3362_v0 = vpop.permute.xlu1 %3361  ;;  %v4363_v28 = vld [vmem:[#allocation3 + $0x88] sm:$0xff]  ;;  %4310 = vst.msk [vmem:[#allocation3 + $0xe0] sm:$0xff] %vm4281_vm12, %v4146_v10  ;;  %v2861_v10 = vld [vmem:[#allocation2 + $0x472] sm:$0xff] }
 0x42f   : > { %3533 = vst.msk [vmem:[#allocation3 + $0xa8] sm:$0xff] %vm3511_vm10, %v3362_v0  ;;  %v4418_v61 = vpack.c.bf16 %v4363_v28, %v4362_v56  ;;  %3800 = vrot.lane.b32.xlu0 %v3624_v7, %s6011_s6 }
 0x430   : > { %4167 = vrot.lane.b32.xlu1 %v4000_v51, %s6012_s7  ;;  %v4370_v51 = vld [vmem:[#allocation3 + $0xc0] sm:$0xff] }
 0x431   : > { %5891 = vmatprep.mubr.msk.bf16.mxu1 %vm4478_vm13, %v4418_v61  ;;  %v4150_v33 = vpop.permute.xlu0 %4149  ;;  %v4372_v61 = vld [vmem:[#allocation3 + $0xd0] sm:$0xff] }
 0x432   : > { %v3366_v4 = vpop.permute.xlu1 %3365  ;;  %v4365_v31 = vld [vmem:[#allocation3 + $0x98] sm:$0xff]  ;;  %4312 = vst.msk [vmem:[#allocation3 + $0xf0] sm:$0xff] %vm4281_vm12, %v4150_v33 }
 0x433   : > { %3535 = vst.msk [vmem:[#allocation3 + $0xb8] sm:$0xff] %vm3511_vm10, %v3366_v4  ;;  %v4419_v6 = vpack.c.bf16 %v4365_v31, %v4364_v25  ;;  %3804 = vrot.lane.b32.xlu0 %v3626_v24, %s6011_s6  ;;  %v7925_v33 = vld [vmem:[#allocation2 + $0x492] sm:$0xff] }
 0x434   : > { %3401 = vrot.lane.b32.xlu1 %v3232_v34, %s6010_s5  ;;  %v3240_v24 = vld [vmem:[#allocation2 + $0x3f0] sm:$0xff] }
 0x435   : > { %5892 = vmatmul.mubr.msk.bf16.gmra.mxu1 %vm4478_vm13, %v4419_v6  ;;  %v3384_v38 = vpop.permute.xlu0 %3383  ;;  %v3247_v6 = vld [vmem:[#allocation2 + $0x480] sm:$0xff] }
 0x436   : > { %v3747_v35 = vpop.permute.xlu1 %3746  ;;  %3544 = vst.msk [vmem:[#allocation3 + $0x100] sm:$0xff] %vm3511_vm10, %v3384_v38 }
 0x437   : > { %3918 = vst.msk [vmem:[#allocation3 + $0xa8] sm:$0xff] %vm3896_vm11, %v3747_v35  ;;  %4185 = vrot.lane.b32.xlu0 %v4009_v62, %s6012_s7  ;;  %v3249_v62 = vld [vmem:[#allocation2 + $0x4a0] sm:$0xff] }
 0x438   : > { %3405 = vrot.lane.b32.xlu1 %v3234_v60, %s6010_s5  ;;  %v3242_v60 = vld [vmem:[#allocation2 + $0x410] sm:$0xff] }
 0x439   : > { %v3388_v47 = vpop.permute.xlu0 %3387 }
 0x43a   : > { %v3751_v11 = vpop.permute.xlu1 %3750  ;;  %3546 = vst.msk [vmem:[#allocation3 + $0x110] sm:$0xff] %vm3511_vm10, %v3388_v47 }
 0x43b   : > { %3920 = vst.msk [vmem:[#allocation3 + $0xb8] sm:$0xff] %vm3896_vm11, %v3751_v11  ;;  %4189 = vrot.lane.b32.xlu0 %v7867_v52, %s6012_s7 }
 0x43c   : > { %3786 = vrot.lane.b32.xlu1 %v3617_v59, %s6011_s6  ;;  %v3625_v59 = vld [vmem:[#allocation2 + $0x3f1] sm:$0xff] }
 0x43d   : > { %v3769_v27 = vpop.permute.xlu0 %3768 }
 0x43e   : > { %v4132_v36 = vpop.permute.xlu1 %4131  ;;  %3929 = vst.msk [vmem:[#allocation3 + $0x100] sm:$0xff] %vm3896_vm11, %v3769_v27 }
 0x43f   : > { %4303 = vst.msk [vmem:[#allocation3 + $0xa8] sm:$0xff] %vm4281_vm12, %v4132_v36  ;;  %3037 = vrot.lane.b32.xlu0 %v7874_v26, %s6009_s30 }
 0x440   : > { %3790 = vrot.lane.b32.xlu1 %v3619_v16, %s6011_s6  ;;  %v3627_v16 = vld [vmem:[#allocation2 + $0x411] sm:$0xff] }
 0x441   : > { %v3773_v37 = vpop.permute.xlu0 %3772 }
 0x442   : > { %v4136_v8 = vpop.permute.xlu1 %4135  ;;  %3931 = vst.msk [vmem:[#allocation3 + $0x110] sm:$0xff] %vm3896_vm11, %v3773_v37 }
 0x443   : > { %4305 = vst.msk [vmem:[#allocation3 + $0xb8] sm:$0xff] %vm4281_vm12, %v4136_v8  ;;  %3041 = vrot.lane.b32.xlu0 %v7881_v19, %s6009_s30  ;;  %v3634_v8 = vld [vmem:[#allocation2 + $0x4a1] sm:$0xff] }
 0x444   : > { %4171 = vrot.lane.b32.xlu1 %v4002_v50, %s6012_s7 }
 0x445   : > { %v4154_v22 = vpop.permute.xlu0 %4153 }
 0x446   : > { %v3370_v63 = vpop.permute.xlu1 %3369  ;;  %v4367_v21 = vld [vmem:[#allocation3 + $0xa8] sm:$0xff]  ;;  %4314 = vst.msk [vmem:[#allocation3 + $0x100] sm:$0xff] %vm4281_vm12, %v4154_v22 }
 0x447   : > { %3537 = vst.msk [vmem:[#allocation3 + $0xc8] sm:$0xff] %vm3511_vm10, %v3370_v63  ;;  %v4420_v18 = vpack.c.bf16 %v4367_v21, %v4366_v58  ;;  %3423 = vrot.lane.b32.xlu0 %v3243_v42, %s6010_s5  ;;  %v4374_v63 = vld [vmem:[#allocation3 + $0xe0] sm:$0xff] }
 0x448   : > { %4175 = vrot.lane.b32.xlu1 %v4004_v30, %s6012_s7  ;;  %v7950_v58 = vld [vmem:[#allocation2 + $0x482] sm:$0xff] }
 0x449   : > { %5895 = vmatprep.mubr.msk.bf16.mxu1 %vm4478_vm13, %v4420_v18  ;;  %v4158_v29 = vpop.permute.xlu0 %4157  ;;  %v4376_v18 = vld [vmem:[#allocation3 + $0xf0] sm:$0xff] }
 0x44a   : > { %v3374_v12 = vpop.permute.xlu1 %3373  ;;  %v4369_v49 = vld [vmem:[#allocation3 + $0xb8] sm:$0xff]  ;;  %4316 = vst.msk [vmem:[#allocation3 + $0x110] sm:$0xff] %vm4281_vm12, %v4158_v29  ;;  %v7959_v29 = vld [vmem:[#allocation2 + $0x4a2] sm:$0xff] }
 0x44b   : > { %3539 = vst.msk [vmem:[#allocation3 + $0xd8] sm:$0xff] %vm3511_vm10, %v3374_v12  ;;  %v4421_v53 = vpack.c.bf16 %v4369_v49, %v4368_v40  ;;  %3427 = vrot.lane.b32.xlu0 %v3245_v13, %s6010_s5 }
 0x44c   : > { %3409 = vrot.lane.b32.xlu1 %v3236_v44, %s6010_s5  ;;  %v7968_v44 = vld [vmem:[#allocation2 + $0x4b2] sm:$0xff] }
 0x44d   : > { %5896 = vmatmul.mubr.msk.bf16.gmra.mxu1 %vm4478_vm13, %v4421_v53  ;;  %v3392_v14 = vpop.permute.xlu0 %3391  ;;  %v7976_v53 = vld [vmem:[#allocation2 + $0x4d2] sm:$0xff] }
 0x44e   : > { %v3755_v55 = vpop.permute.xlu1 %3754  ;;  %3548 = vst.msk [vmem:[#allocation3 + $0x120] sm:$0xff] %vm3511_vm10, %v3392_v14  ;;  %v3244_v14 = vld [vmem:[#allocation2 + $0x430] sm:$0xff] }
 0x44f   : > { %3922 = vst.msk [vmem:[#allocation3 + $0xc8] sm:$0xff] %vm3896_vm11, %v3755_v55  ;;  %3808 = vrot.lane.b32.xlu0 %v3628_v43, %s6011_s6  ;;  %v3251_v43 = vld [vmem:[#allocation2 + $0x4c0] sm:$0xff] }
 0x450   : > { %3413 = vrot.lane.b32.xlu1 %v3238_v9, %s6010_s5 }
 0x451   : > { %v3396_v32 = vpop.permute.xlu0 %3395 }
 0x452   : > { %v3759_v17 = vpop.permute.xlu1 %3758  ;;  %3550 = vst.msk [vmem:[#allocation3 + $0x130] sm:$0xff] %vm3511_vm10, %v3396_v32 }
 0x453   : > { %3924 = vst.msk [vmem:[#allocation3 + $0xd8] sm:$0xff] %vm3896_vm11, %v3759_v17  ;;  %3812 = vrot.lane.b32.xlu0 %v3630_v23, %s6011_s6  ;;  %v3246_v17 = vld [vmem:[#allocation2 + $0x450] sm:$0xff]  ;;  %v3253_v23 = vld [vmem:[#allocation2 + $0x4e0] sm:$0xff] }
 0x454   : > { %3794 = vrot.lane.b32.xlu1 %v3621_v46, %s6011_s6 }
 0x455   : > { %v3777_v48 = vpop.permute.xlu0 %3776 }
 0x456   : > { %v4140_v57 = vpop.permute.xlu1 %4139  ;;  %3933 = vst.msk [vmem:[#allocation3 + $0x120] sm:$0xff] %vm3896_vm11, %v3777_v48  ;;  %v4378_v48 = vld [vmem:[#allocation3 + $0x100] sm:$0xff] }
 0x457   : > { %4307 = vst.msk [vmem:[#allocation3 + $0xc8] sm:$0xff] %vm4281_vm12, %v4140_v57  ;;  %4193 = vrot.lane.b32.xlu0 %v7906_v45, %s6012_s7 }
 0x458   : > { %3798 = vrot.lane.b32.xlu1 %v3623_v54, %s6011_s6 }
 0x459   : > { %v3781_v41 = vpop.permute.xlu0 %3780 }
 0x45a   : > { %v4144_v15 = vpop.permute.xlu1 %4143  ;;  %3935 = vst.msk [vmem:[#allocation3 + $0x130] sm:$0xff] %vm3896_vm11, %v3781_v41  ;;  %v3636_v41 = vld [vmem:[#allocation2 + $0x4c1] sm:$0xff] }
 0x45b   : > { %4309 = vst.msk [vmem:[#allocation3 + $0xd8] sm:$0xff] %vm4281_vm12, %v4144_v15  ;;  %4197 = vrot.lane.b32.xlu0 %v7913_v2, %s6012_s7  ;;  %v3629_v15 = vld [vmem:[#allocation2 + $0x431] sm:$0xff] }
 0x45c   : > { %4179 = vrot.lane.b32.xlu1 %v4006_v5, %s6012_s7 }
 0x45d   : > { %v4162_v39 = vpop.permute.xlu0 %4161 }
 0x45e   : > { %v3378_v1 = vpop.permute.xlu1 %3377  ;;  %v4371_v0 = vld [vmem:[#allocation3 + $0xc8] sm:$0xff]  ;;  %4318 = vst.msk [vmem:[#allocation3 + $0x120] sm:$0xff] %vm4281_vm12, %v4162_v39  ;;  %v4380_v39 = vld [vmem:[#allocation3 + $0x110] sm:$0xff] }
 0x45f   : > { %3541 = vst.msk [vmem:[#allocation3 + $0xe8] sm:$0xff] %vm3511_vm10, %v3378_v1  ;;  %v4422_v56 = vpack.c.bf16 %v4371_v0, %v4370_v51  ;;  %3045 = vrot.lane.b32.xlu0 %v2861_v10, %s6009_s30  ;;  %v3638_v0 = vld [vmem:[#allocation2 + $0x4e1] sm:$0xff] }
 0x460   : > { %4183 = vrot.lane.b32.xlu1 %v4008_v20, %s6012_s7 }
 0x461   : > { %5899 = vmatprep.mubr.msk.bf16.mxu1 %vm4478_vm13, %v4422_v56  ;;  %v4166_v7 = vpop.permute.xlu0 %4165 }
 0x462   : > { %v3382_v28 = vpop.permute.xlu1 %3381  ;;  %v4373_v4 = vld [vmem:[#allocation3 + $0xd8] sm:$0xff]  ;;  %4320 = vst.msk [vmem:[#allocation3 + $0x130] sm:$0xff] %vm4281_vm12, %v4166_v7 }
 0x463   : > { %3543 = vst.msk [vmem:[#allocation3 + $0xf8] sm:$0xff] %vm3511_vm10, %v3382_v28  ;;  %v4423_v25 = vpack.c.bf16 %v4373_v4, %v4372_v61  ;;  %3049 = vrot.lane.b32.xlu0 %v7925_v33, %s6009_s30 }
 0x464   : > { %3035 = vrot.lane.b32.xlu1 %v7867_v52, %s6009_s30  ;;  %v3632_v52 = vld [vmem:[#allocation2 + $0x481] sm:$0xff] }
 0x465   : > { %5900 = vmatmul.mubr.msk.bf16.gmra.mxu1 %vm4478_vm13, %v4423_v25  ;;  %v3400_v34 = vpop.permute.xlu0 %3399  ;;  %v8009_v25 = vld [vmem:[#allocation2 + $0x4c2] sm:$0xff] }
 0x466   : > { %v3763_v31 = vpop.permute.xlu1 %3762  ;;  %3552 = vst.msk [vmem:[#allocation3 + $0x140] sm:$0xff] %vm3511_vm10, %v3400_v34 }
 0x467   : > { %3926 = vst.msk [vmem:[#allocation3 + $0xe8] sm:$0xff] %vm3896_vm11, %v3763_v31  ;;  %3431 = vrot.lane.b32.xlu0 %v3247_v6, %s6010_s5 }
 0x468   : > { %3417 = vrot.lane.b32.xlu1 %v3240_v24, %s6010_s5  ;;  %v4016_v24 = vld [vmem:[#allocation2 + $0x452] sm:$0xff] }
 0x469   : > { %v3404_v38 = vpop.permute.xlu0 %3403 }
 0x46a   : > { %v3767_v35 = vpop.permute.xlu1 %3766  ;;  %3554 = vst.msk [vmem:[#allocation3 + $0x150] sm:$0xff] %vm3511_vm10, %v3404_v38 }
 0x46b   : > { %3928 = vst.msk [vmem:[#allocation3 + $0xf8] sm:$0xff] %vm3896_vm11, %v3767_v35  ;;  %3435 = vrot.lane.b32.xlu0 %v3249_v62, %s6010_s5  ;;  %v8021_v62 = vld [vmem:[#allocation2 + $0x4e2] sm:$0xff] }
 0x46c   : > { %3421 = vrot.lane.b32.xlu1 %v3242_v60, %s6010_s5 }
 0x46d   : > { %v3785_v47 = vpop.permute.xlu0 %3784 }
 0x46e   : > { %v4148_v11 = vpop.permute.xlu1 %4147  ;;  %3937 = vst.msk [vmem:[#allocation3 + $0x140] sm:$0xff] %vm3896_vm11, %v3785_v47 }
 0x46f   : > { %4311 = vst.msk [vmem:[#allocation3 + $0xe8] sm:$0xff] %vm4281_vm12, %v4148_v11  ;;  %3816 = vrot.lane.b32.xlu0 %v3632_v52, %s6011_s6 }
 0x470   : > { %3802 = vrot.lane.b32.xlu1 %v3625_v59, %s6011_s6 }
 0x471   : > { %v3789_v27 = vpop.permute.xlu0 %3788 }
 0x472   : > { %v4152_v36 = vpop.permute.xlu1 %4151  ;;  %3939 = vst.msk [vmem:[#allocation3 + $0x150] sm:$0xff] %vm3896_vm11, %v3789_v27 }
 0x473   : > { %4313 = vst.msk [vmem:[#allocation3 + $0xf8] sm:$0xff] %vm4281_vm12, %v4152_v36  ;;  %3820 = vrot.lane.b32.xlu0 %v3634_v8, %s6011_s6 }
 0x474   : > { %3806 = vrot.lane.b32.xlu1 %v3627_v16, %s6011_s6 }
 0x475   : > { %v4170_v50 = vpop.permute.xlu0 %4169 }
 0x476   : > { %v3386_v37 = vpop.permute.xlu1 %3385  ;;  %v4375_v22 = vld [vmem:[#allocation3 + $0xe8] sm:$0xff]  ;;  %4322 = vst.msk [vmem:[#allocation3 + $0x140] sm:$0xff] %vm4281_vm12, %v4170_v50 }
 0x477   : > { %3545 = vst.msk [vmem:[#allocation3 + $0x108] sm:$0xff] %vm3511_vm10, %v3386_v37  ;;  %v4424_v21 = vpack.c.bf16 %v4375_v22, %v4374_v63  ;;  %4201 = vrot.lane.b32.xlu0 %v7950_v58, %s6012_s7 }
 0x478   : > { %4187 = vrot.lane.b32.xlu1 %v7838_v3, %s6012_s7 }
 0x479   : > { %5903 = vmatprep.mubr.msk.bf16.mxu1 %vm4478_vm13, %v4424_v21  ;;  %v4174_v42 = vpop.permute.xlu0 %4173 }
 0x47a   : > { %v3390_v30 = vpop.permute.xlu1 %3389  ;;  %v4377_v12 = vld [vmem:[#allocation3 + $0xf8] sm:$0xff]  ;;  %4324 = vst.msk [vmem:[#allocation3 + $0x150] sm:$0xff] %vm4281_vm12, %v4174_v42 }
 0x47b   : > { %3547 = vst.msk [vmem:[#allocation3 + $0x118] sm:$0xff] %vm3511_vm10, %v3390_v30  ;;  %v4425_v40 = vpack.c.bf16 %v4377_v12, %v4376_v18  ;;  %4205 = vrot.lane.b32.xlu0 %v7959_v29, %s6012_s7  ;;  %v4382_v30 = vld [vmem:[#allocation3 + $0x120] sm:$0xff]  ;;  %v3248_v18 = vld [vmem:[#allocation2 + $0x490] sm:$0xff] }
 0x47c   : > { %4191 = vrot.lane.b32.xlu1 %v7874_v26, %s6012_s7 }
 0x47d   : > { %5904 = vmatmul.mubr.msk.bf16.gmra.mxu1 %vm4478_vm13, %v4425_v40  ;;  %v3408_v49 = vpop.permute.xlu0 %3407 }
 0x47e   : > { %v3771_v3 = vpop.permute.xlu1 %3770  ;;  %3556 = vst.msk [vmem:[#allocation3 + $0x160] sm:$0xff] %vm3511_vm10, %v3408_v49 }
 0x47f   : > { %3930 = vst.msk [vmem:[#allocation3 + $0x108] sm:$0xff] %vm3896_vm11, %v3771_v3  ;;  %3053 = vrot.lane.b32.xlu0 %v7968_v44, %s6009_s30  ;;  %v4384_v3 = vld [vmem:[#allocation3 + $0x130] sm:$0xff] }
 0x480   : > { %3039 = vrot.lane.b32.xlu1 %v7906_v45, %s6009_s30 }
 0x481   : > { %v3412_v13 = vpop.permute.xlu0 %3411 }
 0x482   : > { %v3775_v26 = vpop.permute.xlu1 %3774  ;;  %3558 = vst.msk [vmem:[#allocation3 + $0x170] sm:$0xff] %vm3511_vm10, %v3412_v13 }
 0x483   : > { %3932 = vst.msk [vmem:[#allocation3 + $0x118] sm:$0xff] %vm3896_vm11, %v3775_v26  ;;  %3057 = vrot.lane.b32.xlu0 %v7976_v53, %s6009_s30 }
 0x484   : > { %3043 = vrot.lane.b32.xlu1 %v7913_v2, %s6009_s30  ;;  %v3631_v2 = vld [vmem:[#allocation2 + $0x451] sm:$0xff] }
 0x485   : > { %v3793_v55 = vpop.permute.xlu0 %3792 }
 0x486   : > { %v4156_v9 = vpop.permute.xlu1 %4155  ;;  %3941 = vst.msk [vmem:[#allocation3 + $0x160] sm:$0xff] %vm3896_vm11, %v3793_v55 }
 0x487   : > { %4315 = vst.msk [vmem:[#allocation3 + $0x108] sm:$0xff] %vm4281_vm12, %v4156_v9  ;;  %3439 = vrot.lane.b32.xlu0 %v3251_v43, %s6010_s5 }
 0x488   : > { %3425 = vrot.lane.b32.xlu1 %v3244_v14, %s6010_s5 }
 0x489   : > { %v3797_v46 = vpop.permute.xlu0 %3796 }
 0x48a   : > { %v4160_v32 = vpop.permute.xlu1 %4159  ;;  %3943 = vst.msk [vmem:[#allocation3 + $0x170] sm:$0xff] %vm3896_vm11, %v3797_v46 }
 0x48b   : > { %4317 = vst.msk [vmem:[#allocation3 + $0x118] sm:$0xff] %vm4281_vm12, %v4160_v32  ;;  %3443 = vrot.lane.b32.xlu0 %v3253_v23, %s6010_s5 }
 0x48c   : > { %3429 = vrot.lane.b32.xlu1 %v3246_v17, %s6010_s5  ;;  %v3633_v17 = vld [vmem:[#allocation2 + $0x491] sm:$0xff] }
 0x48d   : > { %v4178_v57 = vpop.permute.xlu0 %4177 }
 0x48e   : > { %v3394_v54 = vpop.permute.xlu1 %3393  ;;  %v4379_v45 = vld [vmem:[#allocation3 + $0x108] sm:$0xff]  ;;  %4326 = vst.msk [vmem:[#allocation3 + $0x160] sm:$0xff] %vm4281_vm12, %v4178_v57 }
 0x48f   : > { %3549 = vst.msk [vmem:[#allocation3 + $0x128] sm:$0xff] %vm3511_vm10, %v3394_v54  ;;  %v4426_v5 = vpack.c.bf16 %v4379_v45, %v4378_v48  ;;  %3824 = vrot.lane.b32.xlu0 %v3636_v41, %s6011_s6  ;;  %v3635_v41 = vld [vmem:[#allocation2 + $0x4b1] sm:$0xff] }
 0x490   : > { %3810 = vrot.lane.b32.xlu1 %v3629_v15, %s6011_s6 }
 0x491   : > { %5907 = vmatprep.mubr.msk.bf16.mxu1 %vm4478_vm13, %v4426_v5  ;;  %v4182_v1 = vpop.permute.xlu0 %4181 }
 0x492   : > { %v3398_v20 = vpop.permute.xlu1 %3397  ;;  %v4381_v51 = vld [vmem:[#allocation3 + $0x118] sm:$0xff]  ;;  %4328 = vst.msk [vmem:[#allocation3 + $0x170] sm:$0xff] %vm4281_vm12, %v4182_v1 }
 0x493   : > { %3551 = vst.msk [vmem:[#allocation3 + $0x138] sm:$0xff] %vm3511_vm10, %v3398_v20  ;;  %v4427_v10 = vpack.c.bf16 %v4381_v51, %v4380_v39  ;;  %3828 = vrot.lane.b32.xlu0 %v3638_v0, %s6011_s6 }
 0x494   : > { %3814 = vrot.lane.b32.xlu1 %v3631_v2, %s6011_s6 }
 0x495   : > { %v5877_v56 = vpop.f32.mrf.mxu1  ;;  %5908 = vmatmul.mubr.msk.bf16.gmra.mxu1 %vm4478_vm13, %v4427_v10  ;;  %v3034_v61 = vpop.permute.xlu0 %3033 }
 0x496   : > { %v5664_v28 = vpack.c.bf16 %v5877_v56, %v5877_v56  ;;  %v3779_v7 = vpop.permute.xlu1 %3778  ;;  %3176 = vst.msk [vmem:[#allocation3 + $0x190] sm:$0xff] %vm3125_vm8, %v3034_v61  ;;  %v5192_v52 = vsel %vm908_vm0, %v5877_v56, 0.0 }
 0x497   : > { %3934 = vst.msk [vmem:[#allocation3 + $0x128] sm:$0xff] %vm3896_vm11, %v3779_v7  ;;  %v4613_v4 = vpop.f32.mrf.mxu1  ;;  %4209 = vrot.lane.b32.xlu0 %v8009_v25, %s6012_s7 }
 0x498   : > { %5127 = vst.msk [vmem:[%s8004_s24 + $0x8] sm:$0xf] %vm5124_vm14, %v5664_v28  ;;  %v5662_v31 = vpack.c.bf16 %v4613_v4, %v4613_v4  ;;  %4195 = vrot.lane.b32.xlu1 %v7881_v19, %s6012_s7  ;;  %v5189_v19 = vsel %vm908_vm0, %v4613_v4, 0.0 }
 0x499   : > { %v5878_v34 = vpop.f32.mrf.mxu1  ;;  %v3416_v38 = vpop.permute.xlu0 %3415 }
 0x49a   : > { %5125 = vst.msk [vmem:[%s8004_s24] sm:$0xf] %vm5124_vm14, %v5662_v31  ;;  %v5665_v6 = vpack.c.bf16 %v5878_v34, %v5878_v34  ;;  %v3783_v35 = vpop.permute.xlu1 %3782  ;;  %v5194_v8 = vsel %vm908_vm0, %v5878_v34, 0.0  ;;  %v4386_v31 = vld [vmem:[#allocation3 + $0x140] sm:$0xff] }
 0x49b   : > { %3936 = vst.msk [vmem:[#allocation3 + $0x138] sm:$0xff] %vm3896_vm11, %v3783_v35  ;;  %v4616_v60 = vpop.f32.mrf.mxu1  ;;  %4213 = vrot.lane.b32.xlu0 %v8021_v62, %s6012_s7  ;;  %v4388_v35 = vld [vmem:[#allocation3 + $0x150] sm:$0xff] }
 0x49c   : > { %3560 = vst.msk [vmem:[#allocation3 + $0x180] sm:$0xff] %vm3511_vm10, %v3416_v38  ;;  %v5663_v11 = vpack.c.bf16 %v4616_v60, %v4616_v60  ;;  %v5190_v47 = vsel %vm908_vm0, %v4616_v60, 0.0  ;;  %4199 = vrot.lane.b32.xlu1 %v4016_v24, %s6012_s7 }
 0x49d   : > { %5128 = vst.msk [vmem:[%s8004_s24 + $0xc] sm:$0xf] %vm5124_vm14, %v5665_v6  ;;  %v5191_v59 = vadd.f32 %v5190_v47, %v5189_v19  ;;  %v3420_v27 = vpop.permute.xlu0 %3419 }
 0x49e   : > { %5126 = vst.msk [vmem:[%s8004_s24 + $0x4] sm:$0xf] %vm5124_vm14, %v5663_v11  ;;  %v4164_v36 = vpop.permute.xlu1 %4163 }
 0x49f   : > { %v5193_v16 = vadd.f32 %v5192_v52, %v5191_v59  ;;  %4319 = vst.msk [vmem:[#allocation3 + $0x128] sm:$0xff] %vm4281_vm12, %v4164_v36  ;;  %v3252_v59 = vld [vmem:[#allocation2 + $0x4d0] sm:$0xff] }
 0x4a0   : > { %3562 = vst.msk [vmem:[#allocation3 + $0x190] sm:$0xff] %vm3511_vm10, %v3420_v27  ;;  %3047 = vrot.lane.b32.xlu1 %v7950_v58, %s6009_s30 }
 0x4a1   : > { %v5195_v37 = vadd.f32 %v5194_v8, %v5193_v16  ;;  %v3801_v63 = vpop.permute.xlu0 %3800 }
 0x4a2   : > { %v4168_v50 = vpop.permute.xlu1 %4167  ;;  %3945 = vst.msk [vmem:[#allocation3 + $0x180] sm:$0xff] %vm3896_vm11, %v3801_v63 }
 0x4a3   : > { %4321 = vst.msk [vmem:[#allocation3 + $0x138] sm:$0xff] %vm4281_vm12, %v4168_v50 }
 0x4a4   : > { %3051 = vrot.lane.b32.xlu1 %v7959_v29, %s6009_s30  ;;  %v3250_v29 = vld [vmem:[#allocation2 + $0x4b0] sm:$0xff] }
 0x4a5   : > { %v3805_v21 = vpop.permute.xlu0 %3804 }
 0x4a6   : > { %v3402_v22 = vpop.permute.xlu1 %3401  ;;  %v4383_v42 = vld [vmem:[#allocation3 + $0x128] sm:$0xff]  ;;  %3947 = vst.msk [vmem:[#allocation3 + $0x190] sm:$0xff] %vm3896_vm11, %v3805_v21 }
 0x4a7   : > { %3553 = vst.msk [vmem:[#allocation3 + $0x148] sm:$0xff] %vm3511_vm10, %v3402_v22  ;;  %v4428_v58 = vpack.c.bf16 %v4383_v42, %v4382_v30 }
 0x4a8   : > { %3433 = vrot.lane.b32.xlu1 %v3248_v18, %s6010_s5 }
 0x4a9   : > { %5911 = vmatprep.mubr.msk.bf16.mxu1 %vm4478_vm13, %v4428_v58  ;;  %v4186_v40 = vpop.permute.xlu0 %4185 }
 0x4aa   : > { %v3406_v12 = vpop.permute.xlu1 %3405  ;;  %v4385_v49 = vld [vmem:[#allocation3 + $0x138] sm:$0xff]  ;;  %4330 = vst.msk [vmem:[#allocation3 + $0x180] sm:$0xff] %vm4281_vm12, %v4186_v40 }
 0x4ab   : > { %3555 = vst.msk [vmem:[#allocation3 + $0x158] sm:$0xff] %vm3511_vm10, %v3406_v12  ;;  %v4429_v26 = vpack.c.bf16 %v4385_v49, %v4384_v3  ;;  %v3637_v12 = vld [vmem:[#allocation2 + $0x4d1] sm:$0xff] }
 0x4ac   : > { %3437 = vrot.lane.b32.xlu1 %v3250_v29, %s6010_s5  ;;  %v3639_v3 = vld [vmem:[#allocation2 + $0x4f1] sm:$0xff] }
 0x4ad   : > { %v5881_v13 = vpop.f32.mrf.mxu1  ;;  %5912 = vmatmul.mubr.msk.bf16.gmra.mxu1 %vm4478_vm13, %v4429_v26  ;;  %v4190_v14 = vpop.permute.xlu0 %4189 }
 0x4ae   : > { %v5668_v9 = vpack.c.bf16 %v5881_v13, %v5881_v13  ;;  %v3787_v55 = vpop.permute.xlu1 %3786  ;;  %4332 = vst.msk [vmem:[#allocation3 + $0x190] sm:$0xff] %vm4281_vm12, %v4190_v14  ;;  %v5200_v1 = vsel %vm908_vm0, %v5881_v13, 0.0 }
 0x4af   : > { %3938 = vst.msk [vmem:[#allocation3 + $0x148] sm:$0xff] %vm3896_vm11, %v3787_v55  ;;  %v4629_v43 = vpop.f32.mrf.mxu1  ;;  %v4390_v55 = vld [vmem:[#allocation3 + $0x160] sm:$0xff] }
 0x4b0   : > { %5131 = vst.msk [vmem:[%s8004_s24 + $0x18] sm:$0xf] %vm5124_vm14, %v5668_v9  ;;  %v5666_v32 = vpack.c.bf16 %v4629_v43, %v4629_v43  ;;  %v5196_v46 = vsel %vm908_vm0, %v4629_v43, 0.0  ;;  %3818 = vrot.lane.b32.xlu1 %v3633_v17, %s6011_s6  ;;  %v4024_v17 = vld [vmem:[#allocation2 + $0x4f2] sm:$0xff] }
 0x4b1   : > { %v5197_v23 = vadd.f32 %v5196_v46, %v5195_v37  ;;  %v5882_v54 = vpop.f32.mrf.mxu1  ;;  %v3038_v45 = vpop.permute.xlu0 %3037 }
 0x4b2   : > { %5129 = vst.msk [vmem:[%s8004_s24 + $0x10] sm:$0xf] %vm5124_vm14, %v5666_v32  ;;  %v5669_v57 = vpack.c.bf16 %v5882_v54, %v5882_v54  ;;  %v3791_v48 = vpop.permute.xlu1 %3790  ;;  %v5202_v10 = vsel %vm908_vm0, %v5882_v54, 0.0 }
 0x4b3   : > { %3940 = vst.msk [vmem:[#allocation3 + $0x158] sm:$0xff] %vm3896_vm11, %v3791_v48  ;;  %v4632_v15 = vpop.f32.mrf.mxu1 }
 0x4b4   : > { %3178 = vst.msk [vmem:[#allocation3 + $0x1a0] sm:$0xff] %vm3125_vm8, %v3038_v45  ;;  %v5667_v5 = vpack.c.bf16 %v4632_v15, %v4632_v15  ;;  %v5198_v2 = vsel %vm908_vm0, %v4632_v15, 0.0  ;;  %3822 = vrot.lane.b32.xlu1 %v3635_v41, %s6011_s6 }
 0x4b5   : > { %5132 = vst.msk [vmem:[%s8004_s24 + $0x1c] sm:$0xf] %vm5124_vm14, %v5669_v57  ;;  %v5199_v20 = vadd.f32 %v5198_v2, %v5197_v23  ;;  %v3042_v51 = vpop.permute.xlu0 %3041  ;;  %v4392_v23 = vld [vmem:[#allocation3 + $0x170] sm:$0xff] }
 0x4b6   : > { %5130 = vst.msk [vmem:[%s8004_s24 + $0x14] sm:$0xf] %vm5124_vm14, %v5667_v5  ;;  %v4172_v39 = vpop.permute.xlu1 %4171 }
 0x4b7   : > { %v5201_v0 = vadd.f32 %v5200_v1, %v5199_v20  ;;  %4323 = vst.msk [vmem:[#allocation3 + $0x148] sm:$0xff] %vm4281_vm12, %v4172_v39 }
 0x4b8   : > { %3180 = vst.msk [vmem:[#allocation3 + $0x1b0] sm:$0xff] %vm3125_vm8, %v3042_v51  ;;  %4203 = vrot.lane.b32.xlu1 %v7925_v33, %s6012_s7 }
 0x4b9   : > { %v8072_v56 = vadd.f32 %v5202_v10, %v5201_v0  ;;  %v3424_v7 = vpop.permute.xlu0 %3423 }
 0x4ba   : > { %v4176_v28 = vpop.permute.xlu1 %4175  ;;  %3564 = vst.msk [vmem:[#allocation3 + $0x1a0] sm:$0xff] %vm3511_vm10, %v3424_v7 }
 0x4bb   : > { %4325 = vst.msk [vmem:[#allocation3 + $0x158] sm:$0xff] %vm4281_vm12, %v4176_v28  ;;  %v5204_v41 = vrot.slane %v8072_v56, 4 }
 0x4bc   : > { %4207 = vrot.lane.b32.xlu1 %v7968_v44, %s6012_s7 }
 0x4bd   : > { %v3428_v4 = vpop.permute.xlu0 %3427  ;;  %v5205_v28 = vadd.f32 %v5204_v41, %v8072_v56 }
 0x4be   : > { %v3410_v61 = vpop.permute.xlu1 %3409  ;;  %v4387_v34 = vld [vmem:[#allocation3 + $0x148] sm:$0xff]  ;;  %3566 = vst.msk [vmem:[#allocation3 + $0x1b0] sm:$0xff] %vm3511_vm10, %v3428_v4 }
 0x4bf   : > { %3557 = vst.msk [vmem:[#allocation3 + $0x168] sm:$0xff] %vm3511_vm10, %v3410_v61  ;;  %v4430_v33 = vpack.c.bf16 %v4387_v34, %v4386_v31 }
 0x4c0   : > { %3055 = vrot.lane.b32.xlu1 %v8009_v25, %s6009_s30 }
 0x4c1   : > { %5915 = vmatprep.mubr.msk.bf16.mxu1 %vm4478_vm13, %v4430_v33  ;;  %v3809_v6 = vpop.permute.xlu0 %3808 }
 0x4c2   : > { %v3414_v24 = vpop.permute.xlu1 %3413  ;;  %v4389_v38 = vld [vmem:[#allocation3 + $0x158] sm:$0xff]  ;;  %3949 = vst.msk [vmem:[#allocation3 + $0x1a0] sm:$0xff] %vm3896_vm11, %v3809_v6  ;;  %v5206_v6 = vrot.slane %v5205_v28, 2 }
 0x4c3   : > { %3559 = vst.msk [vmem:[#allocation3 + $0x178] sm:$0xff] %vm3511_vm10, %v3414_v24  ;;  %v4431_v44 = vpack.c.bf16 %v4389_v38, %v4388_v35 }
 0x4c4   : > { %3059 = vrot.lane.b32.xlu1 %v8021_v62, %s6009_s30  ;;  %v3254_v62 = vld [vmem:[#allocation2 + $0x4f0] sm:$0xff] }
 0x4c5   : > { %v5885_v60 = vpop.f32.mrf.mxu1  ;;  %5916 = vmatmul.mubr.msk.bf16.gmra.mxu1 %vm4478_vm13, %v4431_v44  ;;  %v3813_v11 = vpop.permute.xlu0 %3812 }
 0x4c6   : > { %v5672_v25 = vpack.c.bf16 %v5885_v60, %v5885_v60  ;;  %v3795_v19 = vpop.permute.xlu1 %3794  ;;  %3951 = vst.msk [vmem:[#allocation3 + $0x1b0] sm:$0xff] %vm3896_vm11, %v3813_v11  ;;  %v5213_v30 = vsel %vm908_vm0, %v5885_v60, 0.0 }
 0x4c7   : > { %3942 = vst.msk [vmem:[#allocation3 + $0x168] sm:$0xff] %vm3896_vm11, %v3795_v19  ;;  %v4645_v47 = vpop.f32.mrf.mxu1 }
 0x4c8   : > { %5135 = vst.msk [vmem:[%s8004_s24 + $0x28] sm:$0xf] %vm5124_vm14, %v5672_v25  ;;  %v5670_v52 = vpack.c.bf16 %v4645_v47, %v4645_v47  ;;  %3441 = vrot.lane.b32.xlu1 %v3252_v59, %s6010_s5  ;;  %v5210_v50 = vsel %vm908_vm0, %v4645_v47, 0.0  ;;  %v5207_v25 = vadd.f32 %v5206_v6, %v5205_v28 }
 0x4c9   : > { %v5886_v36 = vpop.f32.mrf.mxu1  ;;  %v4194_v8 = vpop.permute.xlu0 %4193 }
 0x4ca   : > { %5133 = vst.msk [vmem:[%s8004_s24 + $0x20] sm:$0xf] %vm5124_vm14, %v5670_v52  ;;  %v5673_v27 = vpack.c.bf16 %v5886_v36, %v5886_v36  ;;  %v3799_v16 = vpop.permute.xlu1 %3798  ;;  %v5215_v40 = vsel %vm908_vm0, %v5886_v36, 0.0  ;;  %v5208_v52 = vrot.slane %v5207_v25, 1 }
 0x4cb   : > { %3944 = vst.msk [vmem:[#allocation3 + $0x178] sm:$0xff] %vm3896_vm11, %v3799_v16  ;;  %v4648_v37 = vpop.f32.mrf.mxu1 }
 0x4cc   : > { %4334 = vst.msk [vmem:[#allocation3 + $0x1a0] sm:$0xff] %vm4281_vm12, %v4194_v8  ;;  %v5671_v63 = vpack.c.bf16 %v4648_v37, %v4648_v37  ;;  %v5211_v22 = vsel %vm908_vm0, %v4648_v37, 0.0  ;;  %3445 = vrot.lane.b32.xlu1 %v3254_v62, %s6010_s5  ;;  %v4394_v8 = vld [vmem:[#allocation3 + $0x180] sm:$0xff] }
 0x4cd   : > { %5136 = vst.msk [vmem:[%s8004_s24 + $0x2c] sm:$0xf] %vm5124_vm14, %v5673_v27  ;;  %v5212_v21 = vadd.f32 %v5211_v22, %v5210_v50  ;;  %v4198_v18 = vpop.permute.xlu0 %4197  ;;  %v5209_v50 = vadd.f32 %v5208_v52, %v5207_v25 }
 0x4ce   : > { %5134 = vst.msk [vmem:[%s8004_s24 + $0x24] sm:$0xf] %vm5124_vm14, %v5671_v63  ;;  %v4180_v42 = vpop.permute.xlu1 %4179 }
 0x4cf   : > { %v5214_v58 = vadd.f32 %v5213_v30, %v5212_v21  ;;  %4327 = vst.msk [vmem:[#allocation3 + $0x168] sm:$0xff] %vm4281_vm12, %v4180_v42  ;;  %4336 = vst.msk [vmem:[#allocation3 + $0x1b0] sm:$0xff] %vm4281_vm12, %v4198_v18 }
 0x4d0   : > { %3826 = vrot.lane.b32.xlu1 %v3637_v12, %s6011_s6  ;;  %v4396_v12 = vld [vmem:[#allocation3 + $0x190] sm:$0xff] }
 0x4d1   : > { %v5216_v49 = vadd.f32 %v5215_v40, %v5214_v58  ;;  %v3046_v26 = vpop.permute.xlu0 %3045 }
 0x4d2   : > { %v4184_v29 = vpop.permute.xlu1 %4183  ;;  %3182 = vst.msk [vmem:[#allocation3 + $0x1c0] sm:$0xff] %vm3125_vm8, %v3046_v26 }
 0x4d3   : > { %4329 = vst.msk [vmem:[#allocation3 + $0x178] sm:$0xff] %vm4281_vm12, %v4184_v29 }
 0x4d4   : > { %3830 = vrot.lane.b32.xlu1 %v3639_v3, %s6011_s6  ;;  %v5358_v3 = vmul.f32 0.015625, %v5209_v50 }
 0x4d5   : > { %v3050_v9 = vpop.permute.xlu0 %3049 }
 0x4d6   : > { %v3036_v13 = vpop.permute.xlu1 %3035  ;;  %v4391_v14 = vld [vmem:[#allocation3 + $0x168] sm:$0xff]  ;;  %3184 = vst.msk [vmem:[#allocation3 + $0x1d0] sm:$0xff] %vm3125_vm8, %v3050_v9  ;;  %v4400_v52 = vld [vmem:[#allocation3 + $0x1b0] sm:$0xff] }
 0x4d7   : > { %3177 = vst.msk [vmem:[#allocation3 + $0x198] sm:$0xff] %vm3125_vm8, %v3036_v13  ;;  %v4432_v43 = vpack.c.bf16 %v4391_v14, %v4390_v55 }
 0x4d8   : > { %4211 = vrot.lane.b32.xlu1 %v7976_v53, %s6012_s7 }
 0x4d9   : > { %5919 = vmatprep.mubr.msk.bf16.mxu1 %vm4478_vm13, %v4432_v43  ;;  %v3432_v46 = vpop.permute.xlu0 %3431 }
 0x4da   : > { %v3418_v32 = vpop.permute.xlu1 %3417  ;;  %v4393_v54 = vld [vmem:[#allocation3 + $0x178] sm:$0xff]  ;;  %3568 = vst.msk [vmem:[#allocation3 + $0x1c0] sm:$0xff] %vm3511_vm10, %v3432_v46 }
 0x4db   : > { %3561 = vst.msk [vmem:[#allocation3 + $0x188] sm:$0xff] %vm3511_vm10, %v3418_v32  ;;  %v4433_v57 = vpack.c.bf16 %v4393_v54, %v4392_v23 }
 0x4dc   : > { %4215 = vrot.lane.b32.xlu1 %v4024_v17, %s6012_s7 }
 0x4dd   : > { %v5889_v48 = vpop.f32.mrf.mxu1  ;;  %5920 = vmatmul.mubr.msk.bf16.gmra.mxu1 %vm4478_vm13, %v4433_v57  ;;  %v3436_v15 = vpop.permute.xlu0 %3435 }
 0x4de   : > { %v5676_v53 = vpack.c.bf16 %v5889_v48, %v5889_v48  ;;  %v3422_v45 = vpop.permute.xlu1 %3421  ;;  %3570 = vst.msk [vmem:[#allocation3 + $0x1d0] sm:$0xff] %vm3511_vm10, %v3436_v15  ;;  %v5221_v34 = vsel %vm908_vm0, %v5889_v48, 0.0 }
 0x4df   : > { %3563 = vst.msk [vmem:[#allocation3 + $0x198] sm:$0xff] %vm3511_vm10, %v3422_v45  ;;  %v4661_v5 = vpop.f32.mrf.mxu1 }
 0x4e0   : > { %5139 = vst.msk [vmem:[%s8004_s24 + $0x38] sm:$0xf] %vm5124_vm14, %v5676_v53  ;;  %v5674_v2 = vpack.c.bf16 %v4661_v5, %v4661_v5  ;;  %v5217_v20 = vsel %vm908_vm0, %v4661_v5, 0.0 }
 0x4e1   : > { %v5218_v1 = vadd.f32 %v5217_v20, %v5216_v49  ;;  %v5890_v39 = vpop.f32.mrf.mxu1  ;;  %v3817_v10 = vpop.permute.xlu0 %3816 }
 0x4e2   : > { %5137 = vst.msk [vmem:[%s8004_s24 + $0x30] sm:$0xf] %vm5124_vm14, %v5674_v2  ;;  %v5677_v51 = vpack.c.bf16 %v5890_v39, %v5890_v39  ;;  %v3803_v0 = vpop.permute.xlu1 %3802  ;;  %v5223_v56 = vsel %vm908_vm0, %v5890_v39, 0.0 }
 0x4e3   : > { %3946 = vst.msk [vmem:[#allocation3 + $0x188] sm:$0xff] %vm3896_vm11, %v3803_v0  ;;  %3953 = vst.msk [vmem:[#allocation3 + $0x1c0] sm:$0xff] %vm3896_vm11, %v3817_v10  ;;  %v4664_v7 = vpop.f32.mrf.mxu1 }
 0x4e4   : > { %5140 = vst.msk [vmem:[%s8004_s24 + $0x3c] sm:$0xf] %vm5124_vm14, %v5677_v51  ;;  %v5675_v61 = vpack.c.bf16 %v4664_v7, %v4664_v7  ;;  %v5219_v4 = vsel %vm908_vm0, %v4664_v7, 0.0 }
 0x4e5   : > { %v5220_v31 = vadd.f32 %v5219_v4, %v5218_v1  ;;  %v3821_v24 = vpop.permute.xlu0 %3820 }
 0x4e6   : > { %5138 = vst.msk [vmem:[%s8004_s24 + $0x34] sm:$0xf] %vm5124_vm14, %v5675_v61  ;;  %v3807_v33 = vpop.permute.xlu1 %3806 }
 0x4e7   : > { %v5222_v35 = vadd.f32 %v5221_v34, %v5220_v31  ;;  %3948 = vst.msk [vmem:[#allocation3 + $0x198] sm:$0xff] %vm3896_vm11, %v3807_v33  ;;  %3955 = vst.msk [vmem:[#allocation3 + $0x1d0] sm:$0xff] %vm3896_vm11, %v3821_v24 }
 0x4e9   : > { %v5224_v38 = vadd.f32 %v5223_v56, %v5222_v35  ;;  %v4202_v60 = vpop.permute.xlu0 %4201  ;;  %v4398_v56 = vld [vmem:[#allocation3 + $0x1a0] sm:$0xff] }
 0x4ea   : > { %v4188_v44 = vpop.permute.xlu1 %4187  ;;  %4338 = vst.msk [vmem:[#allocation3 + $0x1c0] sm:$0xff] %vm4281_vm12, %v4202_v60 }
 0x4eb   : > { %v5225_v19 = vrot.slane %v5224_v38, 4  ;;  %4331 = vst.msk [vmem:[#allocation3 + $0x188] sm:$0xff] %vm4281_vm12, %v4188_v44 }
 0x4ed   : > { %v5226_v11 = vadd.f32 %v5225_v19, %v5224_v38  ;;  %v4206_v59 = vpop.permute.xlu0 %4205 }
 0x4ee   : > { %v4192_v47 = vpop.permute.xlu1 %4191  ;;  %4340 = vst.msk [vmem:[#allocation3 + $0x1d0] sm:$0xff] %vm4281_vm12, %v4206_v59 }
 0x4ef   : > { %v5227_v36 = vrot.slane %v5226_v11, 2  ;;  %4333 = vst.msk [vmem:[#allocation3 + $0x198] sm:$0xff] %vm4281_vm12, %v4192_v47 }
 0x4f1   : > { %v5228_v62 = vadd.f32 %v5227_v36, %v5226_v11  ;;  %v3054_v16 = vpop.permute.xlu0 %3053 }
 0x4f2   : > { %v3040_v27 = vpop.permute.xlu1 %3039  ;;  %v4395_v37 = vld [vmem:[#allocation3 + $0x188] sm:$0xff]  ;;  %3186 = vst.msk [vmem:[#allocation3 + $0x1e0] sm:$0xff] %vm3125_vm8, %v3054_v16 }
 0x4f3   : > { %v5229_v63 = vrot.slane %v5228_v62, 1  ;;  %3179 = vst.msk [vmem:[#allocation3 + $0x1a8] sm:$0xff] %vm3125_vm8, %v3040_v27  ;;  %v4434_v22 = vpack.c.bf16 %v4395_v37, %v4394_v8 }
 0x4f5   : > { %v5230_v21 = vadd.f32 %v5229_v63, %v5228_v62  ;;  %v5893_v30 = vpop.f32.mrf.mxu1  ;;  %5923 = vmatprep.mubr.msk.bf16.mxu1 %vm4478_vm13, %v4434_v22  ;;  %v3058_v58 = vpop.permute.xlu0 %3057 }
 0x4f6   : > { %v5680_v42 = vpack.c.bf16 %v5893_v30, %v5893_v30  ;;  %v3044_v18 = vpop.permute.xlu1 %3043  ;;  %v4397_v40 = vld [vmem:[#allocation3 + $0x198] sm:$0xff]  ;;  %3188 = vst.msk [vmem:[#allocation3 + $0x1f0] sm:$0xff] %vm3125_vm8, %v3058_v58  ;;  %v5234_v48 = vsel %vm908_vm0, %v5893_v30, 0.0 }
 0x4f7   : > { %v5359_v49 = vmul.f32 0.015625, %v5230_v21  ;;  %3181 = vst.msk [vmem:[#allocation3 + $0x1b8] sm:$0xff] %vm3125_vm8, %v3044_v18  ;;  %v4677_v29 = vpop.f32.mrf.mxu1  ;;  %v4435_v26 = vpack.c.bf16 %v4397_v40, %v4396_v12 }
 0x4f8   : > { %5143 = vst.msk [vmem:[%s8004_s24 + $0x48] sm:$0xf] %vm5124_vm14, %v5680_v42  ;;  %v5678_v13 = vpack.c.bf16 %v4677_v29, %v4677_v29  ;;  %v5231_v46 = vsel %vm908_vm0, %v4677_v29, 0.0 }
 0x4f9   : > { %v8152_v9 = vsel %vm5374_vm15, %v5359_v49, %v5358_v3  ;;  %v5894_v55 = vpop.f32.mrf.mxu1  ;;  %5924 = vmatmul.mubr.msk.bf16.gmra.mxu1 %vm4478_vm13, %v4435_v26  ;;  %v3440_v17 = vpop.permute.xlu0 %3439 }
 0x4fa   : > { %5141 = vst.msk [vmem:[%s8004_s24 + $0x40] sm:$0xf] %vm5124_vm14, %v5678_v13  ;;  %v5681_v14 = vpack.c.bf16 %v5894_v55, %v5894_v55  ;;  %v3426_v43 = vpop.permute.xlu1 %3425  ;;  %v5236_v41 = vsel %vm908_vm0, %v5894_v55, 0.0 }
 0x4fb   : > { %3565 = vst.msk [vmem:[#allocation3 + $0x1a8] sm:$0xff] %vm3511_vm10, %v3426_v43  ;;  %3572 = vst.msk [vmem:[#allocation3 + $0x1e0] sm:$0xff] %vm3511_vm10, %v3440_v17  ;;  %v4680_v32 = vpop.f32.mrf.mxu1 }
 0x4fc   : > { %5144 = vst.msk [vmem:[%s8004_s24 + $0x4c] sm:$0xf] %vm5124_vm14, %v5681_v14  ;;  %v5679_v23 = vpack.c.bf16 %v4680_v32, %v4680_v32  ;;  %v5232_v54 = vsel %vm908_vm0, %v4680_v32, 0.0 }
 0x4fd   : > { %v5233_v57 = vadd.f32 %v5232_v54, %v5231_v46  ;;  %v3444_v45 = vpop.permute.xlu0 %3443 }
 0x4fe   : > { %5142 = vst.msk [vmem:[%s8004_s24 + $0x44] sm:$0xf] %vm5124_vm14, %v5679_v23  ;;  %v3430_v53 = vpop.permute.xlu1 %3429 }
 0x4ff   : > { %v5235_v15 = vadd.f32 %v5234_v48, %v5233_v57  ;;  %3567 = vst.msk [vmem:[#allocation3 + $0x1b8] sm:$0xff] %vm3511_vm10, %v3430_v53  ;;  %3574 = vst.msk [vmem:[#allocation3 + $0x1f0] sm:$0xff] %vm3511_vm10, %v3444_v45 }
 0x501   : > { %v5237_v5 = vadd.f32 %v5236_v41, %v5235_v15  ;;  %v3825_v20 = vpop.permute.xlu0 %3824  ;;  %v4402_v41 = vld [vmem:[#allocation3 + $0x1c0] sm:$0xff] }
 0x502   : > { %v3811_v2 = vpop.permute.xlu1 %3810  ;;  %3957 = vst.msk [vmem:[#allocation3 + $0x1e0] sm:$0xff] %vm3896_vm11, %v3825_v20 }
 0x503   : > { %3950 = vst.msk [vmem:[#allocation3 + $0x1a8] sm:$0xff] %vm3896_vm11, %v3811_v2 }
 0x505   : > { %v3829_v39 = vpop.permute.xlu0 %3828 }
 0x506   : > { %v3815_v1 = vpop.permute.xlu1 %3814  ;;  %3959 = vst.msk [vmem:[#allocation3 + $0x1f0] sm:$0xff] %vm3896_vm11, %v3829_v39 }
 0x507   : > { %3952 = vst.msk [vmem:[#allocation3 + $0x1b8] sm:$0xff] %vm3896_vm11, %v3815_v1  ;;  %v4404_v1 = vld [vmem:[#allocation3 + $0x1d0] sm:$0xff] }
 0x509   : > { %v4210_v0 = vpop.permute.xlu0 %4209 }
 0x50a   : > { %v4196_v51 = vpop.permute.xlu1 %4195  ;;  %4342 = vst.msk [vmem:[#allocation3 + $0x1e0] sm:$0xff] %vm4281_vm12, %v4210_v0 }
 0x50b   : > { %4335 = vst.msk [vmem:[#allocation3 + $0x1a8] sm:$0xff] %vm4281_vm12, %v4196_v51 }
 0x50d   : > { %v5897_v10 = vpop.f32.mrf.mxu1  ;;  %v4214_v61 = vpop.permute.xlu0 %4213 }
 0x50e   : > { %v5684_v28 = vpack.c.bf16 %v5897_v10, %v5897_v10  ;;  %v4200_v7 = vpop.permute.xlu1 %4199  ;;  %4344 = vst.msk [vmem:[#allocation3 + $0x1f0] sm:$0xff] %vm4281_vm12, %v4214_v61  ;;  %v5242_v47 = vsel %vm908_vm0, %v5897_v10, 0.0 }
 0x50f   : > { %4337 = vst.msk [vmem:[#allocation3 + $0x1b8] sm:$0xff] %vm4281_vm12, %v4200_v7  ;;  %v4693_v4 = vpop.f32.mrf.mxu1 }
 0x510   : > { %5147 = vst.msk [vmem:[%s8004_s24 + $0x58] sm:$0xf] %vm5124_vm14, %v5684_v28  ;;  %v5682_v31 = vpack.c.bf16 %v4693_v4, %v4693_v4  ;;  %v5238_v34 = vsel %vm908_vm0, %v4693_v4, 0.0 }
 0x511   : > { %v5239_v33 = vadd.f32 %v5238_v34, %v5237_v5  ;;  %v5898_v24 = vpop.f32.mrf.mxu1 }
 0x512   : > { %5145 = vst.msk [vmem:[%s8004_s24 + $0x50] sm:$0xf] %vm5124_vm14, %v5682_v31  ;;  %v5685_v6 = vpack.c.bf16 %v5898_v24, %v5898_v24  ;;  %v3048_v35 = vpop.permute.xlu1 %3047  ;;  %v4399_v38 = vld [vmem:[#allocation3 + $0x1a8] sm:$0xff]  ;;  %v5244_v16 = vsel %vm908_vm0, %v5898_v24, 0.0 }
 0x513   : > { %3183 = vst.msk [vmem:[#allocation3 + $0x1c8] sm:$0xff] %vm3125_vm8, %v3048_v35  ;;  %v4696_v44 = vpop.f32.mrf.mxu1  ;;  %v4436_v60 = vpack.c.bf16 %v4399_v38, %v4398_v56 }
 0x514   : > { %5148 = vst.msk [vmem:[%s8004_s24 + $0x5c] sm:$0xf] %vm5124_vm14, %v5685_v6  ;;  %v5683_v25 = vpack.c.bf16 %v4696_v44, %v4696_v44  ;;  %v5240_v19 = vsel %vm908_vm0, %v4696_v44, 0.0 }
 0x515   : > { %v5241_v11 = vadd.f32 %v5240_v19, %v5239_v33  ;;  %5927 = vmatprep.mubr.msk.bf16.mxu1 %vm4478_vm13, %v4436_v60 }
 0x516   : > { %5146 = vst.msk [vmem:[%s8004_s24 + $0x54] sm:$0xf] %vm5124_vm14, %v5683_v25  ;;  %v3052_v59 = vpop.permute.xlu1 %3051  ;;  %v4401_v36 = vld [vmem:[#allocation3 + $0x1b8] sm:$0xff] }
 0x517   : > { %v5243_v62 = vadd.f32 %v5242_v47, %v5241_v11  ;;  %3185 = vst.msk [vmem:[#allocation3 + $0x1d8] sm:$0xff] %vm3125_vm8, %v3052_v59  ;;  %v4437_v27 = vpack.c.bf16 %v4401_v36, %v4400_v52 }
 0x519   : > { %v5245_v8 = vadd.f32 %v5244_v16, %v5243_v62  ;;  %5928 = vmatmul.mubr.msk.bf16.gmra.mxu1 %vm4478_vm13, %v4437_v27 }
 0x51a   : > { %v3434_v37 = vpop.permute.xlu1 %3433 }
 0x51b   : > { %v5246_v50 = vrot.slane %v5245_v8, 4  ;;  %3569 = vst.msk [vmem:[#allocation3 + $0x1c8] sm:$0xff] %vm3511_vm10, %v3434_v37 }
 0x51d   : > { %v5247_v63 = vadd.f32 %v5246_v50, %v5245_v8  ;;  %v4406_v8 = vld [vmem:[#allocation3 + $0x1e0] sm:$0xff] }
 0x51e   : > { %v3438_v22 = vpop.permute.xlu1 %3437 }
 0x51f   : > { %v5248_v21 = vrot.slane %v5247_v63, 2  ;;  %3571 = vst.msk [vmem:[#allocation3 + $0x1d8] sm:$0xff] %vm3511_vm10, %v3438_v22 }
 0x521   : > { %v5249_v30 = vadd.f32 %v5248_v21, %v5247_v63 }
 0x522   : > { %v3819_v42 = vpop.permute.xlu1 %3818 }
 0x523   : > { %v5250_v18 = vrot.slane %v5249_v30, 1  ;;  %3954 = vst.msk [vmem:[#allocation3 + $0x1c8] sm:$0xff] %vm3896_vm11, %v3819_v42  ;;  %v4408_v42 = vld [vmem:[#allocation3 + $0x1f0] sm:$0xff] }
 0x525   : > { %v5251_v58 = vadd.f32 %v5250_v18, %v5249_v30  ;;  %v5901_v12 = vpop.f32.mrf.mxu1 }
 0x526   : > { %v5688_v40 = vpack.c.bf16 %v5901_v12, %v5901_v12  ;;  %v3823_v3 = vpop.permute.xlu1 %3822  ;;  %v5255_v57 = vsel %vm908_vm0, %v5901_v12, 0.0 }
 0x527   : > { %v5360_v49 = vmul.f32 0.015625, %v5251_v58  ;;  %3956 = vst.msk [vmem:[#allocation3 + $0x1d8] sm:$0xff] %vm3896_vm11, %v3823_v3  ;;  %v4709_v29 = vpop.f32.mrf.mxu1 }
 0x528   : > { %5151 = vst.msk [vmem:[%s8004_s24 + $0x68] sm:$0xf] %vm5124_vm14, %v5688_v40  ;;  %v5686_v26 = vpack.c.bf16 %v4709_v29, %v4709_v29  ;;  %v5252_v32 = vsel %vm908_vm0, %v4709_v29, 0.0 }
 0x529   : > { %v8200_v13 = vsel %vm5376_vm1, %v5360_v49, %v8152_v9  ;;  %v5902_v55 = vpop.f32.mrf.mxu1 }
 0x52a   : > { %5149 = vst.msk [vmem:[%s8004_s24 + $0x60] sm:$0xf] %vm5124_vm14, %v5686_v26  ;;  %v5689_v14 = vpack.c.bf16 %v5902_v55, %v5902_v55  ;;  %v4204_v43 = vpop.permute.xlu1 %4203  ;;  %v5257_v53 = vsel %vm908_vm0, %v5902_v55, 0.0 }
 0x52b   : > { %4339 = vst.msk [vmem:[#allocation3 + $0x1c8] sm:$0xff] %vm4281_vm12, %v4204_v43  ;;  %v4712_v17 = vpop.f32.mrf.mxu1 }
 0x52c   : > { %5152 = vst.msk [vmem:[%s8004_s24 + $0x6c] sm:$0xf] %vm5124_vm14, %v5689_v14  ;;  %v5687_v46 = vpack.c.bf16 %v4712_v17, %v4712_v17  ;;  %v5253_v23 = vsel %vm908_vm0, %v4712_v17, 0.0 }
 0x52d   : > { %v5254_v54 = vadd.f32 %v5253_v23, %v5252_v32 }
 0x52e   : > { %5150 = vst.msk [vmem:[%s8004_s24 + $0x64] sm:$0xf] %vm5124_vm14, %v5687_v46  ;;  %v4208_v9 = vpop.permute.xlu1 %4207 }
 0x52f   : > { %v5256_v48 = vadd.f32 %v5255_v57, %v5254_v54  ;;  %4341 = vst.msk [vmem:[#allocation3 + $0x1d8] sm:$0xff] %vm4281_vm12, %v4208_v9 }
 0x531   : > { %v5258_v45 = vadd.f32 %v5257_v53, %v5256_v48 }
 0x532   : > { %v3056_v15 = vpop.permute.xlu1 %3055  ;;  %v4403_v5 = vld [vmem:[#allocation3 + $0x1c8] sm:$0xff] }
 0x533   : > { %3187 = vst.msk [vmem:[#allocation3 + $0x1e8] sm:$0xff] %vm3125_vm8, %v3056_v15  ;;  %v4438_v2 = vpack.c.bf16 %v4403_v5, %v4402_v41 }
 0x535   : > { %5931 = vmatprep.mubr.msk.bf16.mxu1 %vm4478_vm13, %v4438_v2 }
 0x536   : > { %v3060_v20 = vpop.permute.xlu1 %3059  ;;  %v4405_v39 = vld [vmem:[#allocation3 + $0x1d8] sm:$0xff] }
 0x537   : > { %3189 = vst.msk [vmem:[#allocation3 + $0x1f8] sm:$0xff] %vm3125_vm8, %v3060_v20  ;;  %v4439_v51 = vpack.c.bf16 %v4405_v39, %v4404_v1 }
 0x539   : > { %5932 = vmatmul.mubr.msk.bf16.gmra.mxu1 %vm4478_vm13, %v4439_v51 }
 0x53a   : > { %v3442_v0 = vpop.permute.xlu1 %3441 }
 0x53b   : > { %3573 = vst.msk [vmem:[#allocation3 + $0x1e8] sm:$0xff] %vm3511_vm10, %v3442_v0 }
 0x53d   : > { %v5905_v10 = vpop.f32.mrf.mxu1 }
 0x53e   : > { %v5692_v28 = vpack.c.bf16 %v5905_v10, %v5905_v10  ;;  %v3446_v7 = vpop.permute.xlu1 %3445  ;;  %v5263_v60 = vsel %vm908_vm0, %v5905_v10, 0.0 }
 0x53f   : > { %3575 = vst.msk [vmem:[#allocation3 + $0x1f8] sm:$0xff] %vm3511_vm10, %v3446_v7  ;;  %v4725_v61 = vpop.f32.mrf.mxu1 }
 0x540   : > { %5155 = vst.msk [vmem:[%s8004_s24 + $0x78] sm:$0xf] %vm5124_vm14, %v5692_v28  ;;  %v5690_v4 = vpack.c.bf16 %v4725_v61, %v4725_v61  ;;  %v5259_v31 = vsel %vm908_vm0, %v4725_v61, 0.0 }
 0x541   : > { %v5260_v34 = vadd.f32 %v5259_v31, %v5258_v45  ;;  %v5906_v33 = vpop.f32.mrf.mxu1 }
 0x542   : > { %5153 = vst.msk [vmem:[%s8004_s24 + $0x70] sm:$0xf] %vm5124_vm14, %v5690_v4  ;;  %v5693_v24 = vpack.c.bf16 %v5906_v33, %v5906_v33  ;;  %v3827_v6 = vpop.permute.xlu1 %3826  ;;  %v5265_v11 = vsel %vm908_vm0, %v5906_v33, 0.0 }
 0x543   : > { %3958 = vst.msk [vmem:[#allocation3 + $0x1e8] sm:$0xff] %vm3896_vm11, %v3827_v6  ;;  %v4728_v35 = vpop.f32.mrf.mxu1 }
 0x544   : > { %5156 = vst.msk [vmem:[%s8004_s24 + $0x7c] sm:$0xf] %vm5124_vm14, %v5693_v24  ;;  %v5691_v56 = vpack.c.bf16 %v4728_v35, %v4728_v35  ;;  %v5261_v38 = vsel %vm908_vm0, %v4728_v35, 0.0 }
 0x545   : > { %v5262_v44 = vadd.f32 %v5261_v38, %v5260_v34 }
 0x546   : > { %5154 = vst.msk [vmem:[%s8004_s24 + $0x74] sm:$0xf] %vm5124_vm14, %v5691_v56  ;;  %v3831_v25 = vpop.permute.xlu1 %3830 }
 0x547   : > { %v5264_v19 = vadd.f32 %v5263_v60, %v5262_v44  ;;  %3960 = vst.msk [vmem:[#allocation3 + $0x1f8] sm:$0xff] %vm3896_vm11, %v3831_v25 }
 0x549   : > { %v5266_v47 = vadd.f32 %v5265_v11, %v5264_v19 }
 0x54a   : > { %v4212_v59 = vpop.permute.xlu1 %4211 }
 0x54b   : > { %v5267_v52 = vrot.slane %v5266_v47, 4  ;;  %4343 = vst.msk [vmem:[#allocation3 + $0x1e8] sm:$0xff] %vm4281_vm12, %v4212_v59 }
 0x54d   : > { %v5268_v36 = vadd.f32 %v5267_v52, %v5266_v47 }
 0x54e   : > { %v4216_v62 = vpop.permute.xlu1 %4215 }
 0x54f   : > { %v5269_v27 = vrot.slane %v5268_v36, 2  ;;  %4345 = vst.msk [vmem:[#allocation3 + $0x1f8] sm:$0xff] %vm4281_vm12, %v4216_v62 }
 0x551   : > { %v5270_v16 = vadd.f32 %v5269_v27, %v5268_v36 }
 0x552   : > { %v4407_v37 = vld [vmem:[#allocation3 + $0x1e8] sm:$0xff] }
 0x553   : > { %v5271_v50 = vrot.slane %v5270_v16, 1  ;;  %v4440_v63 = vpack.c.bf16 %v4407_v37, %v4406_v8 }
 0x555   : > { %v5272_v22 = vadd.f32 %v5271_v50, %v5270_v16  ;;  %v5909_v21 = vpop.f32.mrf.mxu1  ;;  %5935 = vmatprep.mubr.msk.bf16.mxu1 %vm4478_vm13, %v4440_v63 }
 0x556   : > { %v5696_v30 = vpack.c.bf16 %v5909_v21, %v5909_v21  ;;  %v4409_v18 = vld [vmem:[#allocation3 + $0x1f8] sm:$0xff]  ;;  %v5276_v46 = vsel %vm908_vm0, %v5909_v21, 0.0 }
 0x557   : > { %v5361_v58 = vmul.f32 0.015625, %v5272_v22  ;;  %v4741_v12 = vpop.f32.mrf.mxu1  ;;  %v4441_v40 = vpack.c.bf16 %v4409_v18, %v4408_v42 }
 0x558   : > { %5159 = vst.msk [vmem:[%s8004_s24 + $0x88] sm:$0xf] %vm5124_vm14, %v5696_v30  ;;  %v5694_v3 = vpack.c.bf16 %v4741_v12, %v4741_v12  ;;  %v5273_v14 = vsel %vm908_vm0, %v4741_v12, 0.0 }
 0x559   : > { %v5379_v49 = vsel %vm5378_vm2, %v5361_v58, %v8200_v13  ;;  %v5910_v29 = vpop.f32.mrf.mxu1  ;;  %5936 = vmatmul.mubr.msk.bf16.gmra.mxu1 %vm4478_vm13, %v4441_v40 }
 0x55a   : > { %5157 = vst.msk [vmem:[%s8004_s24 + $0x80] sm:$0xf] %vm5124_vm14, %v5694_v3  ;;  %v5697_v26 = vpack.c.bf16 %v5910_v29, %v5910_v29  ;;  %v5278_v23 = vsel %vm908_vm0, %v5910_v29, 0.0 }
 0x55b   : > { %v4744_v55 = vpop.f32.mrf.mxu1 }
 0x55c   : > { %5160 = vst.msk [vmem:[%s8004_s24 + $0x8c] sm:$0xf] %vm5124_vm14, %v5697_v26  ;;  %v5695_v43 = vpack.c.bf16 %v4744_v55, %v4744_v55  ;;  %v5274_v17 = vsel %vm908_vm0, %v4744_v55, 0.0 }
 0x55d   : > { %v5275_v32 = vadd.f32 %v5274_v17, %v5273_v14 }
 0x55e   : > { %5158 = vst.msk [vmem:[%s8004_s24 + $0x84] sm:$0xf] %vm5124_vm14, %v5695_v43 }
 0x55f   : > { %v5277_v13 = vadd.f32 %v5276_v46, %v5275_v32 }
 0x561   : > { %v5279_v54 = vadd.f32 %v5278_v23, %v5277_v13 }
 0x56d   : > { %v5913_v57 = vpop.f32.mrf.mxu1 }
 0x56e   : > { %v5700_v9 = vpack.c.bf16 %v5913_v57, %v5913_v57  ;;  %v5284_v51 = vsel %vm908_vm0, %v5913_v57, 0.0 }
 0x56f   : > { %v4757_v48 = vpop.f32.mrf.mxu1 }
 0x570   : > { %5163 = vst.msk [vmem:[%s8004_s24 + $0x98] sm:$0xf] %vm5124_vm14, %v5700_v9  ;;  %v5698_v53 = vpack.c.bf16 %v4757_v48, %v4757_v48  ;;  %v5280_v45 = vsel %vm908_vm0, %v4757_v48, 0.0 }
 0x571   : > { %v5281_v15 = vadd.f32 %v5280_v45, %v5279_v54  ;;  %v5914_v41 = vpop.f32.mrf.mxu1 }
 0x572   : > { %5161 = vst.msk [vmem:[%s8004_s24 + $0x90] sm:$0xf] %vm5124_vm14, %v5698_v53  ;;  %v5701_v5 = vpack.c.bf16 %v5914_v41, %v5914_v41  ;;  %v5286_v10 = vsel %vm908_vm0, %v5914_v41, 0.0 }
 0x573   : > { %v4760_v2 = vpop.f32.mrf.mxu1 }
 0x574   : > { %5164 = vst.msk [vmem:[%s8004_s24 + $0x9c] sm:$0xf] %vm5124_vm14, %v5701_v5  ;;  %v5699_v20 = vpack.c.bf16 %v4760_v2, %v4760_v2  ;;  %v5282_v1 = vsel %vm908_vm0, %v4760_v2, 0.0 }
 0x575   : > { %v5283_v39 = vadd.f32 %v5282_v1, %v5281_v15 }
 0x576   : > { %5162 = vst.msk [vmem:[%s8004_s24 + $0x94] sm:$0xf] %vm5124_vm14, %v5699_v20 }
 0x577   : > { %v5285_v0 = vadd.f32 %v5284_v51, %v5283_v39 }
 0x579   : > { %v5287_v28 = vadd.f32 %v5286_v10, %v5285_v0 }
 0x57b   : > { %v5288_v7 = vrot.slane %v5287_v28, 4 }
 0x57d   : > { %v5289_v61 = vadd.f32 %v5288_v7, %v5287_v28 }
 0x57f   : > { %v5290_v4 = vrot.slane %v5289_v61, 2 }
 0x581   : > { %v5291_v31 = vadd.f32 %v5290_v4, %v5289_v61 }
 0x583   : > { %v5292_v34 = vrot.slane %v5291_v31, 1 }
 0x585   : > { %v5293_v33 = vadd.f32 %v5292_v34, %v5291_v31  ;;  %v5917_v24 = vpop.f32.mrf.mxu1 }
 0x586   : > { %v5704_v6 = vpack.c.bf16 %v5917_v24, %v5917_v24  ;;  %v5297_v36 = vsel %vm908_vm0, %v5917_v24, 0.0 }
 0x587   : > { %v5362_v35 = vmul.f32 0.015625, %v5293_v33  ;;  %v4773_v56 = vpop.f32.mrf.mxu1 }
 0x588   : > { %5167 = vst.msk [vmem:[%s8004_s24 + $0xa8] sm:$0xf] %vm5124_vm14, %v5704_v6  ;;  %v5702_v38 = vpack.c.bf16 %v4773_v56, %v4773_v56  ;;  %v5294_v11 = vsel %vm908_vm0, %v4773_v56, 0.0 }
 0x589   : > { %v5381_v44 = vsel %vm5380_vm3, %v5362_v35, %v5379_v49  ;;  %v5918_v60 = vpop.f32.mrf.mxu1 }
 0x58a   : > { %5165 = vst.msk [vmem:[%s8004_s24 + $0xa0] sm:$0xf] %vm5124_vm14, %v5702_v38  ;;  %v5705_v25 = vpack.c.bf16 %v5918_v60, %v5918_v60  ;;  %v5299_v27 = vsel %vm908_vm0, %v5918_v60, 0.0 }
 0x58b   : > { %v4776_v19 = vpop.f32.mrf.mxu1 }
 0x58c   : > { %5168 = vst.msk [vmem:[%s8004_s24 + $0xac] sm:$0xf] %vm5124_vm14, %v5705_v25  ;;  %v5703_v47 = vpack.c.bf16 %v4776_v19, %v4776_v19  ;;  %v5295_v59 = vsel %vm908_vm0, %v4776_v19, 0.0 }
 0x58d   : > { %v5296_v52 = vadd.f32 %v5295_v59, %v5294_v11 }
 0x58e   : > { %5166 = vst.msk [vmem:[%s8004_s24 + $0xa4] sm:$0xf] %vm5124_vm14, %v5703_v47 }
 0x58f   : > { %v5298_v62 = vadd.f32 %v5297_v36, %v5296_v52 }
 0x591   : > { %v5300_v16 = vadd.f32 %v5299_v27, %v5298_v62 }
 0x59d   : > { %v5921_v8 = vpop.f32.mrf.mxu1 }
 0x59e   : > { %v5708_v37 = vpack.c.bf16 %v5921_v8, %v5921_v8  ;;  %v5305_v3 = vsel %vm908_vm0, %v5921_v8, 0.0 }
 0x59f   : > { %v4789_v50 = vpop.f32.mrf.mxu1 }
 0x5a0   : > { %5171 = vst.msk [vmem:[%s8004_s24 + $0xb8] sm:$0xf] %vm5124_vm14, %v5708_v37  ;;  %v5706_v63 = vpack.c.bf16 %v4789_v50, %v4789_v50  ;;  %v5301_v22 = vsel %vm908_vm0, %v4789_v50, 0.0 }
 0x5a1   : > { %v5302_v21 = vadd.f32 %v5301_v22, %v5300_v16  ;;  %v5922_v30 = vpop.f32.mrf.mxu1 }
 0x5a2   : > { %5169 = vst.msk [vmem:[%s8004_s24 + $0xb0] sm:$0xf] %vm5124_vm14, %v5706_v63  ;;  %v5709_v42 = vpack.c.bf16 %v5922_v30, %v5922_v30  ;;  %v5307_v29 = vsel %vm908_vm0, %v5922_v30, 0.0 }
 0x5a3   : > { %v4792_v18 = vpop.f32.mrf.mxu1 }
 0x5a4   : > { %5172 = vst.msk [vmem:[%s8004_s24 + $0xbc] sm:$0xf] %vm5124_vm14, %v5709_v42  ;;  %v5707_v58 = vpack.c.bf16 %v4792_v18, %v4792_v18  ;;  %v5303_v12 = vsel %vm908_vm0, %v4792_v18, 0.0 }
 0x5a5   : > { %v5304_v40 = vadd.f32 %v5303_v12, %v5302_v21 }
 0x5a6   : > { %5170 = vst.msk [vmem:[%s8004_s24 + $0xb4] sm:$0xf] %vm5124_vm14, %v5707_v58 }
 0x5a7   : > { %v5306_v49 = vadd.f32 %v5305_v3, %v5304_v40 }
 0x5a9   : > { %v5308_v26 = vadd.f32 %v5307_v29, %v5306_v49 }
 0x5ab   : > { %v5309_v55 = vrot.slane %v5308_v26, 4 }
 0x5ad   : > { %v5310_v14 = vadd.f32 %v5309_v55, %v5308_v26 }
 0x5af   : > { %v5311_v43 = vrot.slane %v5310_v14, 2 }
 0x5b1   : > { %v5312_v17 = vadd.f32 %v5311_v43, %v5310_v14 }
 0x5b3   : > { %v5313_v32 = vrot.slane %v5312_v17, 1 }
 0x5b5   : > { %v5314_v46 = vadd.f32 %v5313_v32, %v5312_v17 }
 0x5b7   : > { %v5363_v13 = vmul.f32 0.015625, %v5314_v46 }
 0x5b9   : > { %v5383_v23 = vsel %vm5382_vm4, %v5363_v13, %v5381_v44  ;;  %v5925_v54 = vpop.f32.mrf.mxu1 }
 0x5ba   : > { %v5712_v57 = vpack.c.bf16 %v5925_v54, %v5925_v54  ;;  %v5318_v1 = vsel %vm908_vm0, %v5925_v54, 0.0 }
 0x5bb   : > { %v4805_v9 = vpop.f32.mrf.mxu1 }
 0x5bc   : > { %5175 = vst.msk [vmem:[%s8004_s24 + $0xc8] sm:$0xf] %vm5124_vm14, %v5712_v57  ;;  %v5710_v48 = vpack.c.bf16 %v4805_v9, %v4805_v9  ;;  %v5315_v41 = vsel %vm908_vm0, %v4805_v9, 0.0 }
 0x5bd   : > { %v5926_v53 = vpop.f32.mrf.mxu1 }
 0x5be   : > { %5173 = vst.msk [vmem:[%s8004_s24 + $0xc0] sm:$0xf] %vm5124_vm14, %v5710_v48  ;;  %v5713_v45 = vpack.c.bf16 %v5926_v53, %v5926_v53  ;;  %v5320_v51 = vsel %vm908_vm0, %v5926_v53, 0.0 }
 0x5bf   : > { %v4808_v15 = vpop.f32.mrf.mxu1 }
 0x5c0   : > { %5176 = vst.msk [vmem:[%s8004_s24 + $0xcc] sm:$0xf] %vm5124_vm14, %v5713_v45  ;;  %v5711_v5 = vpack.c.bf16 %v4808_v15, %v4808_v15  ;;  %v5316_v2 = vsel %vm908_vm0, %v4808_v15, 0.0 }
 0x5c1   : > { %v5317_v20 = vadd.f32 %v5316_v2, %v5315_v41 }
 0x5c2   : > { %5174 = vst.msk [vmem:[%s8004_s24 + $0xc4] sm:$0xf] %vm5124_vm14, %v5711_v5 }
 0x5c3   : > { %v5319_v39 = vadd.f32 %v5318_v1, %v5317_v20 }
 0x5c5   : > { %v5321_v0 = vadd.f32 %v5320_v51, %v5319_v39 }
 0x5d9   : > { %v5929_v10 = vpop.f32.mrf.mxu1 }
 0x5da   : > { %v5716_v28 = vpack.c.bf16 %v5929_v10, %v5929_v10  ;;  %v5326_v38 = vsel %vm908_vm0, %v5929_v10, 0.0 }
 0x5db   : > { %v4821_v7 = vpop.f32.mrf.mxu1 }
 0x5dc   : > { %5179 = vst.msk [vmem:[%s8004_s24 + $0xd8] sm:$0xf] %vm5124_vm14, %v5716_v28  ;;  %v5714_v61 = vpack.c.bf16 %v4821_v7, %v4821_v7  ;;  %v5322_v4 = vsel %vm908_vm0, %v4821_v7, 0.0 }
 0x5dd   : > { %v5323_v31 = vadd.f32 %v5322_v4, %v5321_v0  ;;  %v5930_v34 = vpop.f32.mrf.mxu1 }
 0x5de   : > { %5177 = vst.msk [vmem:[%s8004_s24 + $0xd0] sm:$0xf] %vm5124_vm14, %v5714_v61  ;;  %v5717_v33 = vpack.c.bf16 %v5930_v34, %v5930_v34  ;;  %v5328_v60 = vsel %vm908_vm0, %v5930_v34, 0.0 }
 0x5df   : > { %v4824_v24 = vpop.f32.mrf.mxu1 }
 0x5e0   : > { %5180 = vst.msk [vmem:[%s8004_s24 + $0xdc] sm:$0xf] %vm5124_vm14, %v5717_v33  ;;  %v5715_v6 = vpack.c.bf16 %v4824_v24, %v4824_v24  ;;  %v5324_v35 = vsel %vm908_vm0, %v4824_v24, 0.0 }
 0x5e1   : > { %v5325_v56 = vadd.f32 %v5324_v35, %v5323_v31 }
 0x5e2   : > { %5178 = vst.msk [vmem:[%s8004_s24 + $0xd4] sm:$0xf] %vm5124_vm14, %v5715_v6 }
 0x5e3   : > { %v5327_v44 = vadd.f32 %v5326_v38, %v5325_v56 }
 0x5e5   : > { %v5329_v25 = vadd.f32 %v5328_v60, %v5327_v44 }
 0x5e7   : > { %v5330_v19 = vrot.slane %v5329_v25, 4 }
 0x5e9   : > { %v5331_v11 = vadd.f32 %v5330_v19, %v5329_v25 }
 0x5eb   : > { %v5332_v47 = vrot.slane %v5331_v11, 2 }
 0x5ed   : > { %v5333_v59 = vadd.f32 %v5332_v47, %v5331_v11 }
 0x5ef   : > { %v5334_v52 = vrot.slane %v5333_v59, 1 }
 0x5f1   : > { %v5335_v36 = vadd.f32 %v5334_v52, %v5333_v59 }
 0x5f3   : > { %v5364_v62 = vmul.f32 0.015625, %v5335_v36 }
 0x5f5   : > { %v5385_v27 = vsel %vm5384_vm5, %v5364_v62, %v5383_v23 }
 0x5f9   : > { %v5933_v16 = vpop.f32.mrf.mxu1 }
 0x5fa   : > { %v5720_v8 = vpack.c.bf16 %v5933_v16, %v5933_v16  ;;  %v5339_v12 = vsel %vm908_vm0, %v5933_v16, 0.0 }
 0x5fb   : > { %v4837_v37 = vpop.f32.mrf.mxu1 }
 0x5fc   : > { %5183 = vst.msk [vmem:[%s8004_s24 + $0xe8] sm:$0xf] %vm5124_vm14, %v5720_v8  ;;  %v5718_v50 = vpack.c.bf16 %v4837_v37, %v4837_v37  ;;  %v5336_v18 = vsel %vm908_vm0, %v4837_v37, 0.0 }
 0x5fd   : > { %v5934_v63 = vpop.f32.mrf.mxu1 }
 0x5fe   : > { %5181 = vst.msk [vmem:[%s8004_s24 + $0xe0] sm:$0xf] %vm5124_vm14, %v5718_v50  ;;  %v5721_v22 = vpack.c.bf16 %v5934_v63, %v5934_v63  ;;  %v5341_v26 = vsel %vm908_vm0, %v5934_v63, 0.0 }
 0x5ff   : > { %v4840_v21 = vpop.f32.mrf.mxu1 }
 0x600   : > { %5184 = vst.msk [vmem:[%s8004_s24 + $0xec] sm:$0xf] %vm5124_vm14, %v5721_v22  ;;  %v5719_v30 = vpack.c.bf16 %v4840_v21, %v4840_v21  ;;  %v5337_v42 = vsel %vm908_vm0, %v4840_v21, 0.0 }
 0x601   : > { %v5338_v58 = vadd.f32 %v5337_v42, %v5336_v18 }
 0x602   : > { %5182 = vst.msk [vmem:[%s8004_s24 + $0xe4] sm:$0xf] %vm5124_vm14, %v5719_v30 }
 0x603   : > { %v5340_v40 = vadd.f32 %v5339_v12, %v5338_v58 }
 0x605   : > { %v5342_v43 = vadd.f32 %v5341_v26, %v5340_v40 }
 0x619   : > { %v5937_v3 = vpop.f32.mrf.mxu1 }
 0x61a   : > { %v5724_v49 = vpack.c.bf16 %v5937_v3, %v5937_v3  ;;  %v5347_v9 = vsel %vm908_vm0, %v5937_v3, 0.0 }
 0x61b   : > { %v4853_v29 = vpop.f32.mrf.mxu1 }
 0x61c   : > { %5187 = vst.msk [vmem:[%s8004_s24 + $0xf8] sm:$0xf] %vm5124_vm14, %v5724_v49  ;;  %v5722_v55 = vpack.c.bf16 %v4853_v29, %v4853_v29  ;;  %v5343_v14 = vsel %vm908_vm0, %v4853_v29, 0.0 }
 0x61d   : > { %v5938_v17 = vpop.f32.mrf.mxu1  ;;  %v5344_v46 = vadd.f32 %v5343_v14, %v5342_v43 }
 0x61e   : > { %5185 = vst.msk [vmem:[%s8004_s24 + $0xf0] sm:$0xf] %vm5124_vm14, %v5722_v55  ;;  %v5725_v32 = vpack.c.bf16 %v5938_v17, %v5938_v17  ;;  %v5349_v53 = vsel %vm908_vm0, %v5938_v17, 0.0 }
 0x61f   : > { %v4856_v13 = vpop.f32.mrf.mxu1 }
 0x620   : > { %5188 = vst.msk [vmem:[%s8004_s24 + $0xfc] sm:$0xf] %vm5124_vm14, %v5725_v32  ;;  %v5723_v23 = vpack.c.bf16 %v4856_v13, %v4856_v13  ;;  %v5345_v54 = vsel %vm908_vm0, %v4856_v13, 0.0 }
 0x621   : > { %v5346_v57 = vadd.f32 %v5345_v54, %v5344_v46 }
 0x622   : > { %5186 = vst.msk [vmem:[%s8004_s24 + $0xf4] sm:$0xf] %vm5124_vm14, %v5723_v23 }
 0x623   : > { %v5348_v48 = vadd.f32 %v5347_v9, %v5346_v57 }
 0x625   : > { %v5350_v45 = vadd.f32 %v5349_v53, %v5348_v48 }
 0x627   : > { %v5351_v15 = vrot.slane %v5350_v45, 4 }
 0x629   : > { %v5352_v41 = vadd.f32 %v5351_v15, %v5350_v45 }
 0x62b   : > { %v5353_v5 = vrot.slane %v5352_v41, 2 }
 0x62d   : > { %v5354_v2 = vadd.f32 %v5353_v5, %v5352_v41 }
 0x62f   : > { %v5355_v20 = vrot.slane %v5354_v2, 1 }
 0x631   : > { %v5356_v1 = vadd.f32 %v5355_v20, %v5354_v2 }
 0x633   : > { %v5365_v39 = vmul.f32 0.015625, %v5356_v1 }
 0x635   : > { %v5387_v51 = vsel %vm5386_vm6, %v5365_v39, %v5385_v27 }
 0x636   : > { %5389 = vst.msk [vmem:[%s216_s26] sm:$0xff] %vm908_vm0, %v5387_v51 }
 0x637 PF: > { %s15_s15 = sadd.s32 1, %s6002_s15  }
 0x638   : > { %p12_p5 = scmp.ge.s32.totalorder %s15_s15, 4  }
 0x63a   :  { %14 = sbr.rel (!%p12_p5) target bundleno = 1 (0x1), region = 77 }

</bundles_post_ra>
